<compile_context>
chip_gen: v7x
topology: tpu7x:2x2x1
jax: 0.10.0
libtpu: 0.0.40
codegen_flags: <defaults>
</compile_context>

<pallas_src>
import functools

import jax
import jax.numpy as jnp
import numpy as np
from jax import lax
from jax.experimental import pallas as pl
from jax.experimental.pallas import tpu as pltpu


def _round_up(x, m):
    return ((x + m - 1) // m) * m


def _cdiv(a, b):
    return -(-a // b)


# ----------------------------------------------------------------------------
# Pallas kernel: both MLP heads fully fused, one batch-row tile per grid step.
# Weights are full-array VMEM-resident blocks (same block every step).
# ----------------------------------------------------------------------------
def _pgnn_kernel(obs_ref,
                 w1_ref, b1_ref,
                 w2p_ref, b2p_ref, w2v_ref, b2v_ref,
                 w3_ref, b3_ref,
                 out_ref, *, action_size, tanh_dtype):
    dt = w1_ref.dtype                       # matmul input dtype (bf16 or f32)
    x = obs_ref[...].astype(dt)

    # --- fused layer 1: [w1p | w1v] in one (IN, 2*H1_pad) matmul --------------
    # bf16 MXU inputs, f32 accumulation, f32 bias add; tanh in tanh_dtype
    # (bf16 on v6e/v7x for 2x EUP throughput, f32 on older chips).
    h1 = jnp.tanh((jnp.dot(x, w1_ref[...], preferred_element_type=jnp.float32)
                   + b1_ref[...]).astype(tanh_dtype)).astype(dt)

    h1_pad = w2p_ref.shape[0]               # padded hidden-1 width (512)
    h1p = h1[:, :h1_pad]                    # lane-aligned static slices
    h1v = h1[:, h1_pad:]

    # --- layer 2 per head ------------------------------------------------------
    h2p = jnp.tanh((jnp.dot(h1p, w2p_ref[...], preferred_element_type=jnp.float32)
                    + b2p_ref[...]).astype(tanh_dtype))
    h2v = jnp.tanh((jnp.dot(h1v, w2v_ref[...], preferred_element_type=jnp.float32)
                    + b2v_ref[...]).astype(tanh_dtype))

    # --- fused layer 3: ONE (tile, 2*H2_pad) x (2*H2_pad, 128) matmul ----------
    # 384 is a 128-multiple, so the concat is pure vreg placement (no XLU).
    #   lanes [0, A)  -> pi logits
    #   lane   A      -> value
    #   lanes (A,128) -> zero-padded
    h2 = jnp.concatenate([h2p, h2v], axis=-1).astype(dt)
    slab = (jnp.dot(h2, w3_ref[...], preferred_element_type=jnp.float32)
            + b3_ref[...])

    lane = lax.broadcasted_iota(jnp.int32, slab.shape, 1)
    is_logit = lane < action_size
    # numerically-stable softmax restricted to the logit lanes
    masked = jnp.where(is_logit, slab, jnp.float32(-1e30))
    m = jnp.max(masked, axis=-1, keepdims=True)
    e = jnp.exp(masked - m)
    inv = pl.reciprocal(jnp.sum(e, axis=-1, keepdims=True), approx=True)
    pi = e * inv                              # padded lanes -> exactly 0
    # keep the value lane from slab, softmax everywhere else
    out_ref[...] = jnp.where(lane == action_size, slab, pi).astype(out_ref.dtype)


# ----------------------------------------------------------------------------
# Param packing: pad hidden dims to lane multiples, fuse layer-1, stack the
# layer-3 weights into a single lane-dense slab weight. Done ONCE, off hot path.
# ----------------------------------------------------------------------------
def pack_pgnn_params(params, action_size, compute_dtype=jnp.bfloat16):
    w1p, b1p = params["w1p"], params["b1p"]
    w2p, b2p = params["w2p"], params["b2p"]
    w3p, b3p = params["w3p"], params["b3p"]
    w1v, b1v = params["w1v"], params["b1v"]
    w2v, b2v = params["w2v"], params["b2v"]
    w3v, b3v = params["w3v"], params["b3v"]

    in_size, h1 = w1p.shape
    h2 = w2p.shape[1]
    assert w1v.shape == (in_size, h1) and w2v.shape[1] == h2, \
        "packing assumes equal pi/v hidden sizes (rlpyt default)"

    h1_pad = _round_up(h1, 128)                 # 400 -> 512
    h2_pad = _round_up(h2, 128)                 # 300 -> 384
    out_w = _round_up(action_size + 1, 128)     # pi lanes + value lane -> 128
    assert action_size + 1 <= out_w

    def padw(w, r, c):
        return jnp.pad(w, ((0, r - w.shape[0]), (0, c - w.shape[1])))

    def padb(b, c):
        return jnp.pad(b, ((0, 0), (0, c - b.shape[1])))

    f32 = jnp.float32
    # fused layer 1: [pi | v] along the output (lane) axis, each padded to h1_pad
    w1 = jnp.concatenate([padw(w1p, in_size, h1_pad),
                          padw(w1v, in_size, h1_pad)], axis=1)
    b1 = jnp.concatenate([padb(b1p, h1_pad), padb(b1v, h1_pad)], axis=1)

    w2p_pk, b2p_pk = padw(w2p, h1_pad, h2_pad), padb(b2p, h2_pad)
    w2v_pk, b2v_pk = padw(w2v, h1_pad, h2_pad), padb(b2v, h2_pad)

    # layer 3 fused: stack pi/v weights vertically -> one (2*h2_pad, out_w) slab
    #   rows [0, h2)              x cols [0, A)   : pi logits
    #   rows [h2_pad, h2_pad+h2)  x col  A        : value
    w3 = (jnp.zeros((2 * h2_pad, out_w), f32)
          .at[:h2, :action_size].set(w3p)
          .at[h2_pad:h2_pad + h2, action_size:action_size + 1].set(w3v))
    b3 = (jnp.zeros((1, out_w), f32)
          .at[:, :action_size].set(b3p)
          .at[:, action_size:action_size + 1].set(b3v))

    cd = compute_dtype
    return {
        "w1": w1.astype(cd), "b1": b1.astype(f32),
        "w2p": w2p_pk.astype(cd), "b2p": b2p_pk.astype(f32),
        "w2v": w2v_pk.astype(cd), "b2v": b2v_pk.astype(f32),
        "w3": w3.astype(cd), "b3": b3.astype(f32),
    }


def _tanh_dtype_for_device(compute_dtype):
    """bf16 tanh only where the EUP supports it (v6e / v7x)."""
    if jnp.dtype(compute_dtype) == jnp.dtype(jnp.float32):
        return jnp.float32
    try:
        kind = jax.devices()[0].device_kind.lower()
    except Exception:
        kind = ""
    if any(g in kind for g in ("v2", "v3", "v4", "v5")):
        return jnp.float32          # no bf16 EUP/VPU -> casts would only hurt
    return jnp.bfloat16             # v6e / v7x


# ----------------------------------------------------------------------------
# pallas_call wrapper.
# ----------------------------------------------------------------------------
def pgnn_forward_pallas(obs_flat, packed, action_size, *, row_tile=512,
                        out_dtype=jnp.float32, tanh_dtype=None):
    """obs_flat: (N, IN) float32. Returns pi (N, A) f32, v (N,) f32.

    row_tile: 512 default (cap for v5e's single vst slot); 1024 is worth a
    sweep on v6e/v7x.  out_dtype=jnp.bfloat16 halves HBM writeback of the
    output slab for large N on v5e.
    """
    n, in_size = obs_flat.shape
    out_w = packed["w3"].shape[1]
    h1_pad2 = packed["w1"].shape[1]          # 2 * padded hidden-1
    h2_pad2 = packed["w3"].shape[0]          # 2 * padded hidden-2

    compute_dtype = packed["w1"].dtype
    if tanh_dtype is None:
        tanh_dtype = _tanh_dtype_for_device(compute_dtype)

    weight_keys = ("w1", "b1", "w2p", "b2p", "w2v", "b2v", "w3", "b3")
    weights = [packed[k] for k in weight_keys]
    w_bytes = sum(int(np.prod(w.shape)) * w.dtype.itemsize for w in weights)
    # TODO(synk): for very large observation sizes add an in_size-reduction grid
    # axis (tk ~ 512-1024, marked "arbitrary", h1 accumulated in VMEM scratch)
    # instead of keeping the fused w1 fully VMEM-resident.
    assert w_bytes <= (40 << 20), (
        f"packed weights ({w_bytes / 2**20:.1f} MiB) too large to stay "
        "VMEM-resident (v7x has 64 MiB); tile the in_size reduction instead")

    # Adaptive row tile: big tiles amortize the ~0.35us/step grid overhead and
    # feed the MXU; shrink for tiny batches so we don't pad 8 rows up to 512.
    tile = min(row_tile, _round_up(n, 8))
    tile = max(8, (tile // 8) * 8)
    # Ensure >= 2 grid steps when possible so dimension_semantics=("parallel",)
    # can split batch tiles across v7x's two TensorCores (no-op on 1-TC chips).
    if tile > 8 and _cdiv(n, tile) < 2:
        half = max(8, ((tile // 2) // 8) * 8)
        if _cdiv(n, half) >= 2:
            tile = half
    n_pad = _round_up(n, tile)
    grid = (n_pad // tile,)

    obs_p = jnp.pad(obs_flat.astype(jnp.float32), ((0, n_pad - n), (0, 0)))

    # Explicit VMEM budget from the footprint: pipelined row tiles + weights
    # (worst-case double-buffered) + a conservative bound on kernel temporaries.
    f32b = 4
    est = (tile * _round_up(in_size, 128) * f32b * 2           # obs tile, 2 bufs
           + tile * out_w * f32b * 2                           # out tile, 2 bufs
           + w_bytes * 2                                       # weights
           + 3 * tile * (h1_pad2 + 2 * h2_pad2 + 2 * out_w) * f32b  # temporaries
           + (4 << 20))
    vmem_limit = int(min(max(est, 16 << 20), 64 << 20))        # fits v7x physical

    def run(buffered_weights):
        def const_spec(a):
            idx = lambda i: (0, 0)
            if buffered_weights and hasattr(pl, "Buffered"):
                # Constant-index block: a single buffer is enough (no point
                # double-buffering a block that never changes index).
                return pl.BlockSpec(a.shape, idx, pipeline_mode=pl.Buffered(1))
            return pl.BlockSpec(a.shape, idx)

        in_specs = [pl.BlockSpec((tile, in_size), lambda i: (i, 0))]  # obs rows
        in_specs += [const_spec(w) for w in weights]
        out_spec = pl.BlockSpec((tile, out_w), lambda i: (i, 0))      # lane-dense

        return pl.pallas_call(
            functools.partial(_pgnn_kernel, action_size=action_size,
                              tanh_dtype=tanh_dtype),
            grid_spec=pltpu.PrefetchScalarGridSpec(
                num_scalar_prefetch=0,
                grid=grid,
                in_specs=in_specs,
                out_specs=out_spec,
            ),
            out_shape=jax.ShapeDtypeStruct((n_pad, out_w), out_dtype),
            compiler_params=pltpu.CompilerParams(
                dimension_semantics=("parallel",),      # shards tiles on v7x
                vmem_limit_bytes=vmem_limit),
        )(obs_p, *weights)

    try:
        out = run(buffered_weights=True)
    except Exception:
        # pl.Buffered(1) not supported by this jax/libtpu combo -> default specs
        # (known-good path; only costs the extra double-buffer VMEM).
        out = run(buffered_weights=False)

    # NOTE: for throughput-critical callers the slicing below should be fused
    # into the consumer instead of running as separate XLA slice kernels.
    pi = out[:n, :action_size].astype(jnp.float32)
    v = out[:n, action_size].astype(jnp.float32)
    return pi, v


# ----------------------------------------------------------------------------
# Module wrapper (plain-JAX glue): leading-dim handling + param init.
# ----------------------------------------------------------------------------
def init_pgnn_params(key, input_size, action_size, hidden_sizes=(400, 300)):
    """torch.nn.Linear-style init (uniform +-1/sqrt(fan_in)).
    Weights stored transposed: (fan_in, fan_out); biases as (1, fan_out)."""
    h1, h2 = hidden_sizes

    def linear(key, fan_in, fan_out):
        kw, kb = jax.random.split(key)
        bound = 1.0 / np.sqrt(fan_in)
        w = jax.random.uniform(kw, (fan_in, fan_out), jnp.float32, -bound, bound)
        b = jax.random.uniform(kb, (1, fan_out), jnp.float32, -bound, bound)
        return w, b

    keys = jax.random.split(key, 6)
    params = {}
    params["w1p"], params["b1p"] = linear(keys[0], input_size, h1)
    params["w2p"], params["b2p"] = linear(keys[1], h1, h2)
    params["w3p"], params["b3p"] = linear(keys[2], h2, action_size)
    params["w1v"], params["b1v"] = linear(keys[3], input_size, h1)
    params["w2v"], params["b2v"] = linear(keys[4], h1, h2)
    params["w3v"], params["b3v"] = linear(keys[5], h2, 1)
    return params


def model_pgnn_discrete_forward(observation, prev_action, prev_reward,
                                packed_params, obs_ndim, action_size,
                                row_tile=512, out_dtype=jnp.float32):
    """Mirrors ModelPgNNDiscrete.forward (prev_action / prev_reward unused)."""
    del prev_action, prev_reward
    # infer_leading_dims
    lead_shape = observation.shape[:observation.ndim - obs_ndim]
    lead_dim = len(lead_shape)
    tb = int(np.prod(lead_shape)) if lead_dim > 0 else 1
    obs_flat = observation.reshape(tb, -1).astype(jnp.float32)

    pi, v = pgnn_forward_pallas(obs_flat, packed_params, action_size,
                                row_tile=row_tile, out_dtype=out_dtype)

    # restore_leading_dims
    pi = pi.reshape(lead_shape + (action_size,))
    v = v.reshape(lead_shape)
    return pi, v


# ----------------------------------------------------------------------------
# Pure-JAX reference (for correctness check only) — uses the RAW params.
# ----------------------------------------------------------------------------
def _reference(obs_flat, params):
    x = obs_flat.astype(jnp.float32)
    h = jnp.tanh(x @ params["w1p"] + params["b1p"])
    h = jnp.tanh(h @ params["w2p"] + params["b2p"])
    logits = h @ params["w3p"] + params["b3p"]
    pi = jax.nn.softmax(logits, axis=-1)
    hv = jnp.tanh(x @ params["w1v"] + params["b1v"])
    hv = jnp.tanh(hv @ params["w2v"] + params["b2v"])
    v = (hv @ params["w3v"] + params["b3v"])[:, 0]
    return pi, v


if __name__ == "__main__":
    key = jax.random.PRNGKey(0)
    k_obs, k_par = jax.random.split(key)

    # Small example consistent with the module: observation_shape=(16,),
    # leading dims T=2, B=4, action_size=6, default hidden sizes [400, 300].
    T, B = 2, 4
    observation_shape = (16,)
    action_size = 6
    input_size = int(np.prod(observation_shape))

    observation = jax.random.normal(k_obs, (T, B) + observation_shape,
                                    jnp.float32)
    prev_action = jnp.zeros((T, B), jnp.int32)    # unused by forward
    prev_reward = jnp.zeros((T, B), jnp.float32)  # unused by forward

    params = init_pgnn_params(k_par, input_size, action_size)
    pi_ref, v_ref = _reference(observation.reshape(T * B, -1), params)

    # ---- default (bf16 MXU) path -------------------------------------------
    packed_bf16 = pack_pgnn_params(params, action_size)   # compute_dtype=bf16
    pi, v = model_pgnn_discrete_forward(observation, prev_action, prev_reward,
                                        packed_bf16,
                                        obs_ndim=len(observation_shape),
                                        action_size=action_size)
    pi = jax.block_until_ready(pi)
    v = jax.block_until_ready(v)

    assert pi.shape == (T, B, action_size), pi.shape
    assert v.shape == (T, B), v.shape

    np.testing.assert_allclose(np.asarray(pi).reshape(T * B, action_size),
                               np.asarray(pi_ref), rtol=2e-2, atol=2e-2)
    np.testing.assert_allclose(np.asarray(v).reshape(T * B),
                               np.asarray(v_ref), rtol=2e-2, atol=2e-2)
    np.testing.assert_allclose(np.asarray(pi).sum(-1), 1.0, rtol=1e-2, atol=1e-2)

    # ---- f32-packed sanity run: checks the packing/fusion math tightly ------
    packed_f32 = pack_pgnn_params(params, action_size,
                                  compute_dtype=jnp.float32)
    pi32, v32 = model_pgnn_discrete_forward(observation, prev_action,
                                            prev_reward, packed_f32,
                                            obs_ndim=len(observation_shape),
                                            action_size=action_size)
    pi32 = jax.block_until_ready(pi32)
    v32 = jax.block_until_ready(v32)
    np.testing.assert_allclose(np.asarray(v32).reshape(T * B),
                               np.asarray(v_ref), rtol=1e-5, atol=1e-5)
    np.testing.assert_allclose(np.asarray(pi32).reshape(T * B, action_size),
                               np.asarray(pi_ref), rtol=1e-2, atol=1e-2)

    print("KERNEL_OK")
</pallas_src>

<mosaic_0001>
module attributes {stable_mosaic.version = 11 : i64} {
  func.func @_pgnn_kernel(%arg0: i32, %arg1: memref<8x16xf32, #tpu.memory_space<vmem>>, %arg2: memref<16x1024xbf16, #tpu.memory_space<vmem>>, %arg3: memref<1x1024xf32, #tpu.memory_space<vmem>>, %arg4: memref<512x384xbf16, #tpu.memory_space<vmem>>, %arg5: memref<1x384xf32, #tpu.memory_space<vmem>>, %arg6: memref<512x384xbf16, #tpu.memory_space<vmem>>, %arg7: memref<1x384xf32, #tpu.memory_space<vmem>>, %arg8: memref<768x128xbf16, #tpu.memory_space<vmem>>, %arg9: memref<1x128xf32, #tpu.memory_space<vmem>>, %arg10: memref<8x128xf32, #tpu.memory_space<vmem>>) attributes {dimension_semantics = [#tpu.dimension_semantics<parallel>], iteration_bounds = array<i64: 1>, scalar_prefetch = 0 : i64, scratch_operands = 0 : i64, tpu.core_type = #tpu.core_type<tc>, window_params = [{transform_indices = @transform_0, window_bounds = array<i64: 8, 16>}, {pipeline_mode = #tpu.pipeline_mode<synchronous>, transform_indices = @transform_1, window_bounds = array<i64: 16, 1024>}, {pipeline_mode = #tpu.pipeline_mode<synchronous>, transform_indices = @transform_2, window_bounds = array<i64: 1, 1024>}, {pipeline_mode = #tpu.pipeline_mode<synchronous>, transform_indices = @transform_3, window_bounds = array<i64: 512, 384>}, {pipeline_mode = #tpu.pipeline_mode<synchronous>, transform_indices = @transform_4, window_bounds = array<i64: 1, 384>}, {pipeline_mode = #tpu.pipeline_mode<synchronous>, transform_indices = @transform_5, window_bounds = array<i64: 512, 384>}, {pipeline_mode = #tpu.pipeline_mode<synchronous>, transform_indices = @transform_6, window_bounds = array<i64: 1, 384>}, {pipeline_mode = #tpu.pipeline_mode<synchronous>, transform_indices = @transform_7, window_bounds = array<i64: 768, 128>}, {pipeline_mode = #tpu.pipeline_mode<synchronous>, transform_indices = @transform_8, window_bounds = array<i64: 1, 128>}, {transform_indices = @transform_9, window_bounds = array<i64: 8, 128>}]} {
    %c0 = arith.constant 0 : index
    %c0_0 = arith.constant 0 : index
    %0 = vector.load %arg1[%c0, %c0_0] : memref<8x16xf32, #tpu.memory_space<vmem>>, vector<8x16xf32>
    %1 = arith.truncf %0 : vector<8x16xf32> to vector<8x16xbf16>
    %c0_1 = arith.constant 0 : index
    %c0_2 = arith.constant 0 : index
    %2 = vector.load %arg2[%c0_1, %c0_2] : memref<16x1024xbf16, #tpu.memory_space<vmem>>, vector<16x1024xbf16>
    %cst = arith.constant dense<0.000000e+00> : vector<8x1024xf32>
    %3 = tpu.matmul %1, %2, %cst {dimension_numbers = #tpu.dot_dimension_numbers<[1], [0], [0], [1], [0, 0, 1, 1], [], []>} : vector<8x16xbf16>, vector<16x1024xbf16>, vector<8x1024xf32> -> vector<8x1024xf32>
    %c0_3 = arith.constant 0 : index
    %c0_4 = arith.constant 0 : index
    %4 = vector.load %arg3[%c0_3, %c0_4] : memref<1x1024xf32, #tpu.memory_space<vmem>>, vector<1x1024xf32>
    %5 = vector.broadcast %4 : vector<1x1024xf32> to vector<8x1024xf32>
    %6 = arith.addf %3, %5 : vector<8x1024xf32>
    %7 = arith.truncf %6 : vector<8x1024xf32> to vector<8x1024xbf16>
    %8 = math.tanh %7 : vector<8x1024xbf16>
    %9 = vector.extract_strided_slice %8 {offsets = [0, 0], sizes = [8, 512], strides = [1, 1]} : vector<8x1024xbf16> to vector<8x512xbf16>
    %10 = vector.extract_strided_slice %8 {offsets = [0, 512], sizes = [8, 512], strides = [1, 1]} : vector<8x1024xbf16> to vector<8x512xbf16>
    %c0_5 = arith.constant 0 : index
    %c0_6 = arith.constant 0 : index
    %11 = vector.load %arg4[%c0_5, %c0_6] : memref<512x384xbf16, #tpu.memory_space<vmem>>, vector<512x384xbf16>
    %cst_7 = arith.constant dense<0.000000e+00> : vector<8x384xf32>
    %12 = tpu.matmul %9, %11, %cst_7 {dimension_numbers = #tpu.dot_dimension_numbers<[1], [0], [0], [1], [0, 0, 1, 1], [], []>} : vector<8x512xbf16>, vector<512x384xbf16>, vector<8x384xf32> -> vector<8x384xf32>
    %c0_8 = arith.constant 0 : index
    %c0_9 = arith.constant 0 : index
    %13 = vector.load %arg5[%c0_8, %c0_9] : memref<1x384xf32, #tpu.memory_space<vmem>>, vector<1x384xf32>
    %14 = vector.broadcast %13 : vector<1x384xf32> to vector<8x384xf32>
    %15 = arith.addf %12, %14 : vector<8x384xf32>
    %16 = arith.truncf %15 : vector<8x384xf32> to vector<8x384xbf16>
    %17 = math.tanh %16 : vector<8x384xbf16>
    %c0_10 = arith.constant 0 : index
    %c0_11 = arith.constant 0 : index
    %18 = vector.load %arg6[%c0_10, %c0_11] : memref<512x384xbf16, #tpu.memory_space<vmem>>, vector<512x384xbf16>
    %cst_12 = arith.constant dense<0.000000e+00> : vector<8x384xf32>
    %19 = tpu.matmul %10, %18, %cst_12 {dimension_numbers = #tpu.dot_dimension_numbers<[1], [0], [0], [1], [0, 0, 1, 1], [], []>} : vector<8x512xbf16>, vector<512x384xbf16>, vector<8x384xf32> -> vector<8x384xf32>
    %c0_13 = arith.constant 0 : index
    %c0_14 = arith.constant 0 : index
    %20 = vector.load %arg7[%c0_13, %c0_14] : memref<1x384xf32, #tpu.memory_space<vmem>>, vector<1x384xf32>
    %21 = vector.broadcast %20 : vector<1x384xf32> to vector<8x384xf32>
    %22 = arith.addf %19, %21 : vector<8x384xf32>
    %23 = arith.truncf %22 : vector<8x384xf32> to vector<8x384xbf16>
    %24 = math.tanh %23 : vector<8x384xbf16>
    %25 = tpu.concatenate %17, %24 in 1 : vector<8x384xbf16>, vector<8x384xbf16> -> vector<8x768xbf16>
    %c0_15 = arith.constant 0 : index
    %c0_16 = arith.constant 0 : index
    %26 = vector.load %arg8[%c0_15, %c0_16] : memref<768x128xbf16, #tpu.memory_space<vmem>>, vector<768x128xbf16>
    %cst_17 = arith.constant dense<0.000000e+00> : vector<8x128xf32>
    %27 = tpu.matmul %25, %26, %cst_17 {dimension_numbers = #tpu.dot_dimension_numbers<[1], [0], [0], [1], [0, 0, 1, 1], [], []>} : vector<8x768xbf16>, vector<768x128xbf16>, vector<8x128xf32> -> vector<8x128xf32>
    %c0_18 = arith.constant 0 : index
    %c0_19 = arith.constant 0 : index
    %28 = vector.load %arg9[%c0_18, %c0_19] : memref<1x128xf32, #tpu.memory_space<vmem>>, vector<1x128xf32>
    %29 = vector.broadcast %28 : vector<1x128xf32> to vector<8x128xf32>
    %30 = arith.addf %27, %29 : vector<8x128xf32>
    %31 = tpu.iota {dimensions = array<i32: 1>} : vector<8x128xi32>
    %c6_i32 = arith.constant 6 : i32
    %32 = vector.broadcast %c6_i32 : i32 to vector<8x128xi32>
    %33 = arith.cmpi slt, %31, %32 : vector<8x128xi32>
    %cst_20 = arith.constant -1.000000e+30 : f32
    %34 = vector.broadcast %cst_20 : f32 to vector<8x128xf32>
    %35 = arith.select %33, %30, %34 : vector<8x128xi1>, vector<8x128xf32>
    %cst_21 = arith.constant dense<0xFF800000> : vector<8xf32>
    %36 = vector.multi_reduction <maximumf>, %35, %cst_21 [1] : vector<8x128xf32> to vector<8xf32>
    %37 = vector.shape_cast %36 : vector<8xf32> to vector<8x1xf32>
    %38 = vector.broadcast %37 : vector<8x1xf32> to vector<8x128xf32>
    %39 = arith.subf %35, %38 : vector<8x128xf32>
    %40 = math.exp %39 : vector<8x128xf32>
    %cst_22 = arith.constant dense<0.000000e+00> : vector<8xf32>
    %41 = vector.multi_reduction <add>, %40, %cst_22 [1] : vector<8x128xf32> to vector<8xf32>
    %42 = vector.shape_cast %41 : vector<8xf32> to vector<8x1xf32>
    %43 = tpu.reciprocal %42 {approx = true} : vector<8x1xf32> -> vector<8x1xf32>
    %44 = vector.broadcast %43 : vector<8x1xf32> to vector<8x128xf32>
    %45 = arith.mulf %40, %44 : vector<8x128xf32>
    %c6_i32_23 = arith.constant 6 : i32
    %46 = vector.broadcast %c6_i32_23 : i32 to vector<8x128xi32>
    %47 = arith.cmpi eq, %31, %46 : vector<8x128xi32>
    %48 = arith.select %47, %30, %45 : vector<8x128xi1>, vector<8x128xf32>
    %c0_24 = arith.constant 0 : index
    %c0_25 = arith.constant 0 : index
    %49 = vector.load %arg10[%c0_24, %c0_25] : memref<8x128xf32, #tpu.memory_space<vmem>>, vector<8x128xf32>
    tpu.vector_store %arg10[%c0_24, %c0_25], %48 {strides = array<i32>} : memref<8x128xf32, #tpu.memory_space<vmem>>, vector<8x128xf32>,
    return
  }
  func.func @transform_0(%arg0: i32) -> (i32, i32) {
    %c0_i32 = arith.constant 0 : i32
    %c0_i32_0 = arith.constant 0 : i32
    return %arg0, %c0_i32 : i32, i32
  }
  func.func @transform_1(%arg0: i32) -> (i32, i32) {
    %c0_i32 = arith.constant 0 : i32
    %c0_i32_0 = arith.constant 0 : i32
    %c0_i32_1 = arith.constant 0 : i32
    return %c0_i32, %c0_i32_0 : i32, i32
  }
  func.func @transform_2(%arg0: i32) -> (i32, i32) {
    %c0_i32 = arith.constant 0 : i32
    %c0_i32_0 = arith.constant 0 : i32
    %c0_i32_1 = arith.constant 0 : i32
    return %c0_i32, %c0_i32_0 : i32, i32
  }
  func.func @transform_3(%arg0: i32) -> (i32, i32) {
    %c0_i32 = arith.constant 0 : i32
    %c0_i32_0 = arith.constant 0 : i32
    %c0_i32_1 = arith.constant 0 : i32
    return %c0_i32, %c0_i32_0 : i32, i32
  }
  func.func @transform_4(%arg0: i32) -> (i32, i32) {
    %c0_i32 = arith.constant 0 : i32
    %c0_i32_0 = arith.constant 0 : i32
    %c0_i32_1 = arith.constant 0 : i32
    return %c0_i32, %c0_i32_0 : i32, i32
  }
  func.func @transform_5(%arg0: i32) -> (i32, i32) {
    %c0_i32 = arith.constant 0 : i32
    %c0_i32_0 = arith.constant 0 : i32
    %c0_i32_1 = arith.constant 0 : i32
    return %c0_i32, %c0_i32_0 : i32, i32
  }
  func.func @transform_6(%arg0: i32) -> (i32, i32) {
    %c0_i32 = arith.constant 0 : i32
    %c0_i32_0 = arith.constant 0 : i32
    %c0_i32_1 = arith.constant 0 : i32
    return %c0_i32, %c0_i32_0 : i32, i32
  }
  func.func @transform_7(%arg0: i32) -> (i32, i32) {
    %c0_i32 = arith.constant 0 : i32
    %c0_i32_0 = arith.constant 0 : i32
    %c0_i32_1 = arith.constant 0 : i32
    return %c0_i32, %c0_i32_0 : i32, i32
  }
  func.func @transform_8(%arg0: i32) -> (i32, i32) {
    %c0_i32 = arith.constant 0 : i32
    %c0_i32_0 = arith.constant 0 : i32
    %c0_i32_1 = arith.constant 0 : i32
    return %c0_i32, %c0_i32_0 : i32, i32
  }
  func.func @transform_9(%arg0: i32) -> (i32, i32) {
    %c0_i32 = arith.constant 0 : i32
    %c0_i32_0 = arith.constant 0 : i32
    return %arg0, %c0_i32 : i32, i32
  }
}

module attributes {stable_mosaic.version = 11 : i64} {
  func.func @_pgnn_kernel(%arg0: i32, %arg1: memref<8x16xf32, #tpu.memory_space<vmem>>, %arg2: memref<16x1024xbf16, #tpu.memory_space<vmem>>, %arg3: memref<1x1024xf32, #tpu.memory_space<vmem>>, %arg4: memref<512x384xbf16, #tpu.memory_space<vmem>>, %arg5: memref<1x384xf32, #tpu.memory_space<vmem>>, %arg6: memref<512x384xbf16, #tpu.memory_space<vmem>>, %arg7: memref<1x384xf32, #tpu.memory_space<vmem>>, %arg8: memref<768x128xbf16, #tpu.memory_space<vmem>>, %arg9: memref<1x128xf32, #tpu.memory_space<vmem>>, %arg10: memref<8x128xf32, #tpu.memory_space<vmem>>) attributes {dimension_semantics = [#tpu.dimension_semantics<parallel>], iteration_bounds = array<i64: 1>, scalar_prefetch = 0 : i64, scratch_operands = 0 : i64, tpu.core_type = #tpu.core_type<tc>, window_params = [{transform_indices = @transform_0, window_bounds = array<i64: 8, 16>}, {pipeline_mode = #tpu.pipeline_mode<synchronous>, transform_indices = @transform_1, window_bounds = array<i64: 16, 1024>}, {pipeline_mode = #tpu.pipeline_mode<synchronous>, transform_indices = @transform_2, window_bounds = array<i64: 1, 1024>}, {pipeline_mode = #tpu.pipeline_mode<synchronous>, transform_indices = @transform_3, window_bounds = array<i64: 512, 384>}, {pipeline_mode = #tpu.pipeline_mode<synchronous>, transform_indices = @transform_4, window_bounds = array<i64: 1, 384>}, {pipeline_mode = #tpu.pipeline_mode<synchronous>, transform_indices = @transform_5, window_bounds = array<i64: 512, 384>}, {pipeline_mode = #tpu.pipeline_mode<synchronous>, transform_indices = @transform_6, window_bounds = array<i64: 1, 384>}, {pipeline_mode = #tpu.pipeline_mode<synchronous>, transform_indices = @transform_7, window_bounds = array<i64: 768, 128>}, {pipeline_mode = #tpu.pipeline_mode<synchronous>, transform_indices = @transform_8, window_bounds = array<i64: 1, 128>}, {transform_indices = @transform_9, window_bounds = array<i64: 8, 128>}]} {
    %c0 = arith.constant 0 : index
    %c0_0 = arith.constant 0 : index
    %0 = vector.load %arg1[%c0, %c0_0] : memref<8x16xf32, #tpu.memory_space<vmem>>, vector<8x16xf32>
    %1 = arith.truncf %0 : vector<8x16xf32> to vector<8x16xbf16>
    %c0_1 = arith.constant 0 : index
    %c0_2 = arith.constant 0 : index
    %2 = vector.load %arg2[%c0_1, %c0_2] : memref<16x1024xbf16, #tpu.memory_space<vmem>>, vector<16x1024xbf16>
    %cst = arith.constant dense<0.000000e+00> : vector<8x1024xf32>
    %3 = tpu.matmul %1, %2, %cst {dimension_numbers = #tpu.dot_dimension_numbers<[1], [0], [0], [1], [0, 0, 1, 1], [], []>} : vector<8x16xbf16>, vector<16x1024xbf16>, vector<8x1024xf32> -> vector<8x1024xf32>
    %c0_3 = arith.constant 0 : index
    %c0_4 = arith.constant 0 : index
    %4 = vector.load %arg3[%c0_3, %c0_4] : memref<1x1024xf32, #tpu.memory_space<vmem>>, vector<1x1024xf32>
    %5 = vector.broadcast %4 : vector<1x1024xf32> to vector<8x1024xf32>
    %6 = arith.addf %3, %5 : vector<8x1024xf32>
    %7 = arith.truncf %6 : vector<8x1024xf32> to vector<8x1024xbf16>
    %8 = math.tanh %7 : vector<8x1024xbf16>
    %9 = vector.extract_strided_slice %8 {offsets = [0, 0], sizes = [8, 512], strides = [1, 1]} : vector<8x1024xbf16> to vector<8x512xbf16>
    %10 = vector.extract_strided_slice %8 {offsets = [0, 512], sizes = [8, 512], strides = [1, 1]} : vector<8x1024xbf16> to vector<8x512xbf16>
    %c0_5 = arith.constant 0 : index
    %c0_6 = arith.constant 0 : index
    %11 = vector.load %arg4[%c0_5, %c0_6] : memref<512x384xbf16, #tpu.memory_space<vmem>>, vector<512x384xbf16>
    %cst_7 = arith.constant dense<0.000000e+00> : vector<8x384xf32>
    %12 = tpu.matmul %9, %11, %cst_7 {dimension_numbers = #tpu.dot_dimension_numbers<[1], [0], [0], [1], [0, 0, 1, 1], [], []>} : vector<8x512xbf16>, vector<512x384xbf16>, vector<8x384xf32> -> vector<8x384xf32>
    %c0_8 = arith.constant 0 : index
    %c0_9 = arith.constant 0 : index
    %13 = vector.load %arg5[%c0_8, %c0_9] : memref<1x384xf32, #tpu.memory_space<vmem>>, vector<1x384xf32>
    %14 = vector.broadcast %13 : vector<1x384xf32> to vector<8x384xf32>
    %15 = arith.addf %12, %14 : vector<8x384xf32>
    %16 = arith.truncf %15 : vector<8x384xf32> to vector<8x384xbf16>
    %17 = math.tanh %16 : vector<8x384xbf16>
    %c0_10 = arith.constant 0 : index
    %c0_11 = arith.constant 0 : index
    %18 = vector.load %arg6[%c0_10, %c0_11] : memref<512x384xbf16, #tpu.memory_space<vmem>>, vector<512x384xbf16>
    %cst_12 = arith.constant dense<0.000000e+00> : vector<8x384xf32>
    %19 = tpu.matmul %10, %18, %cst_12 {dimension_numbers = #tpu.dot_dimension_numbers<[1], [0], [0], [1], [0, 0, 1, 1], [], []>} : vector<8x512xbf16>, vector<512x384xbf16>, vector<8x384xf32> -> vector<8x384xf32>
    %c0_13 = arith.constant 0 : index
    %c0_14 = arith.constant 0 : index
    %20 = vector.load %arg7[%c0_13, %c0_14] : memref<1x384xf32, #tpu.memory_space<vmem>>, vector<1x384xf32>
    %21 = vector.broadcast %20 : vector<1x384xf32> to vector<8x384xf32>
    %22 = arith.addf %19, %21 : vector<8x384xf32>
    %23 = arith.truncf %22 : vector<8x384xf32> to vector<8x384xbf16>
    %24 = math.tanh %23 : vector<8x384xbf16>
    %25 = tpu.concatenate %17, %24 in 1 : vector<8x384xbf16>, vector<8x384xbf16> -> vector<8x768xbf16>
    %c0_15 = arith.constant 0 : index
    %c0_16 = arith.constant 0 : index
    %26 = vector.load %arg8[%c0_15, %c0_16] : memref<768x128xbf16, #tpu.memory_space<vmem>>, vector<768x128xbf16>
    %cst_17 = arith.constant dense<0.000000e+00> : vector<8x128xf32>
    %27 = tpu.matmul %25, %26, %cst_17 {dimension_numbers = #tpu.dot_dimension_numbers<[1], [0], [0], [1], [0, 0, 1, 1], [], []>} : vector<8x768xbf16>, vector<768x128xbf16>, vector<8x128xf32> -> vector<8x128xf32>
    %c0_18 = arith.constant 0 : index
    %c0_19 = arith.constant 0 : index
    %28 = vector.load %arg9[%c0_18, %c0_19] : memref<1x128xf32, #tpu.memory_space<vmem>>, vector<1x128xf32>
    %29 = vector.broadcast %28 : vector<1x128xf32> to vector<8x128xf32>
    %30 = arith.addf %27, %29 : vector<8x128xf32>
    %31 = tpu.iota {dimensions = array<i32: 1>} : vector<8x128xi32>
    %c6_i32 = arith.constant 6 : i32
    %32 = vector.broadcast %c6_i32 : i32 to vector<8x128xi32>
    %33 = arith.cmpi slt, %31, %32 : vector<8x128xi32>
    %cst_20 = arith.constant -1.000000e+30 : f32
    %34 = vector.broadcast %cst_20 : f32 to vector<8x128xf32>
    %35 = arith.select %33, %30, %34 : vector<8x128xi1>, vector<8x128xf32>
    %cst_21 = arith.constant dense<0xFF800000> : vector<8xf32>
    %36 = vector.multi_reduction <maximumf>, %35, %cst_21 [1] : vector<8x128xf32> to vector<8xf32>
    %37 = vector.shape_cast %36 : vector<8xf32> to vector<8x1xf32>
    %38 = vector.broadcast %37 : vector<8x1xf32> to vector<8x128xf32>
    %39 = arith.subf %35, %38 : vector<8x128xf32>
    %40 = math.exp %39 : vector<8x128xf32>
    %cst_22 = arith.constant dense<0.000000e+00> : vector<8xf32>
    %41 = vector.multi_reduction <add>, %40, %cst_22 [1] : vector<8x128xf32> to vector<8xf32>
    %42 = vector.shape_cast %41 : vector<8xf32> to vector<8x1xf32>
    %43 = tpu.reciprocal %42 {approx = true} : vector<8x1xf32> -> vector<8x1xf32>
    %44 = vector.broadcast %43 : vector<8x1xf32> to vector<8x128xf32>
    %45 = arith.mulf %40, %44 : vector<8x128xf32>
    %c6_i32_23 = arith.constant 6 : i32
    %46 = vector.broadcast %c6_i32_23 : i32 to vector<8x128xi32>
    %47 = arith.cmpi eq, %31, %46 : vector<8x128xi32>
    %48 = arith.select %47, %30, %45 : vector<8x128xi1>, vector<8x128xf32>
    %c0_24 = arith.constant 0 : index
    %c0_25 = arith.constant 0 : index
    %49 = vector.load %arg10[%c0_24, %c0_25] : memref<8x128xf32, #tpu.memory_space<vmem>>, vector<8x128xf32>
    tpu.vector_store %arg10[%c0_24, %c0_25], %48 {strides = array<i32>} : memref<8x128xf32, #tpu.memory_space<vmem>>, vector<8x128xf32>,
    return
  }
  func.func @transform_0(%arg0: i32) -> (i32, i32) {
    %c0_i32 = arith.constant 0 : i32
    %c0_i32_0 = arith.constant 0 : i32
    return %arg0, %c0_i32 : i32, i32
  }
  func.func @transform_1(%arg0: i32) -> (i32, i32) {
    %c0_i32 = arith.constant 0 : i32
    %c0_i32_0 = arith.constant 0 : i32
    %c0_i32_1 = arith.constant 0 : i32
    return %c0_i32, %c0_i32_0 : i32, i32
  }
  func.func @transform_2(%arg0: i32) -> (i32, i32) {
    %c0_i32 = arith.constant 0 : i32
    %c0_i32_0 = arith.constant 0 : i32
    %c0_i32_1 = arith.constant 0 : i32
    return %c0_i32, %c0_i32_0 : i32, i32
  }
  func.func @transform_3(%arg0: i32) -> (i32, i32) {
    %c0_i32 = arith.constant 0 : i32
    %c0_i32_0 = arith.constant 0 : i32
    %c0_i32_1 = arith.constant 0 : i32
    return %c0_i32, %c0_i32_0 : i32, i32
  }
  func.func @transform_4(%arg0: i32) -> (i32, i32) {
    %c0_i32 = arith.constant 0 : i32
    %c0_i32_0 = arith.constant 0 : i32
    %c0_i32_1 = arith.constant 0 : i32
    return %c0_i32, %c0_i32_0 : i32, i32
  }
  func.func @transform_5(%arg0: i32) -> (i32, i32) {
    %c0_i32 = arith.constant 0 : i32
    %c0_i32_0 = arith.constant 0 : i32
    %c0_i32_1 = arith.constant 0 : i32
    return %c0_i32, %c0_i32_0 : i32, i32
  }
  func.func @transform_6(%arg0: i32) -> (i32, i32) {
    %c0_i32 = arith.constant 0 : i32
    %c0_i32_0 = arith.constant 0 : i32
    %c0_i32_1 = arith.constant 0 : i32
    return %c0_i32, %c0_i32_0 : i32, i32
  }
  func.func @transform_7(%arg0: i32) -> (i32, i32) {
    %c0_i32 = arith.constant 0 : i32
    %c0_i32_0 = arith.constant 0 : i32
    %c0_i32_1 = arith.constant 0 : i32
    return %c0_i32, %c0_i32_0 : i32, i32
  }
  func.func @transform_8(%arg0: i32) -> (i32, i32) {
    %c0_i32 = arith.constant 0 : i32
    %c0_i32_0 = arith.constant 0 : i32
    %c0_i32_1 = arith.constant 0 : i32
    return %c0_i32, %c0_i32_0 : i32, i32
  }
  func.func @transform_9(%arg0: i32) -> (i32, i32) {
    %c0_i32 = arith.constant 0 : i32
    %c0_i32_0 = arith.constant 0 : i32
    return %arg0, %c0_i32 : i32, i32
  }
}

</mosaic_0001>

<bundles_post_ra>
// kernel: tpu_custom_call.1
= control target key start
LH: loop header
LB: loop body
LE: loop exit
PB: predicated region body
PF: predicated region fallthrough
CT: control target
= control target key end

     0   :  { %14 = vsyncpa [#allocation3], 0  ;;  %s3752_s0 = inlined_call_operand.hbm [shape: f32[8,16], index: 0, kind: input, shape index: {}]   ;;  %s3753_s1 = inlined_call_operand.hbm [shape: bf16[16,1024], index: 1, kind: input, shape index: {}]   ;;  %s3754_s2 = inlined_call_operand.hbm [shape: f32[1,1024], index: 2, kind: input, shape index: {}]   ;;  %s3755_s3 = inlined_call_operand.hbm [shape: bf16[512,384], index: 3, kind: input, shape index: {}]   ;;  %s3756_s4 = inlined_call_operand.vmem [shape: f32[1,384], index: 4, kind: input, shape index: {}]   ;;  %s3757_s5 = inlined_call_operand.hbm [shape: bf16[512,384], index: 5, kind: input, shape index: {}]   ;;  %s3758_s6 = inlined_call_operand.vmem [shape: f32[1,384], index: 6, kind: input, shape index: {}]   ;;  %s3759_s7 = inlined_call_operand.hbm [shape: bf16[768,128], index: 7, kind: input, shape index: {}]   ;;  %s3760_s8 = inlined_call_operand.vmem [shape: f32[1,128], index: 8, kind: input, shape index: {}]   ;;  %s3761_s9 = inlined_call_operand.hbm [shape: f32[8,128], index: 9, kind: output, shape index: {}]  }
   0x1   :  { %15 = vsyncpa [#allocation6], 0 }
   0x2   :  { %16 = vsyncpa [#allocation9], 0 }
   0x3   :  { %17 = vsyncpa [#allocation12], 0 }
   0x4   :  { %18 = vsyncpa [#allocation4], 0  ;;  %s3516_s30 = smov [#allocation5]   ;;  %s3352_s13 = scalar_lea.hbm %s3753_s1, 1024 }
   0x5   :  { %s34_s10 = sshll.u32 %s3516_s30, 4  ;;  %p3353_p0 = scmp.ne.s32.totalorder %s3753_s1, %s3352_s13  ;;  %s35_s10 = int_to_ptr.vmem [resolvable:$true] %s34_s10 }
   0x6   :  { %p3356_p1 = scmp.lt.u32.totalorder %s3352_s13, %s3753_s1 }
   0x8   :  { %p3358_p2 = pnand %p3356_p1, %p3353_p0 }
   0xa   :  { %3361 = shalt.err (!%p3358_p2)
}
   0xb   :  { %s3362_s18 = scalar_lea.vmem %s35_s10, 1024  ;;  %p3367_p4 = scmp.lt.s32.totalorder %s35_s10, %s35_s10 }
   0xc   :  { %p3363_p3 = scmp.ne.s32.totalorder %s35_s10, %s3362_s18  ;;  %p3368_p5 = scmp.lt.s32.totalorder %s3362_s18, %s3362_s18 }
   0xe   :  { %p3369_p6 = por %p3368_p5, %p3367_p4 }
  0x10   :  { %p3370_p7 = pnand %p3369_p6, %p3363_p3 }
  0x12   :  { %3373 = shalt.err (!%p3370_p7)
}
  0x13   :  { %s3517_s19 = smov 512   ;;  %s3518_s20 = smov 32  }
  0x14   :  { %40 = dma.hbm_to_vmem [thread:$0]  %s3753_s1, 1024, %s35_s10, [#allocation6], %s3517_s19, %s3517_s19, %s3518_s20  }
  0x15   :  { %s3519_s23 = smov [#allocation8]   ;;  %s3374_s27 = scalar_lea.hbm %s3755_s3, 12288 }
  0x16   :  { %s56_s24 = sshll.u32 %s3519_s23, 4  ;;  %p3375_p8 = scmp.ne.s32.totalorder %s3755_s3, %s3374_s27  ;;  %s57_s24 = int_to_ptr.vmem [resolvable:$true] %s56_s24 }
  0x17   :  { %p3378_p9 = scmp.lt.u32.totalorder %s3374_s27, %s3755_s3 }
  0x19   :  { %p3380_p10 = pnand %p3378_p9, %p3375_p8 }
  0x1b   :  { %3383 = shalt.err (!%p3380_p10)
}
  0x1c   :  { %s3384_s12 = scalar_lea.vmem %s57_s24, 12288  ;;  %p3389_p12 = scmp.lt.s32.totalorder %s57_s24, %s57_s24 }
  0x1d   :  { %p3385_p11 = scmp.ne.s32.totalorder %s57_s24, %s3384_s12  ;;  %p3390_p13 = scmp.lt.s32.totalorder %s3384_s12, %s3384_s12 }
  0x1f   :  { %p3391_p0 = por %p3390_p13, %p3389_p12 }
  0x21   :  { %p3392_p1 = pnand %p3391_p0, %p3385_p11 }
  0x23   :  { %3395 = shalt.err (!%p3392_p1)
}
  0x24   :  { %s3520_s1 = smov 192   ;;  %s3521_s10 = smov 12  }
  0x25   :  { %62 = dma.hbm_to_vmem [thread:$0]  %s3755_s3, 12288, %s57_s24, [#allocation9], %s3520_s1, %s3520_s1, %s3521_s10  }
  0x26   :  { %s3522_s15 = smov [#allocation2]   ;;  %s3523_s17 = smov [#allocation7]  }
  0x27   :  { %s25_s16 = sshll.u32 %s3522_s15, 4  ;;  %s47_s18 = sshll.u32 %s3523_s17, 4  ;;  %s26_s16 = int_to_ptr.vmem [resolvable:$true] %s25_s16  ;;  %s48_s18 = int_to_ptr.vmem [resolvable:$true] %s47_s18 }
  0x28   :  { %s3396_s21 = scalar_lea.hbm %s3752_s0, 128 }
  0x29   :  { %p3397_p2 = scmp.ne.s32.totalorder %s3752_s0, %s3396_s21  ;;  %p3400_p3 = scmp.lt.u32.totalorder %s3396_s21, %s3752_s0 }
  0x2b   :  { %p3402_p4 = pnand %p3400_p3, %p3397_p2 }
  0x2d   :  { %3405 = shalt.err (!%p3402_p4)
}
  0x2e   :  { %s3406_s3 = scalar_lea.vmem %s26_s16, 128  ;;  %p3411_p6 = scmp.lt.s32.totalorder %s26_s16, %s26_s16 }
  0x2f   :  { %p3407_p5 = scmp.ne.s32.totalorder %s26_s16, %s3406_s3  ;;  %p3412_p7 = scmp.lt.s32.totalorder %s3406_s3, %s3406_s3 }
  0x31   :  { %p3413_p8 = por %p3412_p7, %p3411_p6 }
  0x33   :  { %p3414_p9 = pnand %p3413_p8, %p3407_p5 }
  0x35   :  { %3417 = shalt.err (!%p3414_p9)
}
  0x36   :  { %28 = dma.hbm_to_vmem [thread:$0]  %s3752_s0, 128, %s26_s16, [#allocation3]  }
  0x37   :  { %s3418_s30 = scalar_lea.hbm %s3754_s2, 128 }
  0x38   :  { %p3419_p10 = scmp.ne.s32.totalorder %s3754_s2, %s3418_s30  ;;  %p3422_p11 = scmp.lt.u32.totalorder %s3418_s30, %s3754_s2 }
  0x3a   :  { %p3424_p12 = pnand %p3422_p11, %p3419_p10 }
  0x3c   :  { %3427 = shalt.err (!%p3424_p12)
}
  0x3d   :  { %s3428_s15 = scalar_lea.vmem %s48_s18, 128  ;;  %p3433_p0 = scmp.lt.s32.totalorder %s48_s18, %s48_s18 }
  0x3e   :  { %p3429_p13 = scmp.ne.s32.totalorder %s48_s18, %s3428_s15  ;;  %p3434_p1 = scmp.lt.s32.totalorder %s3428_s15, %s3428_s15 }
  0x40   :  { %p3435_p2 = por %p3434_p1, %p3433_p0 }
  0x42   :  { %p3436_p3 = pnand %p3435_p2, %p3429_p13 }
  0x44   :  { %3439 = shalt.err (!%p3436_p3)
}
  0x45   :  { %50 = dma.hbm_to_vmem [thread:$0]  %s3754_s2, 128, %s48_s18, [#allocation6]  }
  0x46   :  { %s3524_s17 = smov [#allocation10]   ;;  %s3525_s20 = smov [#allocation11]  }
  0x47   :  { %s70_s19 = sshll.u32 %s3524_s17, 4  ;;  %s84_s21 = sshll.u32 %s3525_s20, 4  ;;  %s71_s19 = int_to_ptr.vmem [resolvable:$true] %s70_s19  ;;  %s3631_s21 = int_to_ptr.vmem [resolvable:$true] %s84_s21 }
  0x48   :  { %s3440_s25 = scalar_lea.hbm %s3757_s5, 12288 }
  0x49   :  { %p3441_p4 = scmp.ne.s32.totalorder %s3757_s5, %s3440_s25  ;;  %p3444_p5 = scmp.lt.u32.totalorder %s3440_s25, %s3757_s5 }
  0x4b   :  { %p3446_p6 = pnand %p3444_p5, %p3441_p4 }
  0x4d   :  { %3449 = shalt.err (!%p3446_p6)
}
  0x4e   :  { %s3450_s2 = scalar_lea.vmem %s71_s19, 12288  ;;  %p3455_p8 = scmp.lt.s32.totalorder %s71_s19, %s71_s19 }
  0x4f   :  { %p3451_p7 = scmp.ne.s32.totalorder %s71_s19, %s3450_s2  ;;  %p3456_p9 = scmp.lt.s32.totalorder %s3450_s2, %s3450_s2 }
  0x51   :  { %p3457_p10 = por %p3456_p9, %p3455_p8 }
  0x53   :  { %p3458_p11 = pnand %p3457_p10, %p3451_p7 }
  0x55   :  { %3461 = shalt.err (!%p3458_p11)
}
  0x56   :  { %76 = dma.hbm_to_vmem [thread:$0]  %s3757_s5, 12288, %s71_s19, [#allocation9], %s3520_s1, %s3520_s1, %s3521_s10  }
  0x57   :  { %s3462_s11 = scalar_lea.hbm %s3759_s7, 6144 }
  0x58   :  { %p3463_p12 = scmp.ne.s32.totalorder %s3759_s7, %s3462_s11  ;;  %p3466_p13 = scmp.lt.u32.totalorder %s3462_s11, %s3759_s7 }
  0x5a   :  { %p3468_p0 = pnand %p3466_p13, %p3463_p12 }
  0x5c   :  { %3471 = shalt.err (!%p3468_p0)
}
  0x5d   :  { %s3472_s0 = scalar_lea.vmem %s3631_s21, 6144  ;;  %p3477_p2 = scmp.lt.s32.totalorder %s3631_s21, %s3631_s21 }
  0x5e   :  { %p3473_p1 = scmp.ne.s32.totalorder %s3631_s21, %s3472_s0  ;;  %p3478_p3 = scmp.lt.s32.totalorder %s3472_s0, %s3472_s0 }
  0x60   :  { %p3479_p4 = por %p3478_p3, %p3477_p2 }
  0x62   :  { %p3480_p5 = pnand %p3479_p4, %p3473_p1 }
  0x64   :  { %3483 = shalt.err (!%p3480_p5)
}
  0x65   :  { %s3526_s5 = smov 64   ;;  %s3527_s1 = smov 4  }
  0x66   :  { %90 = dma.hbm_to_vmem [thread:$0]  %s3759_s7, 6144, %s3631_s21, [#allocation12], %s3526_s5, %s3526_s5, %s3527_s1  }
  0x67   :  { %3506 = dma.done.wait [#allocation3], 128  }
  0x68   :  { %3507 = vsyncadd [#allocation3], 4294967168 }
  0x69   :  { %3508 = dma.done.wait [#allocation6], 1152  }
  0x6a   :  { %3509 = vsyncadd [#allocation6], 4294966144 }
  0x6b   :  { %3510 = dma.done.wait [#allocation9], 24576  }
  0x6c   :  { %3511 = vsyncadd [#allocation9], 4294942720 }
  0x6d   :  { %3512 = dma.done.wait [#allocation12], 6144  }
  0x6e   :  { %3513 = vsyncadd [#allocation12], 4294961152  ;;  %v3528_v0 = vmov 0   ;;  %v114_v1 = vld [vmem:[#allocation5] sm:$0xff]  ;;  %v112_v3 = vld [vmem:[#allocation2] sm:$0xff]  ;;  %vm204_vm0 = vcmask 130048  }
  0x6f   :  { %240 = vmatprep.mubr.bf16.mxu1 %v3528_v0  ;;  %v118_v2 = vld [vmem:[#allocation5 + $0x20] sm:$0xff]  ;;  %v115_v6 = vld [vmem:[#allocation5 + $0x8] sm:$0xff]  ;;  %v116_v9 = vld [vmem:[#allocation5 + $0x10] sm:$0xff]  ;;  %v113_v11 = vpack.c.bf16 %v112_v3, %v112_v3 }
  0x70   :  { %v2584_v4 = vcombine.high %v114_v1, %v118_v2  ;;  %v2583_v5 = vcombine.low %v114_v1, %v118_v2  ;;  %v119_v7 = vld [vmem:[#allocation5 + $0x28] sm:$0xff]  ;;  %v120_v10 = vld [vmem:[#allocation5 + $0x30] sm:$0xff]  ;;  %v117_v19 = vld [vmem:[#allocation5 + $0x18] sm:$0xff] }
  0x71   :  { %v2586_v8 = vcombine.high %v115_v6, %v119_v7  ;;  %v3016_v12 = vld [vmem:[#allocation8 + $0x4] ss:$12 sps:$4 sm:$0xff]   ;;  %v2585_v13 = vcombine.low %v115_v6, %v119_v7  ;;  %v3018_v14 = vld [vmem:[#allocation8] ss:$12 sps:$4 sm:$0xff]   ;;  %v2588_v15 = vcombine.high %v116_v9, %v120_v10  ;;  %v3019_v16 = vld [vmem:[#allocation8 + $0x1c] ss:$12 sps:$4 sm:$0xff]   ;;  %v2587_v23 = vcombine.low %v116_v9, %v120_v10 }
  0x72   :  { %208 = vmatprep.subr.bf16.mxu1 %v2584_v4  ;;  %1045 = vmatprep.subr.bf16.mxu0 %v3016_v12  ;;  %v3021_v17 = vld [vmem:[#allocation8 + $0x18] ss:$12 sps:$4 sm:$0xff]   ;;  %v3022_v18 = vld [vmem:[#allocation8 + $0x34] ss:$12 sps:$4 sm:$0xff]   ;;  %v3024_v21 = vld [vmem:[#allocation8 + $0x30] ss:$12 sps:$4 sm:$0xff]  }
  0x73   :  { %209 = vmatpush1.bf16.msra.mxu1 %v2583_v5  ;;  %1046 = vmatpush1.bf16.msra.mxu0 %v3018_v14  ;;  %v121_v20 = vld [vmem:[#allocation5 + $0x38] sm:$0xff]  ;;  %v3025_v22 = vld [vmem:[#allocation8 + $0x4c] ss:$12 sps:$4 sm:$0xff]   ;;  %v3031_v28 = vld [vmem:[#allocation8 + $0x7c] ss:$12 sps:$4 sm:$0xff]   ;;  %v124_v5 = vlaneseq }
  0x74   :  { %249 = vmatprep.subr.bf16.mxu1 %v2586_v8  ;;  %1047 = vmatprep.subr.bf16.mxu0 %v3019_v16  ;;  %v2590_v24 = vcombine.high %v117_v19, %v121_v20  ;;  %v3027_v25 = vld [vmem:[#allocation8 + $0x48] ss:$12 sps:$4 sm:$0xff]   ;;  %v3028_v26 = vld [vmem:[#allocation8 + $0x64] ss:$12 sps:$4 sm:$0xff]   ;;  %v3030_v27 = vld [vmem:[#allocation8 + $0x60] ss:$12 sps:$4 sm:$0xff]   ;;  %v2589_v29 = vcombine.low %v117_v19, %v121_v20 }
  0x75   :  { %v3042_v30 = vld [vmem:[#allocation8 + $0xc8] ss:$12 sps:$4 sm:$0xff]   ;;  %v3033_v31 = vld [vmem:[#allocation8 + $0x78] ss:$12 sps:$4 sm:$0xff]   ;;  %v3036_v33 = vld [vmem:[#allocation8 + $0x90] ss:$12 sps:$4 sm:$0xff]  }
  0x76   :  { %2591 = vmatmul.mubr.msk.bf16.vlgmr.msra.gmra.mrb[0].mxu1 %vm204_vm0, %v113_v11  ;;  %v3034_v32 = vld [vmem:[#allocation8 + $0x94] ss:$12 sps:$4 sm:$0xff]   ;;  %v3037_v34 = vld [vmem:[#allocation8 + $0xac] ss:$12 sps:$4 sm:$0xff]   ;;  %v3040_v38 = vld [vmem:[#allocation8 + $0xc4] ss:$12 sps:$4 sm:$0xff]  }
  0x77   :  { %250 = vmatpush1.bf16.msra.mxu1 %v2585_v13  ;;  %281 = vmatprep.mubr.bf16.mxu1 %v3528_v0  ;;  %v3044_v35 = vld [vmem:[#allocation8 + $0x8] ss:$12 sps:$4 sm:$0xff]   ;;  %v3047_v36 = vld [vmem:[#allocation8 + $0xe0] ss:$12 sps:$4 sm:$0xff]   ;;  %v3052_v40 = vld [vmem:[#allocation8 + $0xf8] ss:$12 sps:$4 sm:$0xff]  }
  0x78   :  { %290 = vmatprep.subr.bf16.mxu1 %v2588_v15  ;;  %1048 = vmatpush1.bf16.msra.mxu0 %v3021_v17  ;;  %v3039_v37 = vld [vmem:[#allocation8 + $0xa8] ss:$12 sps:$4 sm:$0xff]   ;;  %v3049_v39 = vld [vmem:[#allocation8 + $0x20] ss:$12 sps:$4 sm:$0xff]   ;;  %v3054_v43 = vld [vmem:[#allocation8 + $0x38] ss:$12 sps:$4 sm:$0xff]  }
  0x79   :  { %1049 = vmatprep.subr.bf16.mxu0 %v3022_v18  ;;  %v3043_v41 = vld [vmem:[#allocation8 + $0xc0] ss:$12 sps:$4 sm:$0xff]   ;;  %v3045_v42 = vld [vmem:[#allocation8 + $0xdc] ss:$12 sps:$4 sm:$0xff]   ;;  %v3048_v45 = vld [vmem:[#allocation8 + $0xd8] ss:$12 sps:$4 sm:$0xff]  }
  0x7a   :  { %v3057_v44 = vld [vmem:[#allocation8 + $0x110] ss:$12 sps:$4 sm:$0xff]   ;;  %v3050_v46 = vld [vmem:[#allocation8 + $0xf4] ss:$12 sps:$4 sm:$0xff]   ;;  %v3055_v49 = vld [vmem:[#allocation8 + $0x10c] ss:$12 sps:$4 sm:$0xff]  }
  0x7b   :  { %v3059_v47 = vld [vmem:[#allocation8 + $0x50] ss:$12 sps:$4 sm:$0xff]   ;;  %v3058_v50 = vld [vmem:[#allocation8 + $0x108] ss:$12 sps:$4 sm:$0xff]   ;;  %v3063_v53 = vld [vmem:[#allocation8 + $0x120] ss:$12 sps:$4 sm:$0xff]  }
  0x7c   :  { %1050 = vmatpush1.bf16.msra.mxu0 %v3024_v21  ;;  %v3053_v48 = vld [vmem:[#allocation8 + $0xf0] ss:$12 sps:$4 sm:$0xff]   ;;  %v3062_v52 = vld [vmem:[#allocation8 + $0x128] ss:$12 sps:$4 sm:$0xff]   ;;  %v3067_v56 = vld [vmem:[#allocation8 + $0x140] ss:$12 sps:$4 sm:$0xff]  }
  0x7d   :  { %1051 = vmatprep.subr.bf16.mxu0 %v3025_v22  ;;  %v3060_v51 = vld [vmem:[#allocation8 + $0x124] ss:$12 sps:$4 sm:$0xff]   ;;  %v3064_v54 = vld [vmem:[#allocation8 + $0x68] ss:$12 sps:$4 sm:$0xff]   ;;  %v3069_v58 = vld [vmem:[#allocation8 + $0x80] ss:$12 sps:$4 sm:$0xff]  }
  0x7e   :  { %2592 = vmatmul.mubr.msk.bf16.vlgmr.msra.gmra.mrb[4].mxu1 %vm204_vm0, %v113_v11  ;;  %v3065_v55 = vld [vmem:[#allocation8 + $0x13c] ss:$12 sps:$4 sm:$0xff]   ;;  %v3068_v57 = vld [vmem:[#allocation8 + $0x138] ss:$12 sps:$4 sm:$0xff]   ;;  %v3070_v59 = vld [vmem:[#allocation8 + $0x154] ss:$12 sps:$4 sm:$0xff]  }
  0x7f   :  { %291 = vmatpush1.bf16.msra.mxu1 %v2587_v23  ;;  %322 = vmatprep.mubr.bf16.mxu1 %v3528_v0  ;;  %v3072_v60 = vld [vmem:[#allocation8 + $0x158] ss:$12 sps:$4 sm:$0xff]   ;;  %v3073_v61 = vld [vmem:[#allocation8 + $0x150] ss:$12 sps:$4 sm:$0xff]   ;;  %v3078_v1 = vld [vmem:[#allocation8 + $0x168] ss:$12 sps:$4 sm:$0xff]  }
  0x80   :  { %331 = vmatprep.subr.bf16.mxu1 %v2590_v24  ;;  %1052 = vmatpush1.bf16.msra.mxu0 %v3027_v25  ;;  %v3074_v62 = vld [vmem:[#allocation8 + $0x98] ss:$12 sps:$4 sm:$0xff]   ;;  %v3079_v2 = vld [vmem:[#allocation8 + $0xb0] ss:$12 sps:$4 sm:$0xff]   ;;  %v3083_v4 = vld [vmem:[#allocation8 + $0x248] ss:$12 sps:$4 sm:$0xff]  }
  0x81   :  { %1053 = vmatprep.subr.bf16.mxu0 %v3028_v26  ;;  %v3075_v63 = vld [vmem:[#allocation8 + $0x16c] ss:$12 sps:$4 sm:$0xff]   ;;  %v3082_v3 = vld [vmem:[#allocation8 + $0x184] ss:$12 sps:$4 sm:$0xff]   ;;  %v3670_v6 = vshrl.u32 %v124_v5, 7 }
  0x82   :  { %v3675_v8 = vld [vmem:[#allocation7] sm:$0xff] }
  0x83   :  { %v3673_v7 = vsub.s32 0, %v3670_v6  ;;  %v3678_v9 = vsub.s32 1, %v3670_v6  ;;  %v138_v17 = vsub.s32 3, %v3670_v6 }
  0x84   :  { %1054 = vmatpush1.bf16.msra.mxu0 %v3030_v27 }
  0x85   :  { %1055 = vmatprep.subr.bf16.mxu0 %v3031_v28  ;;  %v127_v10 = vrot.slane %v3675_v8, %v3673_v7  ;;  %v139_v21 = vrot.slane %v3675_v8, %v138_v17  ;;  %v3080_v28 = vld [vmem:[#allocation8 + $0x180] ss:$12 sps:$4 sm:$0xff]   ;;  %v3119_v17 = vld [vmem:[#allocation8 + $0x230] ss:$12 sps:$4 sm:$0xff]  }
  0x86   :  { %2593 = vmatmul.mubr.msk.bf16.vlgmr.msra.gmra.mrb[8].mxu1 %vm204_vm0, %v113_v11 }
  0x87   :  { %332 = vmatpush1.bf16.msra.mxu1 %v2589_v29  ;;  %363 = vmatprep.mubr.bf16.mxu1 %v3528_v0  ;;  %v3077_v0 = vld [vmem:[#allocation8 + $0x170] ss:$12 sps:$4 sm:$0xff]   ;;  %v3084_v29 = vld [vmem:[#allocation8 + $0x188] ss:$12 sps:$4 sm:$0xff]  }
  0x88   :  { %2836 = vmatprep.subr.bf16.mxu1 %v3042_v30  ;;  %1056 = vmatpush1.bf16.msra.mxu0 %v3033_v31 }
  0x89   :  { %1057 = vmatprep.subr.bf16.mxu0 %v3034_v32  ;;  %v3087_v32 = vld [vmem:[#allocation8 + $0x19c] ss:$12 sps:$4 sm:$0xff]  }
  0x8c   :  { %1058 = vmatpush1.bf16.msra.mxu0 %v3036_v33  ;;  %v3088_v33 = vld [vmem:[#allocation8 + $0x260] ss:$12 sps:$4 sm:$0xff]  }
  0x8d   :  { %1059 = vmatprep.subr.bf16.mxu0 %v3037_v34 }
  0x8e   :  { %2594 = vmatmul.mubr.msk.bf16.vlgmr.msra.gmra.mrb[12].mxu1 %vm204_vm0, %v113_v11  ;;  %v131_v11 = vrot.slane %v3675_v8, %v3678_v9 }
  0x8f   :  { %2837 = vmatpush3.bf16.msra.mxu1 %v3044_v35 }
  0x90   :  { %2838 = vmatprep.subr.bf16.mxu1 %v3047_v36  ;;  %1060 = vmatpush1.bf16.msra.mxu0 %v3039_v37 }
  0x91   :  { %1061 = vmatprep.subr.bf16.mxu0 %v3040_v38  ;;  %v3085_v38 = vld [vmem:[#allocation8 + $0x198] ss:$12 sps:$4 sm:$0xff]  }
  0x93   :  { %2839 = vmatpush3.bf16.msra.mxu1 %v3049_v39  ;;  %v3089_v39 = vld [vmem:[#allocation8 + $0x1a0] ss:$12 sps:$4 sm:$0xff]  }
  0x94   :  { %2840 = vmatprep.subr.bf16.mxu1 %v3052_v40  ;;  %1062 = vmatpush1.bf16.msra.mxu0 %v3043_v41  ;;  %v3092_v40 = vld [vmem:[#allocation8 + $0x1b4] ss:$12 sps:$4 sm:$0xff]   ;;  %v3093_v41 = vld [vmem:[#allocation8 + $0x278] ss:$12 sps:$4 sm:$0xff]  }
  0x95   :  { %1063 = vmatprep.subr.bf16.mxu0 %v3045_v42  ;;  %v3689_v42 = vsub.s32 2, %v3670_v6 }
  0x97   :  { %2841 = vmatpush3.bf16.msra.mxu1 %v3054_v43  ;;  %v3090_v43 = vld [vmem:[#allocation8 + $0x1b0] ss:$12 sps:$4 sm:$0xff]  }
  0x98   :  { %2842 = vmatprep.subr.bf16.mxu1 %v3057_v44  ;;  %1064 = vmatpush1.bf16.msra.mxu0 %v3048_v45  ;;  %v3094_v44 = vld [vmem:[#allocation8 + $0x1b8] ss:$12 sps:$4 sm:$0xff]   ;;  %v146_v45 = vsub.s32 5, %v3670_v6 }
  0x99   :  { %1065 = vmatprep.subr.bf16.mxu0 %v3050_v46 }
  0x9b   :  { %2843 = vmatpush3.bf16.msra.mxu1 %v3059_v47 }
  0x9c   :  { %1066 = vmatpush1.bf16.msra.mxu0 %v3053_v48  ;;  %2844 = vmatprep.subr.bf16.mxu1 %v3062_v52  ;;  %v135_v48 = vrot.slane %v3675_v8, %v3689_v42 }
  0x9d   :  { %1067 = vmatprep.subr.bf16.mxu0 %v3055_v49  ;;  %v3097_v49 = vld [vmem:[#allocation8 + $0x1cc] ss:$12 sps:$4 sm:$0xff]  }
  0x9f   :  { %2845 = vmatpush3.bf16.msra.mxu1 %v3064_v54  ;;  %v3095_v54 = vld [vmem:[#allocation8 + $0x1c8] ss:$12 sps:$4 sm:$0xff]  }
  0xa0   :  { %1068 = vmatpush1.bf16.msra.mxu0 %v3058_v50  ;;  %2846 = vmatprep.subr.bf16.mxu1 %v3067_v56  ;;  %v3098_v50 = vld [vmem:[#allocation8 + $0x290] ss:$12 sps:$4 sm:$0xff]   ;;  %v147_v56 = vrot.slane %v3675_v8, %v146_v45  ;;  %v3153_v45 = vld [vmem:[#allocation10 + $0x78] ss:$12 sps:$4 sm:$0xff]  }
  0xa1   :  { %1069 = vmatprep.subr.bf16.mxu0 %v3060_v51 }
  0xa3   :  { %2847 = vmatpush3.bf16.msra.mxu1 %v3069_v58  ;;  %v3102_v58 = vld [vmem:[#allocation8 + $0x1e4] ss:$12 sps:$4 sm:$0xff]  }
  0xa4   :  { %1070 = vmatpush1.bf16.msra.mxu0 %v3063_v53  ;;  %2848 = vmatprep.subr.bf16.mxu1 %v3072_v60  ;;  %v3100_v60 = vld [vmem:[#allocation8 + $0x1e0] ss:$12 sps:$4 sm:$0xff]  }
  0xa5   :  { %1071 = vmatprep.subr.bf16.mxu0 %v3065_v55  ;;  %v3099_v55 = vld [vmem:[#allocation8 + $0x1d0] ss:$12 sps:$4 sm:$0xff]  }
  0xa7   :  { %2849 = vmatpush3.bf16.msra.mxu1 %v3074_v62 }
  0xa8   :  { %1072 = vmatpush1.bf16.msra.mxu0 %v3068_v57  ;;  %2850 = vmatprep.subr.bf16.mxu1 %v3077_v0  ;;  %v3107_v0 = vld [vmem:[#allocation8 + $0x1fc] ss:$12 sps:$4 sm:$0xff]  }
  0xa9   :  { %1073 = vmatprep.subr.bf16.mxu0 %v3070_v59  ;;  %v3103_v59 = vld [vmem:[#allocation8 + $0x2a8] ss:$12 sps:$4 sm:$0xff]  }
  0xab   :  { %2851 = vmatpush3.bf16.msra.mxu1 %v3079_v2  ;;  %v3105_v2 = vld [vmem:[#allocation8 + $0x1f8] ss:$12 sps:$4 sm:$0xff]  }
  0xac   :  { %1074 = vmatpush1.bf16.msra.mxu0 %v3073_v61  ;;  %2858 = vmatprep.subr.bf16.mxu1 %v3083_v4  ;;  %v3104_v61 = vld [vmem:[#allocation8 + $0x1e8] ss:$12 sps:$4 sm:$0xff]  }
  0xad   :  { %1075 = vmatprep.subr.bf16.mxu0 %v3075_v63 }
  0xb0   :  { %1076 = vmatpush1.bf16.msra.mxu0 %v3078_v1  ;;  %v3108_v1 = vld [vmem:[#allocation8 + $0x2c0] ss:$12 sps:$4 sm:$0xff]  }
  0xb1   :  { %1086 = vmatprep.subr.bf16.mxu0 %v3082_v3  ;;  %v3109_v3 = vld [vmem:[#allocation8 + $0x200] ss:$12 sps:$4 sm:$0xff]  }
 0x149   :  { %v242_v12 = vpop.f32.mrb[0].mxu1 }
 0x14a   :  { %v243_v13 = vadd.f32 %v242_v12, %v127_v10  ;;  %v244_v14 = vpop.f32.mrb[1].mxu1  ;;  %v3112_v10 = vld [vmem:[#allocation8 + $0x214] ss:$12 sps:$4 sm:$0xff]   ;;  %v3110_v12 = vld [vmem:[#allocation8 + $0x210] ss:$12 sps:$4 sm:$0xff]  }
 0x14b   :  { %v245_v15 = vadd.f32 %v244_v14, %v131_v11  ;;  %v246_v16 = vpop.f32.mrb[2].mxu1  ;;  %v3113_v11 = vld [vmem:[#allocation8 + $0x2d8] ss:$12 sps:$4 sm:$0xff]  }
 0x14c   :  { %v372_v18 = vpack.c.bf16 %v243_v13, %v243_v13  ;;  %v247_v19 = vpop.f32.mrb[3].mxu1  ;;  %v3114_v13 = vld [vmem:[#allocation8 + $0x218] ss:$12 sps:$4 sm:$0xff]   ;;  %v3115_v16 = vld [vmem:[#allocation8 + $0x228] ss:$12 sps:$4 sm:$0xff]  }
 0x14d   :  { %v373_v20 = vpack.c.bf16 %v245_v15, %v245_v15  ;;  %v3117_v14 = vld [vmem:[#allocation8 + $0x22c] ss:$12 sps:$4 sm:$0xff]   ;;  %v3118_v15 = vld [vmem:[#allocation8 + $0x2f0] ss:$12 sps:$4 sm:$0xff]  }
 0x14e   :  { %v3125_v19 = vld [vmem:[#allocation10 + $0x4] ss:$12 sps:$4 sm:$0xff]  }
 0x14f   :  { %3320 = vtanh.bf16 %v373_v20 }
 0x150   :  { %3322 = vtanh.bf16 %v372_v18  ;;  %v3122_v18 = vld [vmem:[#allocation8 + $0x244] ss:$12 sps:$4 sm:$0xff]  }
 0x151   :  { %v283_v22 = vpop.f32.mrb[4].mxu1 }
 0x152   :  { %v285_v23 = vpop.f32.mrb[5].mxu1  ;;  %v284_v57 = vadd.f32 %v283_v22, %v135_v48  ;;  %v3123_v22 = vld [vmem:[#allocation10] ss:$12 sps:$4 sm:$0xff]  }
 0x153   :  { %v286_v24 = vadd.f32 %v285_v23, %v139_v21  ;;  %v287_v25 = vpop.f32.mrb[6].mxu1  ;;  %v3120_v21 = vld [vmem:[#allocation8 + $0x240] ss:$12 sps:$4 sm:$0xff]   ;;  %v3128_v23 = vld [vmem:[#allocation8 + $0x25c] ss:$12 sps:$4 sm:$0xff]  }
 0x154   :  { %v288_v26 = vpop.f32.mrb[7].mxu1  ;;  %v374_v63 = vpack.c.bf16 %v284_v57, %v284_v57  ;;  %v3161_v48 = vld [vmem:[#allocation10 + $0x94] ss:$12 sps:$4 sm:$0xff]  }
 0x155   :  { %v375_v27 = vpack.c.bf16 %v286_v24, %v286_v24  ;;  %v3131_v24 = vld [vmem:[#allocation10 + $0x1c] ss:$12 sps:$4 sm:$0xff]   ;;  %v3126_v26 = vld [vmem:[#allocation8 + $0x258] ss:$12 sps:$4 sm:$0xff]  }
 0x156   :  { %v3171_v57 = vld [vmem:[#allocation10 + $0xc8] ss:$12 sps:$4 sm:$0xff]  }
 0x157   :  { %3324 = vtanh.bf16 %v375_v27  ;;  %v3129_v27 = vld [vmem:[#allocation10 + $0x18] ss:$12 sps:$4 sm:$0xff]  }
 0x158   :  { %3326 = vtanh.bf16 %v374_v63  ;;  %v3177_v63 = vld [vmem:[#allocation10 + $0x20] ss:$12 sps:$4 sm:$0xff]  }
 0x159   :  { %v3686_v30 = vpop.f32.mrb[8].mxu1 }
 0x15a   :  { %v3321_v31 = vpop.eup %3320  ;;  %v326_v34 = vpop.f32.mrb[9].mxu1 }
 0x15b   :  { %v3323_v35 = vpop.eup %3322  ;;  %1077 = vmatprep.mubr.bf16.mxu0 %v3321_v31  ;;  %1159 = vmatprep.mubr.bf16.mxu1 %v3321_v31  ;;  %v328_v36 = vpop.f32.mrb[10].mxu1  ;;  %v327_v62 = vadd.f32 %v326_v34, %v147_v56  ;;  %v3132_v31 = vld [vmem:[#allocation8 + $0x270] ss:$12 sps:$4 sm:$0xff]   ;;  %v3143_v34 = vld [vmem:[#allocation10 + $0x4c] ss:$12 sps:$4 sm:$0xff]  }
 0x15c   :  { %1078 = vmatmul.mubr.bf16.vlgmr.msra.gmra.mrb[0].mxu0 %v3323_v35  ;;  %1160 = vmatmul.mubr.bf16.vlgmr.msra.gmra.mrb[16].mxu1 %v3323_v35  ;;  %v329_v37 = vpop.f32.mrb[11].mxu1  ;;  %v3138_v35 = vld [vmem:[#allocation8 + $0x288] ss:$12 sps:$4 sm:$0xff]   ;;  %v3170_v56 = vld [vmem:[#allocation10 + $0xc4] ss:$12 sps:$4 sm:$0xff]  }
 0x15d   :  { %1087 = vmatpush1.bf16.msra.mxu0 %v3080_v28  ;;  %2859 = vmatpush3.bf16.msra.mxu1 %v3084_v29  ;;  %v377_v4 = vpack.c.bf16 %v327_v62, %v327_v62  ;;  %v3134_v28 = vld [vmem:[#allocation8 + $0x274] ss:$12 sps:$4 sm:$0xff]   ;;  %v3146_v37 = vld [vmem:[#allocation8 + $0x2a4] ss:$12 sps:$4 sm:$0xff]  }
 0x15e   :  { %1088 = vmatprep.subr.bf16.mxu0 %v3087_v32  ;;  %2860 = vmatprep.subr.bf16.mxu1 %v3088_v33  ;;  %v3137_v29 = vld [vmem:[#allocation10 + $0x34] ss:$12 sps:$4 sm:$0xff]   ;;  %v3135_v32 = vld [vmem:[#allocation10 + $0x30] ss:$12 sps:$4 sm:$0xff]   ;;  %v3140_v33 = vld [vmem:[#allocation8 + $0x28c] ss:$12 sps:$4 sm:$0xff]  }
 0x15f   :  { %3328 = vtanh.bf16 %v377_v4  ;;  %v3141_v36 = vld [vmem:[#allocation10 + $0x48] ss:$12 sps:$4 sm:$0xff]   ;;  %v3173_v62 = vld [vmem:[#allocation10 + $0xd8] ss:$12 sps:$4 sm:$0xff]  }
 0x160   :  { %v3182_v4 = vld [vmem:[#allocation10 + $0x38] ss:$12 sps:$4 sm:$0xff]  }
 0x161   :  { %1089 = vmatpush1.bf16.msra.mxu0 %v3085_v38  ;;  %2861 = vmatpush3.bf16.msra.mxu1 %v3089_v39  ;;  %v3692_v46 = vpop.f32.mrb[12].mxu1  ;;  %v3149_v38 = vld [vmem:[#allocation10 + $0x64] ss:$12 sps:$4 sm:$0xff]   ;;  %v3144_v39 = vld [vmem:[#allocation8 + $0x2a0] ss:$12 sps:$4 sm:$0xff]  }
 0x162   :  { %v3325_v47 = vpop.eup %3324  ;;  %1090 = vmatprep.subr.bf16.mxu0 %v3092_v40  ;;  %2862 = vmatprep.subr.bf16.mxu1 %v3093_v41  ;;  %v3696_v51 = vpop.f32.mrb[13].mxu1  ;;  %v3147_v40 = vld [vmem:[#allocation10 + $0x60] ss:$12 sps:$4 sm:$0xff]   ;;  %v3152_v41 = vld [vmem:[#allocation8 + $0x2bc] ss:$12 sps:$4 sm:$0xff]  }
 0x163   :  { %1118 = vmatprep.mubr.bf16.mxu0 %v3325_v47  ;;  %1199 = vmatprep.mubr.bf16.mxu1 %v3325_v47  ;;  %v369_v52 = vpop.f32.mrb[14].mxu1  ;;  %v3699_v20 = vpop.eup %3326  ;;  %v3158_v47 = vld [vmem:[#allocation8 + $0x2d4] ss:$12 sps:$4 sm:$0xff]  }
 0x164   :  { %v370_v53 = vpop.f32.mrb[15].mxu1  ;;  %v3164_v52 = vld [vmem:[#allocation8 + $0x2ec] ss:$12 sps:$4 sm:$0xff]  }
 0x165   :  { %1091 = vmatpush1.bf16.msra.mxu0 %v3090_v43  ;;  %2863 = vmatpush3.bf16.msra.mxu1 %v3094_v44  ;;  %v3155_v43 = vld [vmem:[#allocation10 + $0x7c] ss:$12 sps:$4 sm:$0xff]   ;;  %v3150_v44 = vld [vmem:[#allocation8 + $0x2b8] ss:$12 sps:$4 sm:$0xff]  }
 0x166   :  { %1092 = vmatprep.subr.bf16.mxu0 %v3097_v49  ;;  %2864 = vmatprep.subr.bf16.mxu1 %v3098_v50  ;;  %v3156_v49 = vld [vmem:[#allocation8 + $0x2d0] ss:$12 sps:$4 sm:$0xff]   ;;  %v3167_v53 = vld [vmem:[#allocation10 + $0xac] ss:$12 sps:$4 sm:$0xff]  }
 0x167   :  { %v3159_v50 = vld [vmem:[#allocation10 + $0x90] ss:$12 sps:$4 sm:$0xff]  }
 0x169   :  { %1093 = vmatpush1.bf16.msra.mxu0 %v3095_v54  ;;  %2865 = vmatpush3.bf16.msra.mxu1 %v3099_v55  ;;  %v3162_v54 = vld [vmem:[#allocation8 + $0x2e8] ss:$12 sps:$4 sm:$0xff]  }
 0x16a   :  { %1094 = vmatprep.subr.bf16.mxu0 %v3102_v58  ;;  %2866 = vmatprep.subr.bf16.mxu1 %v3103_v59  ;;  %v3701_v25 = vpop.eup %3328  ;;  %v3165_v55 = vld [vmem:[#allocation10 + $0xa8] ss:$12 sps:$4 sm:$0xff]   ;;  %v3168_v58 = vld [vmem:[#allocation10 + $0xc0] ss:$12 sps:$4 sm:$0xff]  }
 0x16b   :  { %v3172_v59 = vld [vmem:[#allocation10 + $0x8] ss:$12 sps:$4 sm:$0xff]  }
 0x16d   :  { %1095 = vmatpush1.bf16.msra.mxu0 %v3100_v60  ;;  %2867 = vmatpush3.bf16.msra.mxu1 %v3104_v61  ;;  %v3175_v60 = vld [vmem:[#allocation10 + $0xdc] ss:$12 sps:$4 sm:$0xff]   ;;  %v3176_v61 = vld [vmem:[#allocation10 + $0xe0] ss:$12 sps:$4 sm:$0xff]  }
 0x16e   :  { %1096 = vmatprep.subr.bf16.mxu0 %v3107_v0  ;;  %2868 = vmatprep.subr.bf16.mxu1 %v3108_v1  ;;  %v3180_v0 = vld [vmem:[#allocation10 + $0xf4] ss:$12 sps:$4 sm:$0xff]   ;;  %v3181_v1 = vld [vmem:[#allocation10 + $0xf8] ss:$12 sps:$4 sm:$0xff]  }
 0x171   :  { %1097 = vmatpush1.bf16.msra.mxu0 %v3105_v2  ;;  %2869 = vmatpush3.bf16.msra.mxu1 %v3109_v3  ;;  %v142_v2 = vsub.s32 4, %v3670_v6  ;;  %v3178_v3 = vld [vmem:[#allocation10 + $0xf0] ss:$12 sps:$4 sm:$0xff]  }
 0x172   :  { %1098 = vmatprep.subr.bf16.mxu0 %v3112_v10  ;;  %2870 = vmatprep.subr.bf16.mxu1 %v3113_v11  ;;  %v154_v10 = vsub.s32 7, %v3670_v6 }
 0x173   :  { %v143_v11 = vrot.slane %v3675_v8, %v142_v2  ;;  %v3237_v2 = vld [vmem:[#allocation10 + $0x200] ss:$12 sps:$4 sm:$0xff]  }
 0x175   :  { %1099 = vmatpush1.bf16.msra.mxu0 %v3110_v12  ;;  %2871 = vmatpush3.bf16.msra.mxu1 %v3114_v13  ;;  %v3185_v12 = vld [vmem:[#allocation10 + $0x10c] ss:$12 sps:$4 sm:$0xff]   ;;  %v3186_v13 = vld [vmem:[#allocation10 + $0x110] ss:$12 sps:$4 sm:$0xff]  }
 0x176   :  { %1100 = vmatprep.subr.bf16.mxu0 %v3117_v14  ;;  %2872 = vmatprep.subr.bf16.mxu1 %v3118_v15  ;;  %v3183_v14 = vld [vmem:[#allocation10 + $0x108] ss:$12 sps:$4 sm:$0xff]   ;;  %v3187_v15 = vld [vmem:[#allocation10 + $0x50] ss:$12 sps:$4 sm:$0xff]  }
 0x179   :  { %1101 = vmatpush1.bf16.msra.mxu0 %v3115_v16  ;;  %2873 = vmatpush3.bf16.msra.mxu1 %v3119_v17  ;;  %v155_v16 = vrot.slane %v3675_v8, %v154_v10  ;;  %v325_v17 = vadd.f32 %v3686_v30, %v143_v11  ;;  %v3242_v10 = vld [vmem:[#allocation10 + $0x218] ss:$12 sps:$4 sm:$0xff]  }
 0x17a   :  { %1102 = vmatprep.subr.bf16.mxu0 %v3122_v18  ;;  %1870 = vmatprep.subr.bf16.mxu1 %v3125_v19  ;;  %v3190_v18 = vld [vmem:[#allocation10 + $0x124] ss:$12 sps:$4 sm:$0xff]   ;;  %v3191_v19 = vld [vmem:[#allocation10 + $0x128] ss:$12 sps:$4 sm:$0xff]   ;;  %v3245_v11 = vld [vmem:[#allocation10 + $0x22c] ss:$12 sps:$4 sm:$0xff]  }
 0x17c   :  { %1200 = vmatmul.mubr.bf16.vlgmr.msra.gmra.mrb[20].mxu1 %v3699_v20 }
 0x17d   :  { %1103 = vmatpush1.bf16.msra.mxu0 %v3120_v21  ;;  %1871 = vmatpush1.bf16.msra.mxu1 %v3123_v22  ;;  %v3192_v21 = vld [vmem:[#allocation10 + $0x68] ss:$12 sps:$4 sm:$0xff]   ;;  %v368_v22 = vadd.f32 %v3696_v51, %v155_v16  ;;  %v3205_v51 = vld [vmem:[#allocation10 + $0x16c] ss:$12 sps:$4 sm:$0xff]   ;;  %v3272_v16 = vld [vmem:[#allocation11 + $0x40] sm:$0xff]  }
 0x17e   :  { %1104 = vmatprep.subr.bf16.mxu0 %v3128_v23  ;;  %1872 = vmatprep.subr.bf16.mxu1 %v3131_v24  ;;  %v376_v23 = vpack.c.bf16 %v325_v17, %v325_v17  ;;  %v3195_v24 = vld [vmem:[#allocation10 + $0x13c] ss:$12 sps:$4 sm:$0xff]  }
 0x17f   :  { %1902 = vmatprep.mubr.bf16.mxu1 %v3701_v25  ;;  %v379_v30 = vpack.c.bf16 %v368_v22, %v368_v22  ;;  %v3251_v22 = vld [vmem:[#allocation10 + $0x258] ss:$12 sps:$4 sm:$0xff]  }
 0x180   :  { %3330 = vtanh.bf16 %v376_v23  ;;  %v3275_v23 = vld [vmem:[#allocation11 + $0x8] sm:$0xff]  }
 0x181   :  { %1105 = vmatpush1.bf16.msra.mxu0 %v3126_v26  ;;  %1873 = vmatpush1.bf16.msra.mxu1 %v3129_v27  ;;  %v3193_v26 = vld [vmem:[#allocation10 + $0x138] ss:$12 sps:$4 sm:$0xff]   ;;  %v3197_v27 = vld [vmem:[#allocation10 + $0x80] ss:$12 sps:$4 sm:$0xff]   ;;  %3332 = vtanh.bf16 %v379_v30 }
 0x182   :  { %1106 = vmatprep.subr.bf16.mxu0 %v3134_v28  ;;  %1874 = vmatprep.subr.bf16.mxu1 %v3137_v29  ;;  %v3200_v28 = vld [vmem:[#allocation10 + $0x154] ss:$12 sps:$4 sm:$0xff]   ;;  %v3201_v29 = vld [vmem:[#allocation10 + $0x158] ss:$12 sps:$4 sm:$0xff]  }
 0x183   :  { %v3259_v30 = vld [vmem:[#allocation10 + $0x28c] ss:$12 sps:$4 sm:$0xff]  }
 0x185   :  { %1107 = vmatpush1.bf16.msra.mxu0 %v3132_v31  ;;  %1875 = vmatpush1.bf16.msra.mxu1 %v3135_v32  ;;  %v3198_v31 = vld [vmem:[#allocation10 + $0x150] ss:$12 sps:$4 sm:$0xff]   ;;  %v3202_v32 = vld [vmem:[#allocation10 + $0x98] ss:$12 sps:$4 sm:$0xff]  }
 0x186   :  { %1108 = vmatprep.subr.bf16.mxu0 %v3140_v33  ;;  %1876 = vmatprep.subr.bf16.mxu1 %v3143_v34  ;;  %v3206_v33 = vld [vmem:[#allocation10 + $0x170] ss:$12 sps:$4 sm:$0xff]   ;;  %v3203_v34 = vld [vmem:[#allocation10 + $0x168] ss:$12 sps:$4 sm:$0xff]  }
 0x189   :  { %1109 = vmatpush1.bf16.msra.mxu0 %v3138_v35  ;;  %1877 = vmatpush1.bf16.msra.mxu1 %v3141_v36  ;;  %v3207_v35 = vld [vmem:[#allocation10 + $0xb0] ss:$12 sps:$4 sm:$0xff]  }
 0x18a   :  { %1110 = vmatprep.subr.bf16.mxu0 %v3146_v37  ;;  %1878 = vmatprep.subr.bf16.mxu1 %v3149_v38  ;;  %v3210_v36 = vld [vmem:[#allocation10 + $0x184] ss:$12 sps:$4 sm:$0xff]   ;;  %v3211_v37 = vld [vmem:[#allocation10 + $0x248] ss:$12 sps:$4 sm:$0xff]  }
 0x18b   :  { %v3331_v38 = vpop.eup %3330 }
 0x18d   :  { %1111 = vmatpush1.bf16.msra.mxu0 %v3144_v39  ;;  %1879 = vmatpush1.bf16.msra.mxu1 %v3147_v40  ;;  %v3208_v39 = vld [vmem:[#allocation10 + $0x180] ss:$12 sps:$4 sm:$0xff]   ;;  %v3212_v40 = vld [vmem:[#allocation10 + $0x188] ss:$12 sps:$4 sm:$0xff]  }
 0x18e   :  { %1112 = vmatprep.subr.bf16.mxu0 %v3152_v41  ;;  %1880 = vmatprep.subr.bf16.mxu1 %v3155_v43  ;;  %v3215_v41 = vld [vmem:[#allocation10 + $0x19c] ss:$12 sps:$4 sm:$0xff]   ;;  %v3216_v43 = vld [vmem:[#allocation10 + $0x260] ss:$12 sps:$4 sm:$0xff]  }
 0x191   :  { %1113 = vmatpush1.bf16.msra.mxu0 %v3150_v44  ;;  %1881 = vmatpush1.bf16.msra.mxu1 %v3153_v45  ;;  %v3333_v44 = vpop.eup %3332  ;;  %v3213_v45 = vld [vmem:[#allocation10 + $0x198] ss:$12 sps:$4 sm:$0xff]  }
 0x192   :  { %1114 = vmatprep.subr.bf16.mxu0 %v3158_v47  ;;  %1882 = vmatprep.subr.bf16.mxu1 %v3161_v48  ;;  %v3217_v47 = vld [vmem:[#allocation10 + $0x1a0] ss:$12 sps:$4 sm:$0xff]  }
 0x193   :  { %v3220_v48 = vld [vmem:[#allocation10 + $0x1b4] ss:$12 sps:$4 sm:$0xff]  }
 0x195   :  { %1115 = vmatpush1.bf16.msra.mxu0 %v3156_v49  ;;  %1883 = vmatpush1.bf16.msra.mxu1 %v3159_v50  ;;  %v3221_v49 = vld [vmem:[#allocation10 + $0x278] ss:$12 sps:$4 sm:$0xff]   ;;  %v150_v50 = vsub.s32 6, %v3670_v6 }
 0x196   :  { %1116 = vmatprep.subr.bf16.mxu0 %v3164_v52  ;;  %1884 = vmatprep.subr.bf16.mxu1 %v3167_v53  ;;  %v3218_v52 = vld [vmem:[#allocation10 + $0x1b0] ss:$12 sps:$4 sm:$0xff]   ;;  %v3222_v53 = vld [vmem:[#allocation10 + $0x1b8] ss:$12 sps:$4 sm:$0xff]  }
 0x199   :  { %1117 = vmatpush1.bf16.msra.mxu0 %v3162_v54  ;;  %1885 = vmatpush1.bf16.msra.mxu1 %v3165_v55  ;;  %v3225_v54 = vld [vmem:[#allocation10 + $0x1cc] ss:$12 sps:$4 sm:$0xff]   ;;  %v3226_v55 = vld [vmem:[#allocation10 + $0x290] ss:$12 sps:$4 sm:$0xff]  }
 0x19a   :  { %1886 = vmatprep.subr.bf16.mxu1 %v3170_v56  ;;  %2880 = vmatprep.subr.bf16.mxu0 %v3171_v57  ;;  %v151_v56 = vrot.slane %v3675_v8, %v150_v50  ;;  %v3223_v57 = vld [vmem:[#allocation10 + $0x1c8] ss:$12 sps:$4 sm:$0xff]   ;;  %v3233_v8 = vld [vmem:[#allocation10 + $0x1f8] ss:$12 sps:$4 sm:$0xff]  }
 0x19c   :  { %1119 = vmatmul.mubr.bf16.vlgmr.msra.gmra.mrb[0].mxu0 %v3699_v20  ;;  %v3188_v20 = vld [vmem:[#allocation10 + $0x120] ss:$12 sps:$4 sm:$0xff]   ;;  %v366_v6 = vadd.f32 %v3692_v46, %v151_v56  ;;  %v3241_v46 = vld [vmem:[#allocation10 + $0x2d8] ss:$12 sps:$4 sm:$0xff]  }
 0x19d   :  { %1887 = vmatpush1.bf16.msra.mxu1 %v3168_v58  ;;  %2881 = vmatpush3.bf16.msra.mxu0 %v3172_v59  ;;  %v3227_v58 = vld [vmem:[#allocation10 + $0x1d0] ss:$12 sps:$4 sm:$0xff]  }
 0x19e   :  { %1888 = vmatprep.subr.bf16.mxu1 %v3175_v60  ;;  %2882 = vmatprep.subr.bf16.mxu0 %v3176_v61  ;;  %v3230_v59 = vld [vmem:[#allocation10 + $0x1e4] ss:$12 sps:$4 sm:$0xff]   ;;  %v3231_v60 = vld [vmem:[#allocation10 + $0x2a8] ss:$12 sps:$4 sm:$0xff]   ;;  %v3228_v61 = vld [vmem:[#allocation10 + $0x1e0] ss:$12 sps:$4 sm:$0xff]  }
 0x19f   :  { %1984 = vmatprep.mubr.bf16.mxu0 %v3701_v25  ;;  %v3196_v25 = vld [vmem:[#allocation10 + $0x140] ss:$12 sps:$4 sm:$0xff]  }
 0x1a1   :  { %1889 = vmatpush1.bf16.msra.mxu1 %v3173_v62  ;;  %2883 = vmatpush3.bf16.msra.mxu0 %v3177_v63  ;;  %v3232_v62 = vld [vmem:[#allocation10 + $0x1e8] ss:$12 sps:$4 sm:$0xff]   ;;  %v378_v63 = vpack.c.bf16 %v366_v6, %v366_v6  ;;  %v3289_v6 = vld [vmem:[#allocation11 + $0x140] sm:$0xff]  }
 0x1a2   :  { %1890 = vmatprep.subr.bf16.mxu1 %v3180_v0  ;;  %2884 = vmatprep.subr.bf16.mxu0 %v3181_v1  ;;  %v3235_v0 = vld [vmem:[#allocation10 + $0x1fc] ss:$12 sps:$4 sm:$0xff]   ;;  %v3236_v1 = vld [vmem:[#allocation10 + $0x2c0] ss:$12 sps:$4 sm:$0xff]  }
 0x1a3   :  { %3334 = vtanh.bf16 %v378_v63  ;;  %v3298_v63 = vld [vmem:[#allocation11 + $0x90] sm:$0xff]  }
 0x1a5   :  { %1891 = vmatpush1.bf16.msra.mxu1 %v3178_v3  ;;  %2885 = vmatpush3.bf16.msra.mxu0 %v3182_v4  ;;  %v3240_v3 = vld [vmem:[#allocation10 + $0x214] ss:$12 sps:$4 sm:$0xff]   ;;  %v3238_v4 = vld [vmem:[#allocation10 + $0x210] ss:$12 sps:$4 sm:$0xff]  }
 0x1a6   :  { %1892 = vmatprep.subr.bf16.mxu1 %v3185_v12  ;;  %2886 = vmatprep.subr.bf16.mxu0 %v3186_v13  ;;  %v3246_v12 = vld [vmem:[#allocation10 + $0x2f0] ss:$12 sps:$4 sm:$0xff]   ;;  %v3243_v13 = vld [vmem:[#allocation10 + $0x228] ss:$12 sps:$4 sm:$0xff]  }
 0x1a9   :  { %1893 = vmatpush1.bf16.msra.mxu1 %v3183_v14  ;;  %2887 = vmatpush3.bf16.msra.mxu0 %v3187_v15  ;;  %v3247_v14 = vld [vmem:[#allocation10 + $0x230] ss:$12 sps:$4 sm:$0xff]  }
 0x1aa   :  { %1894 = vmatprep.subr.bf16.mxu1 %v3190_v18  ;;  %2888 = vmatprep.subr.bf16.mxu0 %v3191_v19  ;;  %v3250_v15 = vld [vmem:[#allocation10 + $0x244] ss:$12 sps:$4 sm:$0xff]   ;;  %v3248_v18 = vld [vmem:[#allocation10 + $0x240] ss:$12 sps:$4 sm:$0xff]  }
 0x1ab   :  { %v3273_v19 = vld [vmem:[#allocation11] sm:$0xff]  }
 0x1ad   :  { %1895 = vmatpush1.bf16.msra.mxu1 %v3188_v20  ;;  %2889 = vmatpush3.bf16.msra.mxu0 %v3192_v21  ;;  %v3253_v20 = vld [vmem:[#allocation10 + $0x25c] ss:$12 sps:$4 sm:$0xff]  }
 0x1ae   :  { %1896 = vmatprep.subr.bf16.mxu1 %v3195_v24  ;;  %2890 = vmatprep.subr.bf16.mxu0 %v3196_v25  ;;  %v3716_v17 = vpop.eup %3334  ;;  %v3274_v21 = vld [vmem:[#allocation11 + $0x48] sm:$0xff]   ;;  %v3256_v24 = vld [vmem:[#allocation10 + $0x274] ss:$12 sps:$4 sm:$0xff]  }
 0x1af   :  { %v3276_v25 = vld [vmem:[#allocation11 + $0x50] sm:$0xff]  }
 0x1b1   :  { %1897 = vmatpush1.bf16.msra.mxu1 %v3193_v26  ;;  %2891 = vmatpush3.bf16.msra.mxu0 %v3197_v27  ;;  %v3254_v26 = vld [vmem:[#allocation10 + $0x270] ss:$12 sps:$4 sm:$0xff]  }
 0x1b2   :  { %1898 = vmatprep.subr.bf16.mxu1 %v3200_v28  ;;  %2892 = vmatprep.subr.bf16.mxu0 %v3201_v29  ;;  %v3277_v27 = vld [vmem:[#allocation11 + $0x10] sm:$0xff]   ;;  %v3278_v28 = vld [vmem:[#allocation11 + $0x58] sm:$0xff]  }
 0x1b3   :  { %v3257_v29 = vld [vmem:[#allocation10 + $0x288] ss:$12 sps:$4 sm:$0xff]  }
 0x1b5   :  { %1899 = vmatpush1.bf16.msra.mxu1 %v3198_v31  ;;  %2893 = vmatpush3.bf16.msra.mxu0 %v3202_v32  ;;  %v3262_v31 = vld [vmem:[#allocation10 + $0x2a4] ss:$12 sps:$4 sm:$0xff]   ;;  %v3260_v32 = vld [vmem:[#allocation10 + $0x2a0] ss:$12 sps:$4 sm:$0xff]  }
 0x1b6   :  { %1900 = vmatprep.subr.bf16.mxu1 %v3205_v51  ;;  %2894 = vmatprep.subr.bf16.mxu0 %v3206_v33  ;;  %v3265_v51 = vld [vmem:[#allocation10 + $0x2bc] ss:$12 sps:$4 sm:$0xff]   ;;  %v3263_v33 = vld [vmem:[#allocation10 + $0x2b8] ss:$12 sps:$4 sm:$0xff]  }
 0x1b9   :  { %1901 = vmatpush1.bf16.msra.mxu1 %v3203_v34  ;;  %2895 = vmatpush3.bf16.msra.mxu0 %v3207_v35  ;;  %v3279_v34 = vld [vmem:[#allocation11 + $0x18] sm:$0xff]   ;;  %v3268_v35 = vld [vmem:[#allocation10 + $0x2d4] ss:$12 sps:$4 sm:$0xff]  }
 0x1ba   :  { %1911 = vmatprep.subr.bf16.mxu1 %v3210_v36  ;;  %2902 = vmatprep.subr.bf16.mxu0 %v3211_v37  ;;  %v3280_v36 = vld [vmem:[#allocation11 + $0x60] sm:$0xff]   ;;  %v3266_v37 = vld [vmem:[#allocation10 + $0x2d0] ss:$12 sps:$4 sm:$0xff]  }
 0x1bc   :  { %1903 = vmatmul.mubr.bf16.vlgmr.msra.gmra.mrb[24].mxu1 %v3331_v38  ;;  %1985 = vmatmul.mubr.bf16.vlgmr.msra.gmra.mrb[4].mxu0 %v3331_v38  ;;  %v3281_v38 = vld [vmem:[#allocation11 + $0x20] sm:$0xff]  }
 0x1bd   :  { %1912 = vmatpush1.bf16.msra.mxu1 %v3208_v39  ;;  %2903 = vmatpush3.bf16.msra.mxu0 %v3212_v40  ;;  %v3271_v39 = vld [vmem:[#allocation10 + $0x2ec] ss:$12 sps:$4 sm:$0xff]  }
 0x1be   :  { %1913 = vmatprep.subr.bf16.mxu1 %v3215_v41  ;;  %2904 = vmatprep.subr.bf16.mxu0 %v3216_v43  ;;  %v3282_v40 = vld [vmem:[#allocation11 + $0x68] sm:$0xff]  }
 0x1bf   :  { %2024 = vmatprep.mubr.bf16.mxu0 %v3333_v44  ;;  %1943 = vmatprep.mubr.bf16.mxu1 %v3333_v44  ;;  %v3269_v41 = vld [vmem:[#allocation10 + $0x2e8] ss:$12 sps:$4 sm:$0xff]  }
 0x1c0   :  { %v3283_v43 = vld [vmem:[#allocation11 + $0x28] sm:$0xff]   ;;  %v3284_v44 = vld [vmem:[#allocation11 + $0x70] sm:$0xff]  }
 0x1c1   :  { %1914 = vmatpush1.bf16.msra.mxu1 %v3213_v45  ;;  %2905 = vmatpush3.bf16.msra.mxu0 %v3217_v47  ;;  %v3285_v45 = vld [vmem:[#allocation11 + $0x30] sm:$0xff]   ;;  %v3286_v47 = vld [vmem:[#allocation11 + $0x78] sm:$0xff]  }
 0x1c2   :  { %1915 = vmatprep.subr.bf16.mxu1 %v3220_v48  ;;  %2906 = vmatprep.subr.bf16.mxu0 %v3221_v49  ;;  %v3287_v48 = vld [vmem:[#allocation11 + $0x38] sm:$0xff]   ;;  %v516_v49 = vld [vmem:[%s3756_s4] sm:$0x7] }
 0x1c5   :  { %1916 = vmatpush1.bf16.msra.mxu1 %v3218_v52  ;;  %2907 = vmatpush3.bf16.msra.mxu0 %v3222_v53  ;;  %v529_v52 = vrot.slane %v516_v49, %v3689_v42 }
 0x1c6   :  { %1917 = vmatprep.subr.bf16.mxu1 %v3225_v54  ;;  %2908 = vmatprep.subr.bf16.mxu0 %v3226_v55 }
 0x1c9   :  { %1918 = vmatpush1.bf16.msra.mxu1 %v3223_v57  ;;  %2909 = vmatpush3.bf16.msra.mxu0 %v3227_v58  ;;  %v3288_v58 = vld [vmem:[#allocation11 + $0xc0] sm:$0xff]  }
 0x1ca   :  { %1919 = vmatprep.subr.bf16.mxu1 %v3230_v59  ;;  %2910 = vmatprep.subr.bf16.mxu0 %v3231_v60  ;;  %v3290_v59 = vld [vmem:[#allocation11 + $0x80] sm:$0xff]   ;;  %v3292_v60 = vld [vmem:[#allocation11 + $0xc8] sm:$0xff]  }
 0x1cd   :  { %1920 = vmatpush1.bf16.msra.mxu1 %v3228_v61  ;;  %2911 = vmatpush3.bf16.msra.mxu0 %v3232_v62  ;;  %v3294_v61 = vld [vmem:[#allocation11 + $0x88] sm:$0xff]   ;;  %v3296_v62 = vld [vmem:[#allocation11 + $0xd0] sm:$0xff]  }
 0x1ce   :  { %1921 = vmatprep.subr.bf16.mxu1 %v3235_v0  ;;  %2912 = vmatprep.subr.bf16.mxu0 %v3236_v1  ;;  %v3300_v0 = vld [vmem:[#allocation11 + $0xd8] sm:$0xff]  }
 0x1cf   :  { %v3302_v1 = vld [vmem:[#allocation11 + $0x98] sm:$0xff]  }
 0x1d1   :  { %1922 = vmatpush1.bf16.msra.mxu1 %v3233_v8  ;;  %2913 = vmatpush3.bf16.msra.mxu0 %v3237_v2  ;;  %v3304_v2 = vld [vmem:[#allocation11 + $0xe0] sm:$0xff]  }
 0x1d2   :  { %1923 = vmatprep.subr.bf16.mxu1 %v3240_v3  ;;  %2914 = vmatprep.subr.bf16.mxu0 %v3241_v46  ;;  %v3306_v46 = vld [vmem:[#allocation11 + $0xa0] sm:$0xff]  }
 0x1d5   :  { %1924 = vmatpush1.bf16.msra.mxu1 %v3238_v4  ;;  %2915 = vmatpush3.bf16.msra.mxu0 %v3242_v10 }
 0x1d6   :  { %1925 = vmatprep.subr.bf16.mxu1 %v3245_v11  ;;  %2916 = vmatprep.subr.bf16.mxu0 %v3246_v12 }
 0x1d9   :  { %1926 = vmatpush1.bf16.msra.mxu1 %v3243_v13  ;;  %2917 = vmatpush3.bf16.msra.mxu0 %v3247_v14  ;;  %v3308_v13 = vld [vmem:[#allocation11 + $0xe8] sm:$0xff]  }
 0x1da   :  { %1927 = vmatprep.subr.bf16.mxu1 %v3250_v15  ;;  %2924 = vmatprep.subr.bf16.mxu0 %v3272_v16  ;;  %v3310_v14 = vld [vmem:[#allocation11 + $0xa8] sm:$0xff]   ;;  %v3312_v15 = vld [vmem:[#allocation11 + $0xf0] sm:$0xff]  }
 0x1db   :  { %v3314_v16 = vld [vmem:[#allocation11 + $0xb0] sm:$0xff]  }
 0x1dc   :  { %2025 = vmatmul.mubr.bf16.vlgmr.msra.gmra.mrb[8].mxu0 %v3716_v17 }
 0x1dd   :  { %1928 = vmatpush1.bf16.msra.mxu1 %v3248_v18  ;;  %2925 = vmatpush3.bf16.msra.mxu0 %v3273_v19  ;;  %v3318_v18 = vld [vmem:[#allocation11 + $0xb8] sm:$0xff]   ;;  %v521_v19 = vrot.slane %v516_v49, %v3673_v7 }
 0x1de   :  { %1929 = vmatprep.subr.bf16.mxu1 %v3253_v20  ;;  %2926 = vmatprep.subr.bf16.mxu0 %v3274_v21  ;;  %v525_v20 = vrot.slane %v516_v49, %v3678_v9  ;;  %v3315_v49 = vld [vmem:[#allocation11 + $0x130] sm:$0xff]  }
 0x1e1   :  { %1930 = vmatpush1.bf16.msra.mxu1 %v3251_v22  ;;  %2927 = vmatpush3.bf16.msra.mxu0 %v3275_v23 }
 0x1e2   :  { %1931 = vmatprep.subr.bf16.mxu1 %v3256_v24  ;;  %2928 = vmatprep.subr.bf16.mxu0 %v3276_v25 }
 0x1e5   :  { %1932 = vmatpush1.bf16.msra.mxu1 %v3254_v26  ;;  %2929 = vmatpush3.bf16.msra.mxu0 %v3277_v27 }
 0x1e6   :  { %1933 = vmatprep.subr.bf16.mxu1 %v3259_v30  ;;  %2930 = vmatprep.subr.bf16.mxu0 %v3278_v28  ;;  %v3291_v28 = vld [vmem:[#allocation11 + $0x100] sm:$0xff]  }
 0x1e9   :  { %1934 = vmatpush1.bf16.msra.mxu1 %v3257_v29  ;;  %2931 = vmatpush3.bf16.msra.mxu0 %v3279_v34  ;;  %v3299_v34 = vld [vmem:[#allocation11 + $0x110] sm:$0xff]  }
 0x1ea   :  { %1935 = vmatprep.subr.bf16.mxu1 %v3262_v31  ;;  %2932 = vmatprep.subr.bf16.mxu0 %v3280_v36  ;;  %v3293_v31 = vld [vmem:[#allocation11 + $0x148] sm:$0xff]   ;;  %v3303_v36 = vld [vmem:[#allocation11 + $0x118] sm:$0xff]  }
 0x1ed   :  { %1936 = vmatpush1.bf16.msra.mxu1 %v3260_v32  ;;  %2933 = vmatpush3.bf16.msra.mxu0 %v3281_v38 }
 0x1ee   :  { %1937 = vmatprep.subr.bf16.mxu1 %v3265_v51  ;;  %2934 = vmatprep.subr.bf16.mxu0 %v3282_v40  ;;  %v3295_v51 = vld [vmem:[#allocation11 + $0x108] sm:$0xff]  }
 0x1f1   :  { %1938 = vmatpush1.bf16.msra.mxu1 %v3263_v33  ;;  %2935 = vmatpush3.bf16.msra.mxu0 %v3283_v43  ;;  %v3297_v33 = vld [vmem:[#allocation11 + $0x150] sm:$0xff]  }
 0x1f2   :  { %1939 = vmatprep.subr.bf16.mxu1 %v3268_v35  ;;  %2936 = vmatprep.subr.bf16.mxu0 %v3284_v44  ;;  %v3301_v35 = vld [vmem:[#allocation11 + $0x158] sm:$0xff]  }
 0x1f5   :  { %1940 = vmatpush1.bf16.msra.mxu1 %v3266_v37  ;;  %2937 = vmatpush3.bf16.msra.mxu0 %v3285_v45  ;;  %v3305_v37 = vld [vmem:[#allocation11 + $0x160] sm:$0xff]  }
 0x1f6   :  { %1941 = vmatprep.subr.bf16.mxu1 %v3271_v39  ;;  %2938 = vmatprep.subr.bf16.mxu0 %v3286_v47  ;;  %v3307_v39 = vld [vmem:[#allocation11 + $0x120] sm:$0xff]   ;;  %v3311_v47 = vld [vmem:[#allocation11 + $0x128] sm:$0xff]  }
 0x1f9   :  { %1942 = vmatpush1.bf16.msra.mxu1 %v3269_v41  ;;  %2939 = vmatpush3.bf16.msra.mxu0 %v3287_v48  ;;  %v3309_v41 = vld [vmem:[#allocation11 + $0x168] sm:$0xff]   ;;  %v3313_v48 = vld [vmem:[#allocation11 + $0x170] sm:$0xff]  }
 0x1fa   :  { %2946 = vmatprep.subr.bf16.mxu1 %v3288_v58  ;;  %2968 = vmatprep.subr.bf16.mxu0 %v3289_v6 }
 0x1fc   :  { %1944 = vmatmul.mubr.bf16.vlgmr.msra.gmra.mrb[24].mxu1 %v3716_v17  ;;  %v3316_v17 = vld [vmem:[#allocation11 + $0xf8] sm:$0xff]  }
 0x1fd   :  { %2947 = vmatpush3.bf16.msra.mxu1 %v3290_v59 }
 0x1fe   :  { %2948 = vmatprep.subr.bf16.mxu1 %v3292_v60 }
 0x201   :  { %2949 = vmatpush3.bf16.msra.mxu1 %v3294_v61 }
 0x202   :  { %2950 = vmatprep.subr.bf16.mxu1 %v3296_v62 }
 0x205   :  { %2951 = vmatpush3.bf16.msra.mxu1 %v3298_v63 }
 0x206   :  { %2952 = vmatprep.subr.bf16.mxu1 %v3300_v0 }
 0x209   :  { %2953 = vmatpush3.bf16.msra.mxu1 %v3302_v1 }
 0x20a   :  { %2954 = vmatprep.subr.bf16.mxu1 %v3304_v2 }
 0x20d   :  { %2955 = vmatpush3.bf16.msra.mxu1 %v3306_v46 }
 0x20e   :  { %2956 = vmatprep.subr.bf16.mxu1 %v3308_v13 }
 0x211   :  { %2957 = vmatpush3.bf16.msra.mxu1 %v3310_v14 }
 0x212   :  { %2958 = vmatprep.subr.bf16.mxu1 %v3312_v15 }
 0x215   :  { %2959 = vmatpush3.bf16.msra.mxu1 %v3314_v16 }
 0x216   :  { %2960 = vmatprep.subr.bf16.mxu1 %v3316_v17 }
 0x219   :  { %2961 = vmatpush3.bf16.msra.mxu1 %v3318_v18  ;;  %v2787_v18 = vld [vmem:[%s3760_s8] ss:$0 sm:$0xff]  ;;  %s3529_s8 = smov [#allocation13]  }
 0x21a   :  { %s2571_s21 = sshll.u32 %s3529_s8, 4  ;;  %s2572_s21 = int_to_ptr.vmem [resolvable:$true] %s2571_s21 }
 0x21b   :  { %s3484_s22 = scalar_lea.vmem %s2572_s21, 128  ;;  %p3489_p7 = scmp.lt.s32.totalorder %s2572_s21, %s2572_s21 }
 0x21c   :  { %p3485_p6 = scmp.ne.s32.totalorder %s2572_s21, %s3484_s22  ;;  %p3490_p8 = scmp.lt.s32.totalorder %s3484_s22, %s3484_s22 }
 0x21e   :  { %p3491_p9 = por %p3490_p8, %p3489_p7 }
 0x220   :  { %p3492_p10 = pnand %p3491_p9, %p3485_p6 }
 0x22f   :  { %v2852_v50 = vpop.f32.mrb[16].mxu1 }
 0x230   :  { %v2853_v53 = vpop.f32.mrb[17].mxu1 }
 0x231   :  { %v2854_v54 = vadd.f32 %v2853_v53, %v2852_v50  ;;  %v2855_v55 = vpop.f32.mrb[18].mxu1  ;;  %v3317_v50 = vld [vmem:[#allocation11 + $0x178] sm:$0xff]   ;;  %v1341_v53 = vld [vmem:[%s3758_s6] sm:$0x7] }
 0x232   :  { %v2856_v56 = vpop.f32.mrb[19].mxu1  ;;  %v1346_v63 = vrot.slane %v1341_v53, %v3673_v7  ;;  %v1350_v0 = vrot.slane %v1341_v53, %v3678_v9 }
 0x233   :  { %v1162_v57 = vadd.f32 %v2854_v54, %v529_v52  ;;  %v3319_v52 = vld [vmem:[#allocation11 + $0x138] sm:$0xff]   ;;  %v1354_v54 = vrot.slane %v1341_v53, %v3689_v42 }
 0x24f   :  { %v2874_v8 = vpop.f32.mrb[20].mxu1 }
 0x250   :  { %v2875_v3 = vpop.f32.mrb[21].mxu1 }
 0x251   :  { %v2876_v4 = vadd.f32 %v2875_v3, %v2874_v8  ;;  %v2877_v10 = vpop.f32.mrb[22].mxu1 }
 0x252   :  { %v2878_v11 = vpop.f32.mrb[23].mxu1 }
 0x253   :  { %v3724_v12 = vadd.f32 %v2876_v4, %v1162_v57 }
 0x255   :  { %v1209_v1 = vpack.c.bf16 %v3724_v12, %v3724_v12 }
 0x26f   :  { %v1120_v21 = vpop.f32.mrb[0].mxu0 }
 0x270   :  { %v2990_v22 = vadd.f32 %v1120_v21, %v521_v19  ;;  %v1122_v23 = vpop.f32.mrb[1].mxu0 }
 0x271   :  { %v2991_v24 = vadd.f32 %v1122_v23, %v525_v20  ;;  %v1124_v25 = vpop.f32.mrb[2].mxu0  ;;  %v2550_v23 = vand.u32 127, %v124_v5 }
 0x272   :  { %v1207_v26 = vpack.c.bf16 %v2990_v22, %v2990_v22  ;;  %v1125_v27 = vpop.f32.mrb[3].mxu0 }
 0x273   :  { %v1208_v30 = vpack.c.bf16 %v2991_v24, %v2991_v24  ;;  %vm2551_vm1 = vcmp.lt.s32.totalorder %v2550_v23, 6  ;;  %vm2562_vm2 = vcmp.eq.s32.totalorder %v2550_v23, 6 }
 0x275   :  { %3336 = vtanh.bf16 %v1208_v30 }
 0x276   :  { %3338 = vtanh.bf16 %v1207_v26 }
 0x280   :  { %v3337_v29 = vpop.eup %3336 }
 0x281   :  { %v3339_v32 = vpop.eup %3338  ;;  %2461 = vmatprep.mubr.bf16.mxu0 %v3337_v29 }
 0x282   :  { %2462 = vmatmul.mubr.bf16.vlgmr.msra.gmra.mrb[12].mxu0 %v3339_v32 }
 0x283   :  { %2969 = vmatpush3.bf16.msra.mxu0 %v3291_v28 }
 0x284   :  { %2970 = vmatprep.subr.bf16.mxu0 %v3293_v31 }
 0x287   :  { %2971 = vmatpush3.bf16.msra.mxu0 %v3295_v51 }
 0x288   :  { %2972 = vmatprep.subr.bf16.mxu0 %v3297_v33 }
 0x28b   :  { %2973 = vmatpush3.bf16.msra.mxu0 %v3299_v34 }
 0x28c   :  { %2974 = vmatprep.subr.bf16.mxu0 %v3301_v35 }
 0x28f   :  { %v2896_v38 = vpop.f32.mrb[4].mxu0  ;;  %2975 = vmatpush3.bf16.msra.mxu0 %v3303_v36 }
 0x290   :  { %v2897_v40 = vpop.f32.mrb[5].mxu0  ;;  %2976 = vmatprep.subr.bf16.mxu0 %v3305_v37 }
 0x291   :  { %v2898_v43 = vadd.f32 %v2897_v40, %v2896_v38  ;;  %v2899_v44 = vpop.f32.mrb[6].mxu0 }
 0x292   :  { %v2900_v45 = vpop.f32.mrb[7].mxu0 }
 0x293   :  { %2977 = vmatpush3.bf16.msra.mxu0 %v3307_v39  ;;  %v1987_v57 = vadd.f32 %v2898_v43, %v1354_v54 }
 0x294   :  { %2978 = vmatprep.subr.bf16.mxu0 %v3309_v41 }
 0x297   :  { %2979 = vmatpush3.bf16.msra.mxu0 %v3311_v47 }
 0x298   :  { %2980 = vmatprep.subr.bf16.mxu0 %v3313_v48 }
 0x29b   :  { %2981 = vmatpush3.bf16.msra.mxu0 %v3315_v49 }
 0x29c   :  { %2982 = vmatprep.subr.bf16.mxu0 %v3317_v50 }
 0x29f   :  { %2983 = vmatpush3.bf16.msra.mxu0 %v3319_v52 }
 0x2af   :  { %v2918_v55 = vpop.f32.mrb[8].mxu0 }
 0x2b0   :  { %v2919_v56 = vpop.f32.mrb[9].mxu0 }
 0x2b1   :  { %v2920_v58 = vadd.f32 %v2919_v56, %v2918_v55  ;;  %v2921_v6 = vpop.f32.mrb[10].mxu0 }
 0x2b2   :  { %v2922_v59 = vpop.f32.mrb[11].mxu0 }
 0x2b3   :  { %v2027_v60 = vadd.f32 %v2920_v58, %v1987_v57 }
 0x2b5   :  { %v2034_v61 = vpack.c.bf16 %v2027_v60, %v2027_v60 }
 0x2b7   :  { %3340 = vtanh.bf16 %v2034_v61 }
 0x2b8   :  { %3342 = vtanh.bf16 %v1209_v1 }
 0x2c2   :  { %v3341_v62 = vpop.eup %3340 }
 0x2c3   :  { %2541 = vmatprep.mubr.bf16.mxu0 %v3341_v62  ;;  %v3343_v13 = vpop.eup %3342 }
 0x2cf   :  { %v1945_v8 = vpop.f32.mrb[24].mxu1 }
 0x2d0   :  { %v2992_v42 = vadd.f32 %v1945_v8, %v1346_v63  ;;  %v1947_v2 = vpop.f32.mrb[25].mxu1 }
 0x2d1   :  { %v2993_v3 = vadd.f32 %v1947_v2, %v1350_v0  ;;  %v1949_v46 = vpop.f32.mrb[26].mxu1 }
 0x2d2   :  { %v2032_v4 = vpack.c.bf16 %v2992_v42, %v2992_v42  ;;  %v1950_v10 = vpop.f32.mrb[27].mxu1 }
 0x2d3   :  { %v2033_v11 = vpack.c.bf16 %v2993_v3, %v2993_v3 }
 0x2d4   :  { %3344 = vtanh.bf16 %v2032_v4 }
 0x2d5   :  { %3346 = vtanh.bf16 %v2033_v11 }
 0x2df   :  { %v3345_v14 = vpop.eup %3344 }
 0x2e0   :  { %v3347_v15 = vpop.eup %3346  ;;  %2501 = vmatprep.mubr.bf16.mxu1 %v3345_v14 }
 0x2e1   :  { %2502 = vmatmul.mubr.bf16.vlgmr.msra.gmra.mrb[28].mxu1 %v3343_v13  ;;  %2542 = vmatmul.mubr.bf16.vlgmr.msra.gmra.mrb[16].mxu0 %v3347_v15 }
 0x355   :  { %v2940_v7 = vpop.f32.mrb[12].mxu0 }
 0x356   :  { %v2941_v9 = vpop.f32.mrb[13].mxu0 }
 0x357   :  { %v2942_v12 = vadd.f32 %v2941_v9, %v2940_v7  ;;  %v2943_v16 = vpop.f32.mrb[14].mxu0 }
 0x358   :  { %v2944_v17 = vpop.f32.mrb[15].mxu0 }
 0x359   :  { %v2464_v24 = vadd.f32 %v2942_v12, %v2787_v18 }
 0x3b4   :  { %v2962_v19 = vpop.f32.mrb[28].mxu1  ;;  %v2984_v20 = vpop.f32.mrb[16].mxu0 }
 0x3b5   :  { %v2963_v21 = vpop.f32.mrb[29].mxu1  ;;  %v2985_v22 = vpop.f32.mrb[17].mxu0 }
 0x3b6   :  { %v2964_v25 = vadd.f32 %v2963_v21, %v2962_v19  ;;  %v2986_v26 = vadd.f32 %v2985_v22, %v2984_v20  ;;  %v2965_v27 = vpop.f32.mrb[30].mxu1  ;;  %v2987_v30 = vpop.f32.mrb[18].mxu0 }
 0x3b7   :  { %v2966_v28 = vpop.f32.mrb[31].mxu1  ;;  %v2988_v29 = vpop.f32.mrb[19].mxu0 }
 0x3b8   :  { %v2504_v31 = vadd.f32 %v2964_v25, %v2464_v24 }
 0x3ba   :  { %v2544_v32 = vadd.f32 %v2986_v26, %v2504_v31 }
 0x3bc   :  { %v2552_v51 = vsel %vm2551_vm1, %v2544_v32, -1e+30 }
 0x3bd   :  { %2553 = vmax.xlane.f32.xlu0 %v2552_v51 }
 0x44a   :  { %v2554_v33 = vpop.xlane.xlu0 %2553 }
 0x44b   :  { %v2555_v34 = vsub.f32 %v2552_v51, %v2554_v33 }
 0x44d   :  { %v2556_v35 = vmul.f32 1.442695, %v2555_v34 }
 0x44f   :  { %3348 = vpow2.f32 %v2556_v35 }
 0x459   :  { %v3349_v36 = vpop.eup %3348 }
 0x45a   :  { %2558 = vadd.xlane.f32.xlu0 %v3349_v36 }
 0x4e7   :  { %v2559_v37 = vpop.xlane.xlu0 %2558 }
 0x4e8   :  { %3350 = vrcp.f32 %v2559_v37 }
 0x4f2   :  { %v3351_v5 = vpop.eup %3350 }
 0x4f3   :  { %v2561_v38 = vmul.f32 %v3351_v5, %v3349_v36 }
 0x4f5   :  { %v2563_v39 = vsel %vm2562_vm2, %v2544_v32, %v2561_v38 }
 0x4f6   :  { %2564 = vst [vmem:[#allocation13] sm:$0xff] %v2563_v39 }
 0x4f7   :  { %3495 = shalt.err (!%p3492_p10)
}
 0x4f8   :  { %s3496_s26 = scalar_lea.hbm %s3761_s9, 128 }
 0x4f9   :  { %p3497_p11 = scmp.ne.s32.totalorder %s3761_s9, %s3496_s26  ;;  %p3500_p12 = scmp.lt.u32.totalorder %s3496_s26, %s3761_s9 }
 0x4fb   :  { %p3502_p13 = pnand %p3500_p12, %p3497_p11 }
 0x4fd   :  { %3505 = shalt.err (!%p3502_p13)
}
 0x4fe   :  { %2574 = dma.vmem_to_hbm [thread:$0]  %s2572_s21, 128, %s3761_s9, [#allocation4]  }
 0x4ff   :  { %3514 = dma.done.wait [#allocation4], 128  }
 0x500   :  { %3515 = vsyncadd [#allocation4], 4294967168 }
 0x501   :  { %2578 = vsyncpa [#allocation3], 1 }
 0x502   :  { %2579 = vsyncpa [#allocation6], 1 }
 0x503   :  { %2580 = vsyncpa [#allocation9], 1 }
 0x504   :  { %2581 = vsyncpa [#allocation12], 1 }
 0x505   :  { %2582 = vsyncpa [#allocation4], 1 }

// kernel: tpu_custom_call.1
= control target key start
LH: loop header
LB: loop body
LE: loop exit
PB: predicated region body
PF: predicated region fallthrough
CT: control target
= control target key end

     0   :  { %14 = vsyncpa [#allocation3], 0  ;;  %s3752_s0 = inlined_call_operand.hbm [shape: f32[8,16], index: 0, kind: input, shape index: {}]   ;;  %s3753_s1 = inlined_call_operand.hbm [shape: bf16[16,1024], index: 1, kind: input, shape index: {}]   ;;  %s3754_s2 = inlined_call_operand.hbm [shape: f32[1,1024], index: 2, kind: input, shape index: {}]   ;;  %s3755_s3 = inlined_call_operand.hbm [shape: bf16[512,384], index: 3, kind: input, shape index: {}]   ;;  %s3756_s4 = inlined_call_operand.vmem [shape: f32[1,384], index: 4, kind: input, shape index: {}]   ;;  %s3757_s5 = inlined_call_operand.hbm [shape: bf16[512,384], index: 5, kind: input, shape index: {}]   ;;  %s3758_s6 = inlined_call_operand.vmem [shape: f32[1,384], index: 6, kind: input, shape index: {}]   ;;  %s3759_s7 = inlined_call_operand.hbm [shape: bf16[768,128], index: 7, kind: input, shape index: {}]   ;;  %s3760_s8 = inlined_call_operand.vmem [shape: f32[1,128], index: 8, kind: input, shape index: {}]   ;;  %s3761_s9 = inlined_call_operand.hbm [shape: f32[8,128], index: 9, kind: output, shape index: {}]  }
   0x1   :  { %15 = vsyncpa [#allocation6], 0 }
   0x2   :  { %16 = vsyncpa [#allocation9], 0 }
   0x3   :  { %17 = vsyncpa [#allocation12], 0 }
   0x4   :  { %18 = vsyncpa [#allocation4], 0  ;;  %s3516_s30 = smov [#allocation5]   ;;  %s3352_s13 = scalar_lea.hbm %s3753_s1, 1024 }
   0x5   :  { %s34_s10 = sshll.u32 %s3516_s30, 4  ;;  %p3353_p0 = scmp.ne.s32.totalorder %s3753_s1, %s3352_s13  ;;  %s35_s10 = int_to_ptr.vmem [resolvable:$true] %s34_s10 }
   0x6   :  { %p3356_p1 = scmp.lt.u32.totalorder %s3352_s13, %s3753_s1 }
   0x8   :  { %p3358_p2 = pnand %p3356_p1, %p3353_p0 }
   0xa   :  { %3361 = shalt.err (!%p3358_p2)
}
   0xb   :  { %s3362_s18 = scalar_lea.vmem %s35_s10, 1024  ;;  %p3367_p4 = scmp.lt.s32.totalorder %s35_s10, %s35_s10 }
   0xc   :  { %p3363_p3 = scmp.ne.s32.totalorder %s35_s10, %s3362_s18  ;;  %p3368_p5 = scmp.lt.s32.totalorder %s3362_s18, %s3362_s18 }
   0xe   :  { %p3369_p6 = por %p3368_p5, %p3367_p4 }
  0x10   :  { %p3370_p7 = pnand %p3369_p6, %p3363_p3 }
  0x12   :  { %3373 = shalt.err (!%p3370_p7)
}
  0x13   :  { %s3517_s19 = smov 512   ;;  %s3518_s20 = smov 32  }
  0x14   :  { %40 = dma.hbm_to_vmem [thread:$0]  %s3753_s1, 1024, %s35_s10, [#allocation6], %s3517_s19, %s3517_s19, %s3518_s20  }
  0x15   :  { %s3519_s23 = smov [#allocation8]   ;;  %s3374_s27 = scalar_lea.hbm %s3755_s3, 12288 }
  0x16   :  { %s56_s24 = sshll.u32 %s3519_s23, 4  ;;  %p3375_p8 = scmp.ne.s32.totalorder %s3755_s3, %s3374_s27  ;;  %s57_s24 = int_to_ptr.vmem [resolvable:$true] %s56_s24 }
  0x17   :  { %p3378_p9 = scmp.lt.u32.totalorder %s3374_s27, %s3755_s3 }
  0x19   :  { %p3380_p10 = pnand %p3378_p9, %p3375_p8 }
  0x1b   :  { %3383 = shalt.err (!%p3380_p10)
}
  0x1c   :  { %s3384_s12 = scalar_lea.vmem %s57_s24, 12288  ;;  %p3389_p12 = scmp.lt.s32.totalorder %s57_s24, %s57_s24 }
  0x1d   :  { %p3385_p11 = scmp.ne.s32.totalorder %s57_s24, %s3384_s12  ;;  %p3390_p13 = scmp.lt.s32.totalorder %s3384_s12, %s3384_s12 }
  0x1f   :  { %p3391_p0 = por %p3390_p13, %p3389_p12 }
  0x21   :  { %p3392_p1 = pnand %p3391_p0, %p3385_p11 }
  0x23   :  { %3395 = shalt.err (!%p3392_p1)
}
  0x24   :  { %s3520_s1 = smov 192   ;;  %s3521_s10 = smov 12  }
  0x25   :  { %62 = dma.hbm_to_vmem [thread:$0]  %s3755_s3, 12288, %s57_s24, [#allocation9], %s3520_s1, %s3520_s1, %s3521_s10  }
  0x26   :  { %s3522_s15 = smov [#allocation2]   ;;  %s3523_s17 = smov [#allocation7]  }
  0x27   :  { %s25_s16 = sshll.u32 %s3522_s15, 4  ;;  %s47_s18 = sshll.u32 %s3523_s17, 4  ;;  %s26_s16 = int_to_ptr.vmem [resolvable:$true] %s25_s16  ;;  %s48_s18 = int_to_ptr.vmem [resolvable:$true] %s47_s18 }
  0x28   :  { %s3396_s21 = scalar_lea.hbm %s3752_s0, 128 }
  0x29   :  { %p3397_p2 = scmp.ne.s32.totalorder %s3752_s0, %s3396_s21  ;;  %p3400_p3 = scmp.lt.u32.totalorder %s3396_s21, %s3752_s0 }
  0x2b   :  { %p3402_p4 = pnand %p3400_p3, %p3397_p2 }
  0x2d   :  { %3405 = shalt.err (!%p3402_p4)
}
  0x2e   :  { %s3406_s3 = scalar_lea.vmem %s26_s16, 128  ;;  %p3411_p6 = scmp.lt.s32.totalorder %s26_s16, %s26_s16 }
  0x2f   :  { %p3407_p5 = scmp.ne.s32.totalorder %s26_s16, %s3406_s3  ;;  %p3412_p7 = scmp.lt.s32.totalorder %s3406_s3, %s3406_s3 }
  0x31   :  { %p3413_p8 = por %p3412_p7, %p3411_p6 }
  0x33   :  { %p3414_p9 = pnand %p3413_p8, %p3407_p5 }
  0x35   :  { %3417 = shalt.err (!%p3414_p9)
}
  0x36   :  { %28 = dma.hbm_to_vmem [thread:$0]  %s3752_s0, 128, %s26_s16, [#allocation3]  }
  0x37   :  { %s3418_s30 = scalar_lea.hbm %s3754_s2, 128 }
  0x38   :  { %p3419_p10 = scmp.ne.s32.totalorder %s3754_s2, %s3418_s30  ;;  %p3422_p11 = scmp.lt.u32.totalorder %s3418_s30, %s3754_s2 }
  0x3a   :  { %p3424_p12 = pnand %p3422_p11, %p3419_p10 }
  0x3c   :  { %3427 = shalt.err (!%p3424_p12)
}
  0x3d   :  { %s3428_s15 = scalar_lea.vmem %s48_s18, 128  ;;  %p3433_p0 = scmp.lt.s32.totalorder %s48_s18, %s48_s18 }
  0x3e   :  { %p3429_p13 = scmp.ne.s32.totalorder %s48_s18, %s3428_s15  ;;  %p3434_p1 = scmp.lt.s32.totalorder %s3428_s15, %s3428_s15 }
  0x40   :  { %p3435_p2 = por %p3434_p1, %p3433_p0 }
  0x42   :  { %p3436_p3 = pnand %p3435_p2, %p3429_p13 }
  0x44   :  { %3439 = shalt.err (!%p3436_p3)
}
  0x45   :  { %50 = dma.hbm_to_vmem [thread:$0]  %s3754_s2, 128, %s48_s18, [#allocation6]  }
  0x46   :  { %s3524_s17 = smov [#allocation10]   ;;  %s3525_s20 = smov [#allocation11]  }
  0x47   :  { %s70_s19 = sshll.u32 %s3524_s17, 4  ;;  %s84_s21 = sshll.u32 %s3525_s20, 4  ;;  %s71_s19 = int_to_ptr.vmem [resolvable:$true] %s70_s19  ;;  %s3631_s21 = int_to_ptr.vmem [resolvable:$true] %s84_s21 }
  0x48   :  { %s3440_s25 = scalar_lea.hbm %s3757_s5, 12288 }
  0x49   :  { %p3441_p4 = scmp.ne.s32.totalorder %s3757_s5, %s3440_s25  ;;  %p3444_p5 = scmp.lt.u32.totalorder %s3440_s25, %s3757_s5 }
  0x4b   :  { %p3446_p6 = pnand %p3444_p5, %p3441_p4 }
  0x4d   :  { %3449 = shalt.err (!%p3446_p6)
}
  0x4e   :  { %s3450_s2 = scalar_lea.vmem %s71_s19, 12288  ;;  %p3455_p8 = scmp.lt.s32.totalorder %s71_s19, %s71_s19 }
  0x4f   :  { %p3451_p7 = scmp.ne.s32.totalorder %s71_s19, %s3450_s2  ;;  %p3456_p9 = scmp.lt.s32.totalorder %s3450_s2, %s3450_s2 }
  0x51   :  { %p3457_p10 = por %p3456_p9, %p3455_p8 }
  0x53   :  { %p3458_p11 = pnand %p3457_p10, %p3451_p7 }
  0x55   :  { %3461 = shalt.err (!%p3458_p11)
}
  0x56   :  { %76 = dma.hbm_to_vmem [thread:$0]  %s3757_s5, 12288, %s71_s19, [#allocation9], %s3520_s1, %s3520_s1, %s3521_s10  }
  0x57   :  { %s3462_s11 = scalar_lea.hbm %s3759_s7, 6144 }
  0x58   :  { %p3463_p12 = scmp.ne.s32.totalorder %s3759_s7, %s3462_s11  ;;  %p3466_p13 = scmp.lt.u32.totalorder %s3462_s11, %s3759_s7 }
  0x5a   :  { %p3468_p0 = pnand %p3466_p13, %p3463_p12 }
  0x5c   :  { %3471 = shalt.err (!%p3468_p0)
}
  0x5d   :  { %s3472_s0 = scalar_lea.vmem %s3631_s21, 6144  ;;  %p3477_p2 = scmp.lt.s32.totalorder %s3631_s21, %s3631_s21 }
  0x5e   :  { %p3473_p1 = scmp.ne.s32.totalorder %s3631_s21, %s3472_s0  ;;  %p3478_p3 = scmp.lt.s32.totalorder %s3472_s0, %s3472_s0 }
  0x60   :  { %p3479_p4 = por %p3478_p3, %p3477_p2 }
  0x62   :  { %p3480_p5 = pnand %p3479_p4, %p3473_p1 }
  0x64   :  { %3483 = shalt.err (!%p3480_p5)
}
  0x65   :  { %s3526_s5 = smov 64   ;;  %s3527_s1 = smov 4  }
  0x66   :  { %90 = dma.hbm_to_vmem [thread:$0]  %s3759_s7, 6144, %s3631_s21, [#allocation12], %s3526_s5, %s3526_s5, %s3527_s1  }
  0x67   :  { %3506 = dma.done.wait [#allocation3], 128  }
  0x68   :  { %3507 = vsyncadd [#allocation3], 4294967168 }
  0x69   :  { %3508 = dma.done.wait [#allocation6], 1152  }
  0x6a   :  { %3509 = vsyncadd [#allocation6], 4294966144 }
  0x6b   :  { %3510 = dma.done.wait [#allocation9], 24576  }
  0x6c   :  { %3511 = vsyncadd [#allocation9], 4294942720 }
  0x6d   :  { %3512 = dma.done.wait [#allocation12], 6144  }
  0x6e   :  { %3513 = vsyncadd [#allocation12], 4294961152  ;;  %v3528_v0 = vmov 0   ;;  %v114_v1 = vld [vmem:[#allocation5] sm:$0xff]  ;;  %v112_v3 = vld [vmem:[#allocation2] sm:$0xff]  ;;  %vm204_vm0 = vcmask 130048  }
  0x6f   :  { %240 = vmatprep.mubr.bf16.mxu1 %v3528_v0  ;;  %v118_v2 = vld [vmem:[#allocation5 + $0x20] sm:$0xff]  ;;  %v115_v6 = vld [vmem:[#allocation5 + $0x8] sm:$0xff]  ;;  %v116_v9 = vld [vmem:[#allocation5 + $0x10] sm:$0xff]  ;;  %v113_v11 = vpack.c.bf16 %v112_v3, %v112_v3 }
  0x70   :  { %v2584_v4 = vcombine.high %v114_v1, %v118_v2  ;;  %v2583_v5 = vcombine.low %v114_v1, %v118_v2  ;;  %v119_v7 = vld [vmem:[#allocation5 + $0x28] sm:$0xff]  ;;  %v120_v10 = vld [vmem:[#allocation5 + $0x30] sm:$0xff]  ;;  %v117_v19 = vld [vmem:[#allocation5 + $0x18] sm:$0xff] }
  0x71   :  { %v2586_v8 = vcombine.high %v115_v6, %v119_v7  ;;  %v3016_v12 = vld [vmem:[#allocation8 + $0x4] ss:$12 sps:$4 sm:$0xff]   ;;  %v2585_v13 = vcombine.low %v115_v6, %v119_v7  ;;  %v3018_v14 = vld [vmem:[#allocation8] ss:$12 sps:$4 sm:$0xff]   ;;  %v2588_v15 = vcombine.high %v116_v9, %v120_v10  ;;  %v3019_v16 = vld [vmem:[#allocation8 + $0x1c] ss:$12 sps:$4 sm:$0xff]   ;;  %v2587_v23 = vcombine.low %v116_v9, %v120_v10 }
  0x72   :  { %208 = vmatprep.subr.bf16.mxu1 %v2584_v4  ;;  %1045 = vmatprep.subr.bf16.mxu0 %v3016_v12  ;;  %v3021_v17 = vld [vmem:[#allocation8 + $0x18] ss:$12 sps:$4 sm:$0xff]   ;;  %v3022_v18 = vld [vmem:[#allocation8 + $0x34] ss:$12 sps:$4 sm:$0xff]   ;;  %v3024_v21 = vld [vmem:[#allocation8 + $0x30] ss:$12 sps:$4 sm:$0xff]  }
  0x73   :  { %209 = vmatpush1.bf16.msra.mxu1 %v2583_v5  ;;  %1046 = vmatpush1.bf16.msra.mxu0 %v3018_v14  ;;  %v121_v20 = vld [vmem:[#allocation5 + $0x38] sm:$0xff]  ;;  %v3025_v22 = vld [vmem:[#allocation8 + $0x4c] ss:$12 sps:$4 sm:$0xff]   ;;  %v3031_v28 = vld [vmem:[#allocation8 + $0x7c] ss:$12 sps:$4 sm:$0xff]   ;;  %v124_v5 = vlaneseq }
  0x74   :  { %249 = vmatprep.subr.bf16.mxu1 %v2586_v8  ;;  %1047 = vmatprep.subr.bf16.mxu0 %v3019_v16  ;;  %v2590_v24 = vcombine.high %v117_v19, %v121_v20  ;;  %v3027_v25 = vld [vmem:[#allocation8 + $0x48] ss:$12 sps:$4 sm:$0xff]   ;;  %v3028_v26 = vld [vmem:[#allocation8 + $0x64] ss:$12 sps:$4 sm:$0xff]   ;;  %v3030_v27 = vld [vmem:[#allocation8 + $0x60] ss:$12 sps:$4 sm:$0xff]   ;;  %v2589_v29 = vcombine.low %v117_v19, %v121_v20 }
  0x75   :  { %v3042_v30 = vld [vmem:[#allocation8 + $0xc8] ss:$12 sps:$4 sm:$0xff]   ;;  %v3033_v31 = vld [vmem:[#allocation8 + $0x78] ss:$12 sps:$4 sm:$0xff]   ;;  %v3036_v33 = vld [vmem:[#allocation8 + $0x90] ss:$12 sps:$4 sm:$0xff]  }
  0x76   :  { %2591 = vmatmul.mubr.msk.bf16.vlgmr.msra.gmra.mrb[0].mxu1 %vm204_vm0, %v113_v11  ;;  %v3034_v32 = vld [vmem:[#allocation8 + $0x94] ss:$12 sps:$4 sm:$0xff]   ;;  %v3037_v34 = vld [vmem:[#allocation8 + $0xac] ss:$12 sps:$4 sm:$0xff]   ;;  %v3040_v38 = vld [vmem:[#allocation8 + $0xc4] ss:$12 sps:$4 sm:$0xff]  }
  0x77   :  { %250 = vmatpush1.bf16.msra.mxu1 %v2585_v13  ;;  %281 = vmatprep.mubr.bf16.mxu1 %v3528_v0  ;;  %v3044_v35 = vld [vmem:[#allocation8 + $0x8] ss:$12 sps:$4 sm:$0xff]   ;;  %v3047_v36 = vld [vmem:[#allocation8 + $0xe0] ss:$12 sps:$4 sm:$0xff]   ;;  %v3052_v40 = vld [vmem:[#allocation8 + $0xf8] ss:$12 sps:$4 sm:$0xff]  }
  0x78   :  { %290 = vmatprep.subr.bf16.mxu1 %v2588_v15  ;;  %1048 = vmatpush1.bf16.msra.mxu0 %v3021_v17  ;;  %v3039_v37 = vld [vmem:[#allocation8 + $0xa8] ss:$12 sps:$4 sm:$0xff]   ;;  %v3049_v39 = vld [vmem:[#allocation8 + $0x20] ss:$12 sps:$4 sm:$0xff]   ;;  %v3054_v43 = vld [vmem:[#allocation8 + $0x38] ss:$12 sps:$4 sm:$0xff]  }
  0x79   :  { %1049 = vmatprep.subr.bf16.mxu0 %v3022_v18  ;;  %v3043_v41 = vld [vmem:[#allocation8 + $0xc0] ss:$12 sps:$4 sm:$0xff]   ;;  %v3045_v42 = vld [vmem:[#allocation8 + $0xdc] ss:$12 sps:$4 sm:$0xff]   ;;  %v3048_v45 = vld [vmem:[#allocation8 + $0xd8] ss:$12 sps:$4 sm:$0xff]  }
  0x7a   :  { %v3057_v44 = vld [vmem:[#allocation8 + $0x110] ss:$12 sps:$4 sm:$0xff]   ;;  %v3050_v46 = vld [vmem:[#allocation8 + $0xf4] ss:$12 sps:$4 sm:$0xff]   ;;  %v3055_v49 = vld [vmem:[#allocation8 + $0x10c] ss:$12 sps:$4 sm:$0xff]  }
  0x7b   :  { %v3059_v47 = vld [vmem:[#allocation8 + $0x50] ss:$12 sps:$4 sm:$0xff]   ;;  %v3058_v50 = vld [vmem:[#allocation8 + $0x108] ss:$12 sps:$4 sm:$0xff]   ;;  %v3063_v53 = vld [vmem:[#allocation8 + $0x120] ss:$12 sps:$4 sm:$0xff]  }
  0x7c   :  { %1050 = vmatpush1.bf16.msra.mxu0 %v3024_v21  ;;  %v3053_v48 = vld [vmem:[#allocation8 + $0xf0] ss:$12 sps:$4 sm:$0xff]   ;;  %v3062_v52 = vld [vmem:[#allocation8 + $0x128] ss:$12 sps:$4 sm:$0xff]   ;;  %v3067_v56 = vld [vmem:[#allocation8 + $0x140] ss:$12 sps:$4 sm:$0xff]  }
  0x7d   :  { %1051 = vmatprep.subr.bf16.mxu0 %v3025_v22  ;;  %v3060_v51 = vld [vmem:[#allocation8 + $0x124] ss:$12 sps:$4 sm:$0xff]   ;;  %v3064_v54 = vld [vmem:[#allocation8 + $0x68] ss:$12 sps:$4 sm:$0xff]   ;;  %v3069_v58 = vld [vmem:[#allocation8 + $0x80] ss:$12 sps:$4 sm:$0xff]  }
  0x7e   :  { %2592 = vmatmul.mubr.msk.bf16.vlgmr.msra.gmra.mrb[4].mxu1 %vm204_vm0, %v113_v11  ;;  %v3065_v55 = vld [vmem:[#allocation8 + $0x13c] ss:$12 sps:$4 sm:$0xff]   ;;  %v3068_v57 = vld [vmem:[#allocation8 + $0x138] ss:$12 sps:$4 sm:$0xff]   ;;  %v3070_v59 = vld [vmem:[#allocation8 + $0x154] ss:$12 sps:$4 sm:$0xff]  }
  0x7f   :  { %291 = vmatpush1.bf16.msra.mxu1 %v2587_v23  ;;  %322 = vmatprep.mubr.bf16.mxu1 %v3528_v0  ;;  %v3072_v60 = vld [vmem:[#allocation8 + $0x158] ss:$12 sps:$4 sm:$0xff]   ;;  %v3073_v61 = vld [vmem:[#allocation8 + $0x150] ss:$12 sps:$4 sm:$0xff]   ;;  %v3078_v1 = vld [vmem:[#allocation8 + $0x168] ss:$12 sps:$4 sm:$0xff]  }
  0x80   :  { %331 = vmatprep.subr.bf16.mxu1 %v2590_v24  ;;  %1052 = vmatpush1.bf16.msra.mxu0 %v3027_v25  ;;  %v3074_v62 = vld [vmem:[#allocation8 + $0x98] ss:$12 sps:$4 sm:$0xff]   ;;  %v3079_v2 = vld [vmem:[#allocation8 + $0xb0] ss:$12 sps:$4 sm:$0xff]   ;;  %v3083_v4 = vld [vmem:[#allocation8 + $0x248] ss:$12 sps:$4 sm:$0xff]  }
  0x81   :  { %1053 = vmatprep.subr.bf16.mxu0 %v3028_v26  ;;  %v3075_v63 = vld [vmem:[#allocation8 + $0x16c] ss:$12 sps:$4 sm:$0xff]   ;;  %v3082_v3 = vld [vmem:[#allocation8 + $0x184] ss:$12 sps:$4 sm:$0xff]   ;;  %v3670_v6 = vshrl.u32 %v124_v5, 7 }
  0x82   :  { %v3675_v8 = vld [vmem:[#allocation7] sm:$0xff] }
  0x83   :  { %v3673_v7 = vsub.s32 0, %v3670_v6  ;;  %v3678_v9 = vsub.s32 1, %v3670_v6  ;;  %v138_v17 = vsub.s32 3, %v3670_v6 }
  0x84   :  { %1054 = vmatpush1.bf16.msra.mxu0 %v3030_v27 }
  0x85   :  { %1055 = vmatprep.subr.bf16.mxu0 %v3031_v28  ;;  %v127_v10 = vrot.slane %v3675_v8, %v3673_v7  ;;  %v139_v21 = vrot.slane %v3675_v8, %v138_v17  ;;  %v3080_v28 = vld [vmem:[#allocation8 + $0x180] ss:$12 sps:$4 sm:$0xff]   ;;  %v3119_v17 = vld [vmem:[#allocation8 + $0x230] ss:$12 sps:$4 sm:$0xff]  }
  0x86   :  { %2593 = vmatmul.mubr.msk.bf16.vlgmr.msra.gmra.mrb[8].mxu1 %vm204_vm0, %v113_v11 }
  0x87   :  { %332 = vmatpush1.bf16.msra.mxu1 %v2589_v29  ;;  %363 = vmatprep.mubr.bf16.mxu1 %v3528_v0  ;;  %v3077_v0 = vld [vmem:[#allocation8 + $0x170] ss:$12 sps:$4 sm:$0xff]   ;;  %v3084_v29 = vld [vmem:[#allocation8 + $0x188] ss:$12 sps:$4 sm:$0xff]  }
  0x88   :  { %2836 = vmatprep.subr.bf16.mxu1 %v3042_v30  ;;  %1056 = vmatpush1.bf16.msra.mxu0 %v3033_v31 }
  0x89   :  { %1057 = vmatprep.subr.bf16.mxu0 %v3034_v32  ;;  %v3087_v32 = vld [vmem:[#allocation8 + $0x19c] ss:$12 sps:$4 sm:$0xff]  }
  0x8c   :  { %1058 = vmatpush1.bf16.msra.mxu0 %v3036_v33  ;;  %v3088_v33 = vld [vmem:[#allocation8 + $0x260] ss:$12 sps:$4 sm:$0xff]  }
  0x8d   :  { %1059 = vmatprep.subr.bf16.mxu0 %v3037_v34 }
  0x8e   :  { %2594 = vmatmul.mubr.msk.bf16.vlgmr.msra.gmra.mrb[12].mxu1 %vm204_vm0, %v113_v11  ;;  %v131_v11 = vrot.slane %v3675_v8, %v3678_v9 }
  0x8f   :  { %2837 = vmatpush3.bf16.msra.mxu1 %v3044_v35 }
  0x90   :  { %2838 = vmatprep.subr.bf16.mxu1 %v3047_v36  ;;  %1060 = vmatpush1.bf16.msra.mxu0 %v3039_v37 }
  0x91   :  { %1061 = vmatprep.subr.bf16.mxu0 %v3040_v38  ;;  %v3085_v38 = vld [vmem:[#allocation8 + $0x198] ss:$12 sps:$4 sm:$0xff]  }
  0x93   :  { %2839 = vmatpush3.bf16.msra.mxu1 %v3049_v39  ;;  %v3089_v39 = vld [vmem:[#allocation8 + $0x1a0] ss:$12 sps:$4 sm:$0xff]  }
  0x94   :  { %2840 = vmatprep.subr.bf16.mxu1 %v3052_v40  ;;  %1062 = vmatpush1.bf16.msra.mxu0 %v3043_v41  ;;  %v3092_v40 = vld [vmem:[#allocation8 + $0x1b4] ss:$12 sps:$4 sm:$0xff]   ;;  %v3093_v41 = vld [vmem:[#allocation8 + $0x278] ss:$12 sps:$4 sm:$0xff]  }
  0x95   :  { %1063 = vmatprep.subr.bf16.mxu0 %v3045_v42  ;;  %v3689_v42 = vsub.s32 2, %v3670_v6 }
  0x97   :  { %2841 = vmatpush3.bf16.msra.mxu1 %v3054_v43  ;;  %v3090_v43 = vld [vmem:[#allocation8 + $0x1b0] ss:$12 sps:$4 sm:$0xff]  }
  0x98   :  { %2842 = vmatprep.subr.bf16.mxu1 %v3057_v44  ;;  %1064 = vmatpush1.bf16.msra.mxu0 %v3048_v45  ;;  %v3094_v44 = vld [vmem:[#allocation8 + $0x1b8] ss:$12 sps:$4 sm:$0xff]   ;;  %v146_v45 = vsub.s32 5, %v3670_v6 }
  0x99   :  { %1065 = vmatprep.subr.bf16.mxu0 %v3050_v46 }
  0x9b   :  { %2843 = vmatpush3.bf16.msra.mxu1 %v3059_v47 }
  0x9c   :  { %1066 = vmatpush1.bf16.msra.mxu0 %v3053_v48  ;;  %2844 = vmatprep.subr.bf16.mxu1 %v3062_v52  ;;  %v135_v48 = vrot.slane %v3675_v8, %v3689_v42 }
  0x9d   :  { %1067 = vmatprep.subr.bf16.mxu0 %v3055_v49  ;;  %v3097_v49 = vld [vmem:[#allocation8 + $0x1cc] ss:$12 sps:$4 sm:$0xff]  }
  0x9f   :  { %2845 = vmatpush3.bf16.msra.mxu1 %v3064_v54  ;;  %v3095_v54 = vld [vmem:[#allocation8 + $0x1c8] ss:$12 sps:$4 sm:$0xff]  }
  0xa0   :  { %1068 = vmatpush1.bf16.msra.mxu0 %v3058_v50  ;;  %2846 = vmatprep.subr.bf16.mxu1 %v3067_v56  ;;  %v3098_v50 = vld [vmem:[#allocation8 + $0x290] ss:$12 sps:$4 sm:$0xff]   ;;  %v147_v56 = vrot.slane %v3675_v8, %v146_v45  ;;  %v3153_v45 = vld [vmem:[#allocation10 + $0x78] ss:$12 sps:$4 sm:$0xff]  }
  0xa1   :  { %1069 = vmatprep.subr.bf16.mxu0 %v3060_v51 }
  0xa3   :  { %2847 = vmatpush3.bf16.msra.mxu1 %v3069_v58  ;;  %v3102_v58 = vld [vmem:[#allocation8 + $0x1e4] ss:$12 sps:$4 sm:$0xff]  }
  0xa4   :  { %1070 = vmatpush1.bf16.msra.mxu0 %v3063_v53  ;;  %2848 = vmatprep.subr.bf16.mxu1 %v3072_v60  ;;  %v3100_v60 = vld [vmem:[#allocation8 + $0x1e0] ss:$12 sps:$4 sm:$0xff]  }
  0xa5   :  { %1071 = vmatprep.subr.bf16.mxu0 %v3065_v55  ;;  %v3099_v55 = vld [vmem:[#allocation8 + $0x1d0] ss:$12 sps:$4 sm:$0xff]  }
  0xa7   :  { %2849 = vmatpush3.bf16.msra.mxu1 %v3074_v62 }
  0xa8   :  { %1072 = vmatpush1.bf16.msra.mxu0 %v3068_v57  ;;  %2850 = vmatprep.subr.bf16.mxu1 %v3077_v0  ;;  %v3107_v0 = vld [vmem:[#allocation8 + $0x1fc] ss:$12 sps:$4 sm:$0xff]  }
  0xa9   :  { %1073 = vmatprep.subr.bf16.mxu0 %v3070_v59  ;;  %v3103_v59 = vld [vmem:[#allocation8 + $0x2a8] ss:$12 sps:$4 sm:$0xff]  }
  0xab   :  { %2851 = vmatpush3.bf16.msra.mxu1 %v3079_v2  ;;  %v3105_v2 = vld [vmem:[#allocation8 + $0x1f8] ss:$12 sps:$4 sm:$0xff]  }
  0xac   :  { %1074 = vmatpush1.bf16.msra.mxu0 %v3073_v61  ;;  %2858 = vmatprep.subr.bf16.mxu1 %v3083_v4  ;;  %v3104_v61 = vld [vmem:[#allocation8 + $0x1e8] ss:$12 sps:$4 sm:$0xff]  }
  0xad   :  { %1075 = vmatprep.subr.bf16.mxu0 %v3075_v63 }
  0xb0   :  { %1076 = vmatpush1.bf16.msra.mxu0 %v3078_v1  ;;  %v3108_v1 = vld [vmem:[#allocation8 + $0x2c0] ss:$12 sps:$4 sm:$0xff]  }
  0xb1   :  { %1086 = vmatprep.subr.bf16.mxu0 %v3082_v3  ;;  %v3109_v3 = vld [vmem:[#allocation8 + $0x200] ss:$12 sps:$4 sm:$0xff]  }
 0x149   :  { %v242_v12 = vpop.f32.mrb[0].mxu1 }
 0x14a   :  { %v243_v13 = vadd.f32 %v242_v12, %v127_v10  ;;  %v244_v14 = vpop.f32.mrb[1].mxu1  ;;  %v3112_v10 = vld [vmem:[#allocation8 + $0x214] ss:$12 sps:$4 sm:$0xff]   ;;  %v3110_v12 = vld [vmem:[#allocation8 + $0x210] ss:$12 sps:$4 sm:$0xff]  }
 0x14b   :  { %v245_v15 = vadd.f32 %v244_v14, %v131_v11  ;;  %v246_v16 = vpop.f32.mrb[2].mxu1  ;;  %v3113_v11 = vld [vmem:[#allocation8 + $0x2d8] ss:$12 sps:$4 sm:$0xff]  }
 0x14c   :  { %v372_v18 = vpack.c.bf16 %v243_v13, %v243_v13  ;;  %v247_v19 = vpop.f32.mrb[3].mxu1  ;;  %v3114_v13 = vld [vmem:[#allocation8 + $0x218] ss:$12 sps:$4 sm:$0xff]   ;;  %v3115_v16 = vld [vmem:[#allocation8 + $0x228] ss:$12 sps:$4 sm:$0xff]  }
 0x14d   :  { %v373_v20 = vpack.c.bf16 %v245_v15, %v245_v15  ;;  %v3117_v14 = vld [vmem:[#allocation8 + $0x22c] ss:$12 sps:$4 sm:$0xff]   ;;  %v3118_v15 = vld [vmem:[#allocation8 + $0x2f0] ss:$12 sps:$4 sm:$0xff]  }
 0x14e   :  { %v3125_v19 = vld [vmem:[#allocation10 + $0x4] ss:$12 sps:$4 sm:$0xff]  }
 0x14f   :  { %3320 = vtanh.bf16 %v373_v20 }
 0x150   :  { %3322 = vtanh.bf16 %v372_v18  ;;  %v3122_v18 = vld [vmem:[#allocation8 + $0x244] ss:$12 sps:$4 sm:$0xff]  }
 0x151   :  { %v283_v22 = vpop.f32.mrb[4].mxu1 }
 0x152   :  { %v285_v23 = vpop.f32.mrb[5].mxu1  ;;  %v284_v57 = vadd.f32 %v283_v22, %v135_v48  ;;  %v3123_v22 = vld [vmem:[#allocation10] ss:$12 sps:$4 sm:$0xff]  }
 0x153   :  { %v286_v24 = vadd.f32 %v285_v23, %v139_v21  ;;  %v287_v25 = vpop.f32.mrb[6].mxu1  ;;  %v3120_v21 = vld [vmem:[#allocation8 + $0x240] ss:$12 sps:$4 sm:$0xff]   ;;  %v3128_v23 = vld [vmem:[#allocation8 + $0x25c] ss:$12 sps:$4 sm:$0xff]  }
 0x154   :  { %v288_v26 = vpop.f32.mrb[7].mxu1  ;;  %v374_v63 = vpack.c.bf16 %v284_v57, %v284_v57  ;;  %v3161_v48 = vld [vmem:[#allocation10 + $0x94] ss:$12 sps:$4 sm:$0xff]  }
 0x155   :  { %v375_v27 = vpack.c.bf16 %v286_v24, %v286_v24  ;;  %v3131_v24 = vld [vmem:[#allocation10 + $0x1c] ss:$12 sps:$4 sm:$0xff]   ;;  %v3126_v26 = vld [vmem:[#allocation8 + $0x258] ss:$12 sps:$4 sm:$0xff]  }
 0x156   :  { %v3171_v57 = vld [vmem:[#allocation10 + $0xc8] ss:$12 sps:$4 sm:$0xff]  }
 0x157   :  { %3324 = vtanh.bf16 %v375_v27  ;;  %v3129_v27 = vld [vmem:[#allocation10 + $0x18] ss:$12 sps:$4 sm:$0xff]  }
 0x158   :  { %3326 = vtanh.bf16 %v374_v63  ;;  %v3177_v63 = vld [vmem:[#allocation10 + $0x20] ss:$12 sps:$4 sm:$0xff]  }
 0x159   :  { %v3686_v30 = vpop.f32.mrb[8].mxu1 }
 0x15a   :  { %v3321_v31 = vpop.eup %3320  ;;  %v326_v34 = vpop.f32.mrb[9].mxu1 }
 0x15b   :  { %v3323_v35 = vpop.eup %3322  ;;  %1077 = vmatprep.mubr.bf16.mxu0 %v3321_v31  ;;  %1159 = vmatprep.mubr.bf16.mxu1 %v3321_v31  ;;  %v328_v36 = vpop.f32.mrb[10].mxu1  ;;  %v327_v62 = vadd.f32 %v326_v34, %v147_v56  ;;  %v3132_v31 = vld [vmem:[#allocation8 + $0x270] ss:$12 sps:$4 sm:$0xff]   ;;  %v3143_v34 = vld [vmem:[#allocation10 + $0x4c] ss:$12 sps:$4 sm:$0xff]  }
 0x15c   :  { %1078 = vmatmul.mubr.bf16.vlgmr.msra.gmra.mrb[0].mxu0 %v3323_v35  ;;  %1160 = vmatmul.mubr.bf16.vlgmr.msra.gmra.mrb[16].mxu1 %v3323_v35  ;;  %v329_v37 = vpop.f32.mrb[11].mxu1  ;;  %v3138_v35 = vld [vmem:[#allocation8 + $0x288] ss:$12 sps:$4 sm:$0xff]   ;;  %v3170_v56 = vld [vmem:[#allocation10 + $0xc4] ss:$12 sps:$4 sm:$0xff]  }
 0x15d   :  { %1087 = vmatpush1.bf16.msra.mxu0 %v3080_v28  ;;  %2859 = vmatpush3.bf16.msra.mxu1 %v3084_v29  ;;  %v377_v4 = vpack.c.bf16 %v327_v62, %v327_v62  ;;  %v3134_v28 = vld [vmem:[#allocation8 + $0x274] ss:$12 sps:$4 sm:$0xff]   ;;  %v3146_v37 = vld [vmem:[#allocation8 + $0x2a4] ss:$12 sps:$4 sm:$0xff]  }
 0x15e   :  { %1088 = vmatprep.subr.bf16.mxu0 %v3087_v32  ;;  %2860 = vmatprep.subr.bf16.mxu1 %v3088_v33  ;;  %v3137_v29 = vld [vmem:[#allocation10 + $0x34] ss:$12 sps:$4 sm:$0xff]   ;;  %v3135_v32 = vld [vmem:[#allocation10 + $0x30] ss:$12 sps:$4 sm:$0xff]   ;;  %v3140_v33 = vld [vmem:[#allocation8 + $0x28c] ss:$12 sps:$4 sm:$0xff]  }
 0x15f   :  { %3328 = vtanh.bf16 %v377_v4  ;;  %v3141_v36 = vld [vmem:[#allocation10 + $0x48] ss:$12 sps:$4 sm:$0xff]   ;;  %v3173_v62 = vld [vmem:[#allocation10 + $0xd8] ss:$12 sps:$4 sm:$0xff]  }
 0x160   :  { %v3182_v4 = vld [vmem:[#allocation10 + $0x38] ss:$12 sps:$4 sm:$0xff]  }
 0x161   :  { %1089 = vmatpush1.bf16.msra.mxu0 %v3085_v38  ;;  %2861 = vmatpush3.bf16.msra.mxu1 %v3089_v39  ;;  %v3692_v46 = vpop.f32.mrb[12].mxu1  ;;  %v3149_v38 = vld [vmem:[#allocation10 + $0x64] ss:$12 sps:$4 sm:$0xff]   ;;  %v3144_v39 = vld [vmem:[#allocation8 + $0x2a0] ss:$12 sps:$4 sm:$0xff]  }
 0x162   :  { %v3325_v47 = vpop.eup %3324  ;;  %1090 = vmatprep.subr.bf16.mxu0 %v3092_v40  ;;  %2862 = vmatprep.subr.bf16.mxu1 %v3093_v41  ;;  %v3696_v51 = vpop.f32.mrb[13].mxu1  ;;  %v3147_v40 = vld [vmem:[#allocation10 + $0x60] ss:$12 sps:$4 sm:$0xff]   ;;  %v3152_v41 = vld [vmem:[#allocation8 + $0x2bc] ss:$12 sps:$4 sm:$0xff]  }
 0x163   :  { %1118 = vmatprep.mubr.bf16.mxu0 %v3325_v47  ;;  %1199 = vmatprep.mubr.bf16.mxu1 %v3325_v47  ;;  %v369_v52 = vpop.f32.mrb[14].mxu1  ;;  %v3699_v20 = vpop.eup %3326  ;;  %v3158_v47 = vld [vmem:[#allocation8 + $0x2d4] ss:$12 sps:$4 sm:$0xff]  }
 0x164   :  { %v370_v53 = vpop.f32.mrb[15].mxu1  ;;  %v3164_v52 = vld [vmem:[#allocation8 + $0x2ec] ss:$12 sps:$4 sm:$0xff]  }
 0x165   :  { %1091 = vmatpush1.bf16.msra.mxu0 %v3090_v43  ;;  %2863 = vmatpush3.bf16.msra.mxu1 %v3094_v44  ;;  %v3155_v43 = vld [vmem:[#allocation10 + $0x7c] ss:$12 sps:$4 sm:$0xff]   ;;  %v3150_v44 = vld [vmem:[#allocation8 + $0x2b8] ss:$12 sps:$4 sm:$0xff]  }
 0x166   :  { %1092 = vmatprep.subr.bf16.mxu0 %v3097_v49  ;;  %2864 = vmatprep.subr.bf16.mxu1 %v3098_v50  ;;  %v3156_v49 = vld [vmem:[#allocation8 + $0x2d0] ss:$12 sps:$4 sm:$0xff]   ;;  %v3167_v53 = vld [vmem:[#allocation10 + $0xac] ss:$12 sps:$4 sm:$0xff]  }
 0x167   :  { %v3159_v50 = vld [vmem:[#allocation10 + $0x90] ss:$12 sps:$4 sm:$0xff]  }
 0x169   :  { %1093 = vmatpush1.bf16.msra.mxu0 %v3095_v54  ;;  %2865 = vmatpush3.bf16.msra.mxu1 %v3099_v55  ;;  %v3162_v54 = vld [vmem:[#allocation8 + $0x2e8] ss:$12 sps:$4 sm:$0xff]  }
 0x16a   :  { %1094 = vmatprep.subr.bf16.mxu0 %v3102_v58  ;;  %2866 = vmatprep.subr.bf16.mxu1 %v3103_v59  ;;  %v3701_v25 = vpop.eup %3328  ;;  %v3165_v55 = vld [vmem:[#allocation10 + $0xa8] ss:$12 sps:$4 sm:$0xff]   ;;  %v3168_v58 = vld [vmem:[#allocation10 + $0xc0] ss:$12 sps:$4 sm:$0xff]  }
 0x16b   :  { %v3172_v59 = vld [vmem:[#allocation10 + $0x8] ss:$12 sps:$4 sm:$0xff]  }
 0x16d   :  { %1095 = vmatpush1.bf16.msra.mxu0 %v3100_v60  ;;  %2867 = vmatpush3.bf16.msra.mxu1 %v3104_v61  ;;  %v3175_v60 = vld [vmem:[#allocation10 + $0xdc] ss:$12 sps:$4 sm:$0xff]   ;;  %v3176_v61 = vld [vmem:[#allocation10 + $0xe0] ss:$12 sps:$4 sm:$0xff]  }
 0x16e   :  { %1096 = vmatprep.subr.bf16.mxu0 %v3107_v0  ;;  %2868 = vmatprep.subr.bf16.mxu1 %v3108_v1  ;;  %v3180_v0 = vld [vmem:[#allocation10 + $0xf4] ss:$12 sps:$4 sm:$0xff]   ;;  %v3181_v1 = vld [vmem:[#allocation10 + $0xf8] ss:$12 sps:$4 sm:$0xff]  }
 0x171   :  { %1097 = vmatpush1.bf16.msra.mxu0 %v3105_v2  ;;  %2869 = vmatpush3.bf16.msra.mxu1 %v3109_v3  ;;  %v142_v2 = vsub.s32 4, %v3670_v6  ;;  %v3178_v3 = vld [vmem:[#allocation10 + $0xf0] ss:$12 sps:$4 sm:$0xff]  }
 0x172   :  { %1098 = vmatprep.subr.bf16.mxu0 %v3112_v10  ;;  %2870 = vmatprep.subr.bf16.mxu1 %v3113_v11  ;;  %v154_v10 = vsub.s32 7, %v3670_v6 }
 0x173   :  { %v143_v11 = vrot.slane %v3675_v8, %v142_v2  ;;  %v3237_v2 = vld [vmem:[#allocation10 + $0x200] ss:$12 sps:$4 sm:$0xff]  }
 0x175   :  { %1099 = vmatpush1.bf16.msra.mxu0 %v3110_v12  ;;  %2871 = vmatpush3.bf16.msra.mxu1 %v3114_v13  ;;  %v3185_v12 = vld [vmem:[#allocation10 + $0x10c] ss:$12 sps:$4 sm:$0xff]   ;;  %v3186_v13 = vld [vmem:[#allocation10 + $0x110] ss:$12 sps:$4 sm:$0xff]  }
 0x176   :  { %1100 = vmatprep.subr.bf16.mxu0 %v3117_v14  ;;  %2872 = vmatprep.subr.bf16.mxu1 %v3118_v15  ;;  %v3183_v14 = vld [vmem:[#allocation10 + $0x108] ss:$12 sps:$4 sm:$0xff]   ;;  %v3187_v15 = vld [vmem:[#allocation10 + $0x50] ss:$12 sps:$4 sm:$0xff]  }
 0x179   :  { %1101 = vmatpush1.bf16.msra.mxu0 %v3115_v16  ;;  %2873 = vmatpush3.bf16.msra.mxu1 %v3119_v17  ;;  %v155_v16 = vrot.slane %v3675_v8, %v154_v10  ;;  %v325_v17 = vadd.f32 %v3686_v30, %v143_v11  ;;  %v3242_v10 = vld [vmem:[#allocation10 + $0x218] ss:$12 sps:$4 sm:$0xff]  }
 0x17a   :  { %1102 = vmatprep.subr.bf16.mxu0 %v3122_v18  ;;  %1870 = vmatprep.subr.bf16.mxu1 %v3125_v19  ;;  %v3190_v18 = vld [vmem:[#allocation10 + $0x124] ss:$12 sps:$4 sm:$0xff]   ;;  %v3191_v19 = vld [vmem:[#allocation10 + $0x128] ss:$12 sps:$4 sm:$0xff]   ;;  %v3245_v11 = vld [vmem:[#allocation10 + $0x22c] ss:$12 sps:$4 sm:$0xff]  }
 0x17c   :  { %1200 = vmatmul.mubr.bf16.vlgmr.msra.gmra.mrb[20].mxu1 %v3699_v20 }
 0x17d   :  { %1103 = vmatpush1.bf16.msra.mxu0 %v3120_v21  ;;  %1871 = vmatpush1.bf16.msra.mxu1 %v3123_v22  ;;  %v3192_v21 = vld [vmem:[#allocation10 + $0x68] ss:$12 sps:$4 sm:$0xff]   ;;  %v368_v22 = vadd.f32 %v3696_v51, %v155_v16  ;;  %v3205_v51 = vld [vmem:[#allocation10 + $0x16c] ss:$12 sps:$4 sm:$0xff]   ;;  %v3272_v16 = vld [vmem:[#allocation11 + $0x40] sm:$0xff]  }
 0x17e   :  { %1104 = vmatprep.subr.bf16.mxu0 %v3128_v23  ;;  %1872 = vmatprep.subr.bf16.mxu1 %v3131_v24  ;;  %v376_v23 = vpack.c.bf16 %v325_v17, %v325_v17  ;;  %v3195_v24 = vld [vmem:[#allocation10 + $0x13c] ss:$12 sps:$4 sm:$0xff]  }
 0x17f   :  { %1902 = vmatprep.mubr.bf16.mxu1 %v3701_v25  ;;  %v379_v30 = vpack.c.bf16 %v368_v22, %v368_v22  ;;  %v3251_v22 = vld [vmem:[#allocation10 + $0x258] ss:$12 sps:$4 sm:$0xff]  }
 0x180   :  { %3330 = vtanh.bf16 %v376_v23  ;;  %v3275_v23 = vld [vmem:[#allocation11 + $0x8] sm:$0xff]  }
 0x181   :  { %1105 = vmatpush1.bf16.msra.mxu0 %v3126_v26  ;;  %1873 = vmatpush1.bf16.msra.mxu1 %v3129_v27  ;;  %v3193_v26 = vld [vmem:[#allocation10 + $0x138] ss:$12 sps:$4 sm:$0xff]   ;;  %v3197_v27 = vld [vmem:[#allocation10 + $0x80] ss:$12 sps:$4 sm:$0xff]   ;;  %3332 = vtanh.bf16 %v379_v30 }
 0x182   :  { %1106 = vmatprep.subr.bf16.mxu0 %v3134_v28  ;;  %1874 = vmatprep.subr.bf16.mxu1 %v3137_v29  ;;  %v3200_v28 = vld [vmem:[#allocation10 + $0x154] ss:$12 sps:$4 sm:$0xff]   ;;  %v3201_v29 = vld [vmem:[#allocation10 + $0x158] ss:$12 sps:$4 sm:$0xff]  }
 0x183   :  { %v3259_v30 = vld [vmem:[#allocation10 + $0x28c] ss:$12 sps:$4 sm:$0xff]  }
 0x185   :  { %1107 = vmatpush1.bf16.msra.mxu0 %v3132_v31  ;;  %1875 = vmatpush1.bf16.msra.mxu1 %v3135_v32  ;;  %v3198_v31 = vld [vmem:[#allocation10 + $0x150] ss:$12 sps:$4 sm:$0xff]   ;;  %v3202_v32 = vld [vmem:[#allocation10 + $0x98] ss:$12 sps:$4 sm:$0xff]  }
 0x186   :  { %1108 = vmatprep.subr.bf16.mxu0 %v3140_v33  ;;  %1876 = vmatprep.subr.bf16.mxu1 %v3143_v34  ;;  %v3206_v33 = vld [vmem:[#allocation10 + $0x170] ss:$12 sps:$4 sm:$0xff]   ;;  %v3203_v34 = vld [vmem:[#allocation10 + $0x168] ss:$12 sps:$4 sm:$0xff]  }
 0x189   :  { %1109 = vmatpush1.bf16.msra.mxu0 %v3138_v35  ;;  %1877 = vmatpush1.bf16.msra.mxu1 %v3141_v36  ;;  %v3207_v35 = vld [vmem:[#allocation10 + $0xb0] ss:$12 sps:$4 sm:$0xff]  }
 0x18a   :  { %1110 = vmatprep.subr.bf16.mxu0 %v3146_v37  ;;  %1878 = vmatprep.subr.bf16.mxu1 %v3149_v38  ;;  %v3210_v36 = vld [vmem:[#allocation10 + $0x184] ss:$12 sps:$4 sm:$0xff]   ;;  %v3211_v37 = vld [vmem:[#allocation10 + $0x248] ss:$12 sps:$4 sm:$0xff]  }
 0x18b   :  { %v3331_v38 = vpop.eup %3330 }
 0x18d   :  { %1111 = vmatpush1.bf16.msra.mxu0 %v3144_v39  ;;  %1879 = vmatpush1.bf16.msra.mxu1 %v3147_v40  ;;  %v3208_v39 = vld [vmem:[#allocation10 + $0x180] ss:$12 sps:$4 sm:$0xff]   ;;  %v3212_v40 = vld [vmem:[#allocation10 + $0x188] ss:$12 sps:$4 sm:$0xff]  }
 0x18e   :  { %1112 = vmatprep.subr.bf16.mxu0 %v3152_v41  ;;  %1880 = vmatprep.subr.bf16.mxu1 %v3155_v43  ;;  %v3215_v41 = vld [vmem:[#allocation10 + $0x19c] ss:$12 sps:$4 sm:$0xff]   ;;  %v3216_v43 = vld [vmem:[#allocation10 + $0x260] ss:$12 sps:$4 sm:$0xff]  }
 0x191   :  { %1113 = vmatpush1.bf16.msra.mxu0 %v3150_v44  ;;  %1881 = vmatpush1.bf16.msra.mxu1 %v3153_v45  ;;  %v3333_v44 = vpop.eup %3332  ;;  %v3213_v45 = vld [vmem:[#allocation10 + $0x198] ss:$12 sps:$4 sm:$0xff]  }
 0x192   :  { %1114 = vmatprep.subr.bf16.mxu0 %v3158_v47  ;;  %1882 = vmatprep.subr.bf16.mxu1 %v3161_v48  ;;  %v3217_v47 = vld [vmem:[#allocation10 + $0x1a0] ss:$12 sps:$4 sm:$0xff]  }
 0x193   :  { %v3220_v48 = vld [vmem:[#allocation10 + $0x1b4] ss:$12 sps:$4 sm:$0xff]  }
 0x195   :  { %1115 = vmatpush1.bf16.msra.mxu0 %v3156_v49  ;;  %1883 = vmatpush1.bf16.msra.mxu1 %v3159_v50  ;;  %v3221_v49 = vld [vmem:[#allocation10 + $0x278] ss:$12 sps:$4 sm:$0xff]   ;;  %v150_v50 = vsub.s32 6, %v3670_v6 }
 0x196   :  { %1116 = vmatprep.subr.bf16.mxu0 %v3164_v52  ;;  %1884 = vmatprep.subr.bf16.mxu1 %v3167_v53  ;;  %v3218_v52 = vld [vmem:[#allocation10 + $0x1b0] ss:$12 sps:$4 sm:$0xff]   ;;  %v3222_v53 = vld [vmem:[#allocation10 + $0x1b8] ss:$12 sps:$4 sm:$0xff]  }
 0x199   :  { %1117 = vmatpush1.bf16.msra.mxu0 %v3162_v54  ;;  %1885 = vmatpush1.bf16.msra.mxu1 %v3165_v55  ;;  %v3225_v54 = vld [vmem:[#allocation10 + $0x1cc] ss:$12 sps:$4 sm:$0xff]   ;;  %v3226_v55 = vld [vmem:[#allocation10 + $0x290] ss:$12 sps:$4 sm:$0xff]  }
 0x19a   :  { %1886 = vmatprep.subr.bf16.mxu1 %v3170_v56  ;;  %2880 = vmatprep.subr.bf16.mxu0 %v3171_v57  ;;  %v151_v56 = vrot.slane %v3675_v8, %v150_v50  ;;  %v3223_v57 = vld [vmem:[#allocation10 + $0x1c8] ss:$12 sps:$4 sm:$0xff]   ;;  %v3233_v8 = vld [vmem:[#allocation10 + $0x1f8] ss:$12 sps:$4 sm:$0xff]  }
 0x19c   :  { %1119 = vmatmul.mubr.bf16.vlgmr.msra.gmra.mrb[0].mxu0 %v3699_v20  ;;  %v3188_v20 = vld [vmem:[#allocation10 + $0x120] ss:$12 sps:$4 sm:$0xff]   ;;  %v366_v6 = vadd.f32 %v3692_v46, %v151_v56  ;;  %v3241_v46 = vld [vmem:[#allocation10 + $0x2d8] ss:$12 sps:$4 sm:$0xff]  }
 0x19d   :  { %1887 = vmatpush1.bf16.msra.mxu1 %v3168_v58  ;;  %2881 = vmatpush3.bf16.msra.mxu0 %v3172_v59  ;;  %v3227_v58 = vld [vmem:[#allocation10 + $0x1d0] ss:$12 sps:$4 sm:$0xff]  }
 0x19e   :  { %1888 = vmatprep.subr.bf16.mxu1 %v3175_v60  ;;  %2882 = vmatprep.subr.bf16.mxu0 %v3176_v61  ;;  %v3230_v59 = vld [vmem:[#allocation10 + $0x1e4] ss:$12 sps:$4 sm:$0xff]   ;;  %v3231_v60 = vld [vmem:[#allocation10 + $0x2a8] ss:$12 sps:$4 sm:$0xff]   ;;  %v3228_v61 = vld [vmem:[#allocation10 + $0x1e0] ss:$12 sps:$4 sm:$0xff]  }
 0x19f   :  { %1984 = vmatprep.mubr.bf16.mxu0 %v3701_v25  ;;  %v3196_v25 = vld [vmem:[#allocation10 + $0x140] ss:$12 sps:$4 sm:$0xff]  }
 0x1a1   :  { %1889 = vmatpush1.bf16.msra.mxu1 %v3173_v62  ;;  %2883 = vmatpush3.bf16.msra.mxu0 %v3177_v63  ;;  %v3232_v62 = vld [vmem:[#allocation10 + $0x1e8] ss:$12 sps:$4 sm:$0xff]   ;;  %v378_v63 = vpack.c.bf16 %v366_v6, %v366_v6  ;;  %v3289_v6 = vld [vmem:[#allocation11 + $0x140] sm:$0xff]  }
 0x1a2   :  { %1890 = vmatprep.subr.bf16.mxu1 %v3180_v0  ;;  %2884 = vmatprep.subr.bf16.mxu0 %v3181_v1  ;;  %v3235_v0 = vld [vmem:[#allocation10 + $0x1fc] ss:$12 sps:$4 sm:$0xff]   ;;  %v3236_v1 = vld [vmem:[#allocation10 + $0x2c0] ss:$12 sps:$4 sm:$0xff]  }
 0x1a3   :  { %3334 = vtanh.bf16 %v378_v63  ;;  %v3298_v63 = vld [vmem:[#allocation11 + $0x90] sm:$0xff]  }
 0x1a5   :  { %1891 = vmatpush1.bf16.msra.mxu1 %v3178_v3  ;;  %2885 = vmatpush3.bf16.msra.mxu0 %v3182_v4  ;;  %v3240_v3 = vld [vmem:[#allocation10 + $0x214] ss:$12 sps:$4 sm:$0xff]   ;;  %v3238_v4 = vld [vmem:[#allocation10 + $0x210] ss:$12 sps:$4 sm:$0xff]  }
 0x1a6   :  { %1892 = vmatprep.subr.bf16.mxu1 %v3185_v12  ;;  %2886 = vmatprep.subr.bf16.mxu0 %v3186_v13  ;;  %v3246_v12 = vld [vmem:[#allocation10 + $0x2f0] ss:$12 sps:$4 sm:$0xff]   ;;  %v3243_v13 = vld [vmem:[#allocation10 + $0x228] ss:$12 sps:$4 sm:$0xff]  }
 0x1a9   :  { %1893 = vmatpush1.bf16.msra.mxu1 %v3183_v14  ;;  %2887 = vmatpush3.bf16.msra.mxu0 %v3187_v15  ;;  %v3247_v14 = vld [vmem:[#allocation10 + $0x230] ss:$12 sps:$4 sm:$0xff]  }
 0x1aa   :  { %1894 = vmatprep.subr.bf16.mxu1 %v3190_v18  ;;  %2888 = vmatprep.subr.bf16.mxu0 %v3191_v19  ;;  %v3250_v15 = vld [vmem:[#allocation10 + $0x244] ss:$12 sps:$4 sm:$0xff]   ;;  %v3248_v18 = vld [vmem:[#allocation10 + $0x240] ss:$12 sps:$4 sm:$0xff]  }
 0x1ab   :  { %v3273_v19 = vld [vmem:[#allocation11] sm:$0xff]  }
 0x1ad   :  { %1895 = vmatpush1.bf16.msra.mxu1 %v3188_v20  ;;  %2889 = vmatpush3.bf16.msra.mxu0 %v3192_v21  ;;  %v3253_v20 = vld [vmem:[#allocation10 + $0x25c] ss:$12 sps:$4 sm:$0xff]  }
 0x1ae   :  { %1896 = vmatprep.subr.bf16.mxu1 %v3195_v24  ;;  %2890 = vmatprep.subr.bf16.mxu0 %v3196_v25  ;;  %v3716_v17 = vpop.eup %3334  ;;  %v3274_v21 = vld [vmem:[#allocation11 + $0x48] sm:$0xff]   ;;  %v3256_v24 = vld [vmem:[#allocation10 + $0x274] ss:$12 sps:$4 sm:$0xff]  }
 0x1af   :  { %v3276_v25 = vld [vmem:[#allocation11 + $0x50] sm:$0xff]  }
 0x1b1   :  { %1897 = vmatpush1.bf16.msra.mxu1 %v3193_v26  ;;  %2891 = vmatpush3.bf16.msra.mxu0 %v3197_v27  ;;  %v3254_v26 = vld [vmem:[#allocation10 + $0x270] ss:$12 sps:$4 sm:$0xff]  }
 0x1b2   :  { %1898 = vmatprep.subr.bf16.mxu1 %v3200_v28  ;;  %2892 = vmatprep.subr.bf16.mxu0 %v3201_v29  ;;  %v3277_v27 = vld [vmem:[#allocation11 + $0x10] sm:$0xff]   ;;  %v3278_v28 = vld [vmem:[#allocation11 + $0x58] sm:$0xff]  }
 0x1b3   :  { %v3257_v29 = vld [vmem:[#allocation10 + $0x288] ss:$12 sps:$4 sm:$0xff]  }
 0x1b5   :  { %1899 = vmatpush1.bf16.msra.mxu1 %v3198_v31  ;;  %2893 = vmatpush3.bf16.msra.mxu0 %v3202_v32  ;;  %v3262_v31 = vld [vmem:[#allocation10 + $0x2a4] ss:$12 sps:$4 sm:$0xff]   ;;  %v3260_v32 = vld [vmem:[#allocation10 + $0x2a0] ss:$12 sps:$4 sm:$0xff]  }
 0x1b6   :  { %1900 = vmatprep.subr.bf16.mxu1 %v3205_v51  ;;  %2894 = vmatprep.subr.bf16.mxu0 %v3206_v33  ;;  %v3265_v51 = vld [vmem:[#allocation10 + $0x2bc] ss:$12 sps:$4 sm:$0xff]   ;;  %v3263_v33 = vld [vmem:[#allocation10 + $0x2b8] ss:$12 sps:$4 sm:$0xff]  }
 0x1b9   :  { %1901 = vmatpush1.bf16.msra.mxu1 %v3203_v34  ;;  %2895 = vmatpush3.bf16.msra.mxu0 %v3207_v35  ;;  %v3279_v34 = vld [vmem:[#allocation11 + $0x18] sm:$0xff]   ;;  %v3268_v35 = vld [vmem:[#allocation10 + $0x2d4] ss:$12 sps:$4 sm:$0xff]  }
 0x1ba   :  { %1911 = vmatprep.subr.bf16.mxu1 %v3210_v36  ;;  %2902 = vmatprep.subr.bf16.mxu0 %v3211_v37  ;;  %v3280_v36 = vld [vmem:[#allocation11 + $0x60] sm:$0xff]   ;;  %v3266_v37 = vld [vmem:[#allocation10 + $0x2d0] ss:$12 sps:$4 sm:$0xff]  }
 0x1bc   :  { %1903 = vmatmul.mubr.bf16.vlgmr.msra.gmra.mrb[24].mxu1 %v3331_v38  ;;  %1985 = vmatmul.mubr.bf16.vlgmr.msra.gmra.mrb[4].mxu0 %v3331_v38  ;;  %v3281_v38 = vld [vmem:[#allocation11 + $0x20] sm:$0xff]  }
 0x1bd   :  { %1912 = vmatpush1.bf16.msra.mxu1 %v3208_v39  ;;  %2903 = vmatpush3.bf16.msra.mxu0 %v3212_v40  ;;  %v3271_v39 = vld [vmem:[#allocation10 + $0x2ec] ss:$12 sps:$4 sm:$0xff]  }
 0x1be   :  { %1913 = vmatprep.subr.bf16.mxu1 %v3215_v41  ;;  %2904 = vmatprep.subr.bf16.mxu0 %v3216_v43  ;;  %v3282_v40 = vld [vmem:[#allocation11 + $0x68] sm:$0xff]  }
 0x1bf   :  { %2024 = vmatprep.mubr.bf16.mxu0 %v3333_v44  ;;  %1943 = vmatprep.mubr.bf16.mxu1 %v3333_v44  ;;  %v3269_v41 = vld [vmem:[#allocation10 + $0x2e8] ss:$12 sps:$4 sm:$0xff]  }
 0x1c0   :  { %v3283_v43 = vld [vmem:[#allocation11 + $0x28] sm:$0xff]   ;;  %v3284_v44 = vld [vmem:[#allocation11 + $0x70] sm:$0xff]  }
 0x1c1   :  { %1914 = vmatpush1.bf16.msra.mxu1 %v3213_v45  ;;  %2905 = vmatpush3.bf16.msra.mxu0 %v3217_v47  ;;  %v3285_v45 = vld [vmem:[#allocation11 + $0x30] sm:$0xff]   ;;  %v3286_v47 = vld [vmem:[#allocation11 + $0x78] sm:$0xff]  }
 0x1c2   :  { %1915 = vmatprep.subr.bf16.mxu1 %v3220_v48  ;;  %2906 = vmatprep.subr.bf16.mxu0 %v3221_v49  ;;  %v3287_v48 = vld [vmem:[#allocation11 + $0x38] sm:$0xff]   ;;  %v516_v49 = vld [vmem:[%s3756_s4] sm:$0x7] }
 0x1c5   :  { %1916 = vmatpush1.bf16.msra.mxu1 %v3218_v52  ;;  %2907 = vmatpush3.bf16.msra.mxu0 %v3222_v53  ;;  %v529_v52 = vrot.slane %v516_v49, %v3689_v42 }
 0x1c6   :  { %1917 = vmatprep.subr.bf16.mxu1 %v3225_v54  ;;  %2908 = vmatprep.subr.bf16.mxu0 %v3226_v55 }
 0x1c9   :  { %1918 = vmatpush1.bf16.msra.mxu1 %v3223_v57  ;;  %2909 = vmatpush3.bf16.msra.mxu0 %v3227_v58  ;;  %v3288_v58 = vld [vmem:[#allocation11 + $0xc0] sm:$0xff]  }
 0x1ca   :  { %1919 = vmatprep.subr.bf16.mxu1 %v3230_v59  ;;  %2910 = vmatprep.subr.bf16.mxu0 %v3231_v60  ;;  %v3290_v59 = vld [vmem:[#allocation11 + $0x80] sm:$0xff]   ;;  %v3292_v60 = vld [vmem:[#allocation11 + $0xc8] sm:$0xff]  }
 0x1cd   :  { %1920 = vmatpush1.bf16.msra.mxu1 %v3228_v61  ;;  %2911 = vmatpush3.bf16.msra.mxu0 %v3232_v62  ;;  %v3294_v61 = vld [vmem:[#allocation11 + $0x88] sm:$0xff]   ;;  %v3296_v62 = vld [vmem:[#allocation11 + $0xd0] sm:$0xff]  }
 0x1ce   :  { %1921 = vmatprep.subr.bf16.mxu1 %v3235_v0  ;;  %2912 = vmatprep.subr.bf16.mxu0 %v3236_v1  ;;  %v3300_v0 = vld [vmem:[#allocation11 + $0xd8] sm:$0xff]  }
 0x1cf   :  { %v3302_v1 = vld [vmem:[#allocation11 + $0x98] sm:$0xff]  }
 0x1d1   :  { %1922 = vmatpush1.bf16.msra.mxu1 %v3233_v8  ;;  %2913 = vmatpush3.bf16.msra.mxu0 %v3237_v2  ;;  %v3304_v2 = vld [vmem:[#allocation11 + $0xe0] sm:$0xff]  }
 0x1d2   :  { %1923 = vmatprep.subr.bf16.mxu1 %v3240_v3  ;;  %2914 = vmatprep.subr.bf16.mxu0 %v3241_v46  ;;  %v3306_v46 = vld [vmem:[#allocation11 + $0xa0] sm:$0xff]  }
 0x1d5   :  { %1924 = vmatpush1.bf16.msra.mxu1 %v3238_v4  ;;  %2915 = vmatpush3.bf16.msra.mxu0 %v3242_v10 }
 0x1d6   :  { %1925 = vmatprep.subr.bf16.mxu1 %v3245_v11  ;;  %2916 = vmatprep.subr.bf16.mxu0 %v3246_v12 }
 0x1d9   :  { %1926 = vmatpush1.bf16.msra.mxu1 %v3243_v13  ;;  %2917 = vmatpush3.bf16.msra.mxu0 %v3247_v14  ;;  %v3308_v13 = vld [vmem:[#allocation11 + $0xe8] sm:$0xff]  }
 0x1da   :  { %1927 = vmatprep.subr.bf16.mxu1 %v3250_v15  ;;  %2924 = vmatprep.subr.bf16.mxu0 %v3272_v16  ;;  %v3310_v14 = vld [vmem:[#allocation11 + $0xa8] sm:$0xff]   ;;  %v3312_v15 = vld [vmem:[#allocation11 + $0xf0] sm:$0xff]  }
 0x1db   :  { %v3314_v16 = vld [vmem:[#allocation11 + $0xb0] sm:$0xff]  }
 0x1dc   :  { %2025 = vmatmul.mubr.bf16.vlgmr.msra.gmra.mrb[8].mxu0 %v3716_v17 }
 0x1dd   :  { %1928 = vmatpush1.bf16.msra.mxu1 %v3248_v18  ;;  %2925 = vmatpush3.bf16.msra.mxu0 %v3273_v19  ;;  %v3318_v18 = vld [vmem:[#allocation11 + $0xb8] sm:$0xff]   ;;  %v521_v19 = vrot.slane %v516_v49, %v3673_v7 }
 0x1de   :  { %1929 = vmatprep.subr.bf16.mxu1 %v3253_v20  ;;  %2926 = vmatprep.subr.bf16.mxu0 %v3274_v21  ;;  %v525_v20 = vrot.slane %v516_v49, %v3678_v9  ;;  %v3315_v49 = vld [vmem:[#allocation11 + $0x130] sm:$0xff]  }
 0x1e1   :  { %1930 = vmatpush1.bf16.msra.mxu1 %v3251_v22  ;;  %2927 = vmatpush3.bf16.msra.mxu0 %v3275_v23 }
 0x1e2   :  { %1931 = vmatprep.subr.bf16.mxu1 %v3256_v24  ;;  %2928 = vmatprep.subr.bf16.mxu0 %v3276_v25 }
 0x1e5   :  { %1932 = vmatpush1.bf16.msra.mxu1 %v3254_v26  ;;  %2929 = vmatpush3.bf16.msra.mxu0 %v3277_v27 }
 0x1e6   :  { %1933 = vmatprep.subr.bf16.mxu1 %v3259_v30  ;;  %2930 = vmatprep.subr.bf16.mxu0 %v3278_v28  ;;  %v3291_v28 = vld [vmem:[#allocation11 + $0x100] sm:$0xff]  }
 0x1e9   :  { %1934 = vmatpush1.bf16.msra.mxu1 %v3257_v29  ;;  %2931 = vmatpush3.bf16.msra.mxu0 %v3279_v34  ;;  %v3299_v34 = vld [vmem:[#allocation11 + $0x110] sm:$0xff]  }
 0x1ea   :  { %1935 = vmatprep.subr.bf16.mxu1 %v3262_v31  ;;  %2932 = vmatprep.subr.bf16.mxu0 %v3280_v36  ;;  %v3293_v31 = vld [vmem:[#allocation11 + $0x148] sm:$0xff]   ;;  %v3303_v36 = vld [vmem:[#allocation11 + $0x118] sm:$0xff]  }
 0x1ed   :  { %1936 = vmatpush1.bf16.msra.mxu1 %v3260_v32  ;;  %2933 = vmatpush3.bf16.msra.mxu0 %v3281_v38 }
 0x1ee   :  { %1937 = vmatprep.subr.bf16.mxu1 %v3265_v51  ;;  %2934 = vmatprep.subr.bf16.mxu0 %v3282_v40  ;;  %v3295_v51 = vld [vmem:[#allocation11 + $0x108] sm:$0xff]  }
 0x1f1   :  { %1938 = vmatpush1.bf16.msra.mxu1 %v3263_v33  ;;  %2935 = vmatpush3.bf16.msra.mxu0 %v3283_v43  ;;  %v3297_v33 = vld [vmem:[#allocation11 + $0x150] sm:$0xff]  }
 0x1f2   :  { %1939 = vmatprep.subr.bf16.mxu1 %v3268_v35  ;;  %2936 = vmatprep.subr.bf16.mxu0 %v3284_v44  ;;  %v3301_v35 = vld [vmem:[#allocation11 + $0x158] sm:$0xff]  }
 0x1f5   :  { %1940 = vmatpush1.bf16.msra.mxu1 %v3266_v37  ;;  %2937 = vmatpush3.bf16.msra.mxu0 %v3285_v45  ;;  %v3305_v37 = vld [vmem:[#allocation11 + $0x160] sm:$0xff]  }
 0x1f6   :  { %1941 = vmatprep.subr.bf16.mxu1 %v3271_v39  ;;  %2938 = vmatprep.subr.bf16.mxu0 %v3286_v47  ;;  %v3307_v39 = vld [vmem:[#allocation11 + $0x120] sm:$0xff]   ;;  %v3311_v47 = vld [vmem:[#allocation11 + $0x128] sm:$0xff]  }
 0x1f9   :  { %1942 = vmatpush1.bf16.msra.mxu1 %v3269_v41  ;;  %2939 = vmatpush3.bf16.msra.mxu0 %v3287_v48  ;;  %v3309_v41 = vld [vmem:[#allocation11 + $0x168] sm:$0xff]   ;;  %v3313_v48 = vld [vmem:[#allocation11 + $0x170] sm:$0xff]  }
 0x1fa   :  { %2946 = vmatprep.subr.bf16.mxu1 %v3288_v58  ;;  %2968 = vmatprep.subr.bf16.mxu0 %v3289_v6 }
 0x1fc   :  { %1944 = vmatmul.mubr.bf16.vlgmr.msra.gmra.mrb[24].mxu1 %v3716_v17  ;;  %v3316_v17 = vld [vmem:[#allocation11 + $0xf8] sm:$0xff]  }
 0x1fd   :  { %2947 = vmatpush3.bf16.msra.mxu1 %v3290_v59 }
 0x1fe   :  { %2948 = vmatprep.subr.bf16.mxu1 %v3292_v60 }
 0x201   :  { %2949 = vmatpush3.bf16.msra.mxu1 %v3294_v61 }
 0x202   :  { %2950 = vmatprep.subr.bf16.mxu1 %v3296_v62 }
 0x205   :  { %2951 = vmatpush3.bf16.msra.mxu1 %v3298_v63 }
 0x206   :  { %2952 = vmatprep.subr.bf16.mxu1 %v3300_v0 }
 0x209   :  { %2953 = vmatpush3.bf16.msra.mxu1 %v3302_v1 }
 0x20a   :  { %2954 = vmatprep.subr.bf16.mxu1 %v3304_v2 }
 0x20d   :  { %2955 = vmatpush3.bf16.msra.mxu1 %v3306_v46 }
 0x20e   :  { %2956 = vmatprep.subr.bf16.mxu1 %v3308_v13 }
 0x211   :  { %2957 = vmatpush3.bf16.msra.mxu1 %v3310_v14 }
 0x212   :  { %2958 = vmatprep.subr.bf16.mxu1 %v3312_v15 }
 0x215   :  { %2959 = vmatpush3.bf16.msra.mxu1 %v3314_v16 }
 0x216   :  { %2960 = vmatprep.subr.bf16.mxu1 %v3316_v17 }
 0x219   :  { %2961 = vmatpush3.bf16.msra.mxu1 %v3318_v18  ;;  %v2787_v18 = vld [vmem:[%s3760_s8] ss:$0 sm:$0xff]  ;;  %s3529_s8 = smov [#allocation13]  }
 0x21a   :  { %s2571_s21 = sshll.u32 %s3529_s8, 4  ;;  %s2572_s21 = int_to_ptr.vmem [resolvable:$true] %s2571_s21 }
 0x21b   :  { %s3484_s22 = scalar_lea.vmem %s2572_s21, 128  ;;  %p3489_p7 = scmp.lt.s32.totalorder %s2572_s21, %s2572_s21 }
 0x21c   :  { %p3485_p6 = scmp.ne.s32.totalorder %s2572_s21, %s3484_s22  ;;  %p3490_p8 = scmp.lt.s32.totalorder %s3484_s22, %s3484_s22 }
 0x21e   :  { %p3491_p9 = por %p3490_p8, %p3489_p7 }
 0x220   :  { %p3492_p10 = pnand %p3491_p9, %p3485_p6 }
 0x22f   :  { %v2852_v50 = vpop.f32.mrb[16].mxu1 }
 0x230   :  { %v2853_v53 = vpop.f32.mrb[17].mxu1 }
 0x231   :  { %v2854_v54 = vadd.f32 %v2853_v53, %v2852_v50  ;;  %v2855_v55 = vpop.f32.mrb[18].mxu1  ;;  %v3317_v50 = vld [vmem:[#allocation11 + $0x178] sm:$0xff]   ;;  %v1341_v53 = vld [vmem:[%s3758_s6] sm:$0x7] }
 0x232   :  { %v2856_v56 = vpop.f32.mrb[19].mxu1  ;;  %v1346_v63 = vrot.slane %v1341_v53, %v3673_v7  ;;  %v1350_v0 = vrot.slane %v1341_v53, %v3678_v9 }
 0x233   :  { %v1162_v57 = vadd.f32 %v2854_v54, %v529_v52  ;;  %v3319_v52 = vld [vmem:[#allocation11 + $0x138] sm:$0xff]   ;;  %v1354_v54 = vrot.slane %v1341_v53, %v3689_v42 }
 0x24f   :  { %v2874_v8 = vpop.f32.mrb[20].mxu1 }
 0x250   :  { %v2875_v3 = vpop.f32.mrb[21].mxu1 }
 0x251   :  { %v2876_v4 = vadd.f32 %v2875_v3, %v2874_v8  ;;  %v2877_v10 = vpop.f32.mrb[22].mxu1 }
 0x252   :  { %v2878_v11 = vpop.f32.mrb[23].mxu1 }
 0x253   :  { %v3724_v12 = vadd.f32 %v2876_v4, %v1162_v57 }
 0x255   :  { %v1209_v1 = vpack.c.bf16 %v3724_v12, %v3724_v12 }
 0x26f   :  { %v1120_v21 = vpop.f32.mrb[0].mxu0 }
 0x270   :  { %v2990_v22 = vadd.f32 %v1120_v21, %v521_v19  ;;  %v1122_v23 = vpop.f32.mrb[1].mxu0 }
 0x271   :  { %v2991_v24 = vadd.f32 %v1122_v23, %v525_v20  ;;  %v1124_v25 = vpop.f32.mrb[2].mxu0  ;;  %v2550_v23 = vand.u32 127, %v124_v5 }
 0x272   :  { %v1207_v26 = vpack.c.bf16 %v2990_v22, %v2990_v22  ;;  %v1125_v27 = vpop.f32.mrb[3].mxu0 }
 0x273   :  { %v1208_v30 = vpack.c.bf16 %v2991_v24, %v2991_v24  ;;  %vm2551_vm1 = vcmp.lt.s32.totalorder %v2550_v23, 6  ;;  %vm2562_vm2 = vcmp.eq.s32.totalorder %v2550_v23, 6 }
 0x275   :  { %3336 = vtanh.bf16 %v1208_v30 }
 0x276   :  { %3338 = vtanh.bf16 %v1207_v26 }
 0x280   :  { %v3337_v29 = vpop.eup %3336 }
 0x281   :  { %v3339_v32 = vpop.eup %3338  ;;  %2461 = vmatprep.mubr.bf16.mxu0 %v3337_v29 }
 0x282   :  { %2462 = vmatmul.mubr.bf16.vlgmr.msra.gmra.mrb[12].mxu0 %v3339_v32 }
 0x283   :  { %2969 = vmatpush3.bf16.msra.mxu0 %v3291_v28 }
 0x284   :  { %2970 = vmatprep.subr.bf16.mxu0 %v3293_v31 }
 0x287   :  { %2971 = vmatpush3.bf16.msra.mxu0 %v3295_v51 }
 0x288   :  { %2972 = vmatprep.subr.bf16.mxu0 %v3297_v33 }
 0x28b   :  { %2973 = vmatpush3.bf16.msra.mxu0 %v3299_v34 }
 0x28c   :  { %2974 = vmatprep.subr.bf16.mxu0 %v3301_v35 }
 0x28f   :  { %v2896_v38 = vpop.f32.mrb[4].mxu0  ;;  %2975 = vmatpush3.bf16.msra.mxu0 %v3303_v36 }
 0x290   :  { %v2897_v40 = vpop.f32.mrb[5].mxu0  ;;  %2976 = vmatprep.subr.bf16.mxu0 %v3305_v37 }
 0x291   :  { %v2898_v43 = vadd.f32 %v2897_v40, %v2896_v38  ;;  %v2899_v44 = vpop.f32.mrb[6].mxu0 }
 0x292   :  { %v2900_v45 = vpop.f32.mrb[7].mxu0 }
 0x293   :  { %2977 = vmatpush3.bf16.msra.mxu0 %v3307_v39  ;;  %v1987_v57 = vadd.f32 %v2898_v43, %v1354_v54 }
 0x294   :  { %2978 = vmatprep.subr.bf16.mxu0 %v3309_v41 }
 0x297   :  { %2979 = vmatpush3.bf16.msra.mxu0 %v3311_v47 }
 0x298   :  { %2980 = vmatprep.subr.bf16.mxu0 %v3313_v48 }
 0x29b   :  { %2981 = vmatpush3.bf16.msra.mxu0 %v3315_v49 }
 0x29c   :  { %2982 = vmatprep.subr.bf16.mxu0 %v3317_v50 }
 0x29f   :  { %2983 = vmatpush3.bf16.msra.mxu0 %v3319_v52 }
 0x2af   :  { %v2918_v55 = vpop.f32.mrb[8].mxu0 }
 0x2b0   :  { %v2919_v56 = vpop.f32.mrb[9].mxu0 }
 0x2b1   :  { %v2920_v58 = vadd.f32 %v2919_v56, %v2918_v55  ;;  %v2921_v6 = vpop.f32.mrb[10].mxu0 }
 0x2b2   :  { %v2922_v59 = vpop.f32.mrb[11].mxu0 }
 0x2b3   :  { %v2027_v60 = vadd.f32 %v2920_v58, %v1987_v57 }
 0x2b5   :  { %v2034_v61 = vpack.c.bf16 %v2027_v60, %v2027_v60 }
 0x2b7   :  { %3340 = vtanh.bf16 %v2034_v61 }
 0x2b8   :  { %3342 = vtanh.bf16 %v1209_v1 }
 0x2c2   :  { %v3341_v62 = vpop.eup %3340 }
 0x2c3   :  { %2541 = vmatprep.mubr.bf16.mxu0 %v3341_v62  ;;  %v3343_v13 = vpop.eup %3342 }
 0x2cf   :  { %v1945_v8 = vpop.f32.mrb[24].mxu1 }
 0x2d0   :  { %v2992_v42 = vadd.f32 %v1945_v8, %v1346_v63  ;;  %v1947_v2 = vpop.f32.mrb[25].mxu1 }
 0x2d1   :  { %v2993_v3 = vadd.f32 %v1947_v2, %v1350_v0  ;;  %v1949_v46 = vpop.f32.mrb[26].mxu1 }
 0x2d2   :  { %v2032_v4 = vpack.c.bf16 %v2992_v42, %v2992_v42  ;;  %v1950_v10 = vpop.f32.mrb[27].mxu1 }
 0x2d3   :  { %v2033_v11 = vpack.c.bf16 %v2993_v3, %v2993_v3 }
 0x2d4   :  { %3344 = vtanh.bf16 %v2032_v4 }
 0x2d5   :  { %3346 = vtanh.bf16 %v2033_v11 }
 0x2df   :  { %v3345_v14 = vpop.eup %3344 }
 0x2e0   :  { %v3347_v15 = vpop.eup %3346  ;;  %2501 = vmatprep.mubr.bf16.mxu1 %v3345_v14 }
 0x2e1   :  { %2502 = vmatmul.mubr.bf16.vlgmr.msra.gmra.mrb[28].mxu1 %v3343_v13  ;;  %2542 = vmatmul.mubr.bf16.vlgmr.msra.gmra.mrb[16].mxu0 %v3347_v15 }
 0x355   :  { %v2940_v7 = vpop.f32.mrb[12].mxu0 }
 0x356   :  { %v2941_v9 = vpop.f32.mrb[13].mxu0 }
 0x357   :  { %v2942_v12 = vadd.f32 %v2941_v9, %v2940_v7  ;;  %v2943_v16 = vpop.f32.mrb[14].mxu0 }
 0x358   :  { %v2944_v17 = vpop.f32.mrb[15].mxu0 }
 0x359   :  { %v2464_v24 = vadd.f32 %v2942_v12, %v2787_v18 }
 0x3b4   :  { %v2962_v19 = vpop.f32.mrb[28].mxu1  ;;  %v2984_v20 = vpop.f32.mrb[16].mxu0 }
 0x3b5   :  { %v2963_v21 = vpop.f32.mrb[29].mxu1  ;;  %v2985_v22 = vpop.f32.mrb[17].mxu0 }
 0x3b6   :  { %v2964_v25 = vadd.f32 %v2963_v21, %v2962_v19  ;;  %v2986_v26 = vadd.f32 %v2985_v22, %v2984_v20  ;;  %v2965_v27 = vpop.f32.mrb[30].mxu1  ;;  %v2987_v30 = vpop.f32.mrb[18].mxu0 }
 0x3b7   :  { %v2966_v28 = vpop.f32.mrb[31].mxu1  ;;  %v2988_v29 = vpop.f32.mrb[19].mxu0 }
 0x3b8   :  { %v2504_v31 = vadd.f32 %v2964_v25, %v2464_v24 }
 0x3ba   :  { %v2544_v32 = vadd.f32 %v2986_v26, %v2504_v31 }
 0x3bc   :  { %v2552_v51 = vsel %vm2551_vm1, %v2544_v32, -1e+30 }
 0x3bd   :  { %2553 = vmax.xlane.f32.xlu0 %v2552_v51 }
 0x44a   :  { %v2554_v33 = vpop.xlane.xlu0 %2553 }
 0x44b   :  { %v2555_v34 = vsub.f32 %v2552_v51, %v2554_v33 }
 0x44d   :  { %v2556_v35 = vmul.f32 1.442695, %v2555_v34 }
 0x44f   :  { %3348 = vpow2.f32 %v2556_v35 }
 0x459   :  { %v3349_v36 = vpop.eup %3348 }
 0x45a   :  { %2558 = vadd.xlane.f32.xlu0 %v3349_v36 }
 0x4e7   :  { %v2559_v37 = vpop.xlane.xlu0 %2558 }
 0x4e8   :  { %3350 = vrcp.f32 %v2559_v37 }
 0x4f2   :  { %v3351_v5 = vpop.eup %3350 }
 0x4f3   :  { %v2561_v38 = vmul.f32 %v3351_v5, %v3349_v36 }
 0x4f5   :  { %v2563_v39 = vsel %vm2562_vm2, %v2544_v32, %v2561_v38 }
 0x4f6   :  { %2564 = vst [vmem:[#allocation13] sm:$0xff] %v2563_v39 }
 0x4f7   :  { %3495 = shalt.err (!%p3492_p10)
}
 0x4f8   :  { %s3496_s26 = scalar_lea.hbm %s3761_s9, 128 }
 0x4f9   :  { %p3497_p11 = scmp.ne.s32.totalorder %s3761_s9, %s3496_s26  ;;  %p3500_p12 = scmp.lt.u32.totalorder %s3496_s26, %s3761_s9 }
 0x4fb   :  { %p3502_p13 = pnand %p3500_p12, %p3497_p11 }
 0x4fd   :  { %3505 = shalt.err (!%p3502_p13)
}
 0x4fe   :  { %2574 = dma.vmem_to_hbm [thread:$0]  %s2572_s21, 128, %s3761_s9, [#allocation4]  }
 0x4ff   :  { %3514 = dma.done.wait [#allocation4], 128  }
 0x500   :  { %3515 = vsyncadd [#allocation4], 4294967168 }
 0x501   :  { %2578 = vsyncpa [#allocation3], 1 }
 0x502   :  { %2579 = vsyncpa [#allocation6], 1 }
 0x503   :  { %2580 = vsyncpa [#allocation9], 1 }
 0x504   :  { %2581 = vsyncpa [#allocation12], 1 }
 0x505   :  { %2582 = vsyncpa [#allocation4], 1 }

</bundles_post_ra>
